<compile_context>
chip_gen: v5e
topology: v5e:2x2
jax: 0.10.0
libtpu: 0.0.40
codegen_flags: <defaults>
</compile_context>

<pallas_src>
import functools

import jax
import jax.numpy as jnp
from jax import lax
from jax.experimental import pallas as pl
from jax.experimental.pallas import tpu as pltpu


# ----------------------------------------------------------------------------
# Kernel helpers (traced inside the kernel body)
# ----------------------------------------------------------------------------
def _lstm_cell(gates, c_prev, hidden):
    """One LSTM cell update, PyTorch gate order (i, f, g, o).

    One sigmoid pass over the whole (B, 4H) block (4H = 128 lanes = one vreg),
    tanh only on the g slab and the new cell state.
    """
    H = hidden
    s = jax.nn.sigmoid(gates)                      # i | f | (unused) | o
    g = jnp.tanh(gates[:, 2 * H:3 * H])
    c = s[:, H:2 * H] * c_prev + s[:, 0:H] * g
    h = s[:, 3 * H:4 * H] * jnp.tanh(c)
    return h, c


def _row_offset(t, batch):
    """Row offset t*batch; hint alignment when t is a traced index."""
    off = t * batch
    if isinstance(off, int):
        return off
    return pl.multiple_of(off, batch)


# ----------------------------------------------------------------------------
# Fused kernel: all layers, both directions, FC head — single invocation
# ----------------------------------------------------------------------------
def _fused_bilstm_fc_kernel(*refs, seq_len, batch, hidden, num_layers, unroll_time):
    T, B, H = seq_len, batch, hidden
    H2, H4 = 2 * H, 4 * H

    x_ref = refs[0]
    idx = 1
    layer_refs = []
    for _ in range(num_layers):
        # (wih_f, b_f, wih_b, b_b, whh_blockdiag)
        layer_refs.append(tuple(refs[idx:idx + 5]))
        idx += 5
    fc_w_ref, fc_b_ref = refs[idx], refs[idx + 1]
    y_ref = refs[idx + 2]
    scratch = list(refs[idx + 3:])
    gxf_scr = scratch[0]                                   # (T*B, 4H)
    gxb_scr = scratch[1] if num_layers > 1 else None       # (T*B, 4H)
    out_scr = scratch[2] if num_layers > 1 else None       # (T*B, 2H)

    zeros_bh = jnp.zeros((B, H), jnp.float32)
    inp_ref = x_ref                                        # current layer input (T*B, d_in)

    for layer in range(num_layers):
        wih_f, b_f, wih_b, b_b, whh_blk = layer_refs[layer]
        last = layer == num_layers - 1

        # Hoisted input projection: one big MXU matmul (M = T*B) per direction,
        # parked in VMEM scratch so per-step reads are pl.ds slices, not live vregs.
        inp = inp_ref[...]
        gxf_scr[...] = jnp.dot(inp, wih_f[...],
                               preferred_element_type=jnp.float32) + b_f[...]

        if not last:
            gxb_scr[...] = jnp.dot(inp, wih_b[...],
                                   preferred_element_type=jnp.float32) + b_b[...]

            def step(t, h_cat, c_f, c_b,
                     whh_blk=whh_blk, gxf_scr=gxf_scr, gxb_scr=gxb_scr,
                     out_scr=out_scr):
                tb = T - 1 - t
                off_f = _row_offset(t, B)
                off_b = _row_offset(tb, B)
                # One block-diagonal recurrent matmul covers both directions
                # (zero off-diagonal halves are free on the under-filled MXU).
                rec = jnp.dot(h_cat, whh_blk[...],
                              preferred_element_type=jnp.float32)     # (B, 8H)
                gf = gxf_scr[pl.ds(off_f, B), :] + rec[:, 0:H4]
                gb = gxb_scr[pl.ds(off_b, B), :] + rec[:, H4:2 * H4]
                h_f, c_f = _lstm_cell(gf, c_f, H)
                h_b, c_b = _lstm_cell(gb, c_b, H)
                out_scr[pl.ds(off_f, B), 0:H] = h_f
                out_scr[pl.ds(off_b, B), H:H2] = h_b
                return jnp.concatenate([h_f, h_b], axis=1), c_f, c_b

            init = (jnp.zeros((B, H2), jnp.float32), zeros_bh, zeros_bh)
            if unroll_time:
                carry = init
                for t in range(T):
                    carry = step(t, *carry)
            else:
                _ = lax.fori_loop(0, T, lambda t, c: step(t, *c), init, unroll=2)

            inp_ref = out_scr
        else:
            # --- last layer ---
            # Backward direction: out[:, -1, :] only needs ONE backward step (the
            # first of the reversed scan from zero init => recurrent term vanishes).
            # NOTE: valid only because h0 = c0 = 0 and only the last time step
            # feeds the FC head; revisit if initial state / full-seq output / inter-
            # layer dropout are ever added.
            x_last = inp_ref[(T - 1) * B:T * B, :]
            gb = jnp.dot(x_last, wih_b[...],
                         preferred_element_type=jnp.float32) + b_b[...]
            h_b, _ = _lstm_cell(gb, zeros_bh, H)
            # Hoist the backward half of the FC head ahead of the serial forward
            # chain so the scheduler can overlap it with the recurrence.
            y_b = jnp.dot(h_b, fc_w_ref[H:H2, :],
                          preferred_element_type=jnp.float32) + fc_b_ref[...]

            def fstep(t, h_f, c_f, whh_blk=whh_blk, gxf_scr=gxf_scr):
                off = _row_offset(t, B)
                # Forward block of the block-diagonal weight; read from the ref
                # near the use (re-reads are free, avoids spills once H grows).
                g = gxf_scr[pl.ds(off, B), :] + jnp.dot(
                    h_f, whh_blk[0:H, 0:H4], preferred_element_type=jnp.float32)
                return _lstm_cell(g, c_f, H)

            if unroll_time:
                h_f, c_f = zeros_bh, zeros_bh
                for t in range(T):
                    h_f, c_f = fstep(t, h_f, c_f)
            else:
                h_f, c_f = lax.fori_loop(
                    0, T, lambda t, hc: fstep(t, *hc), (zeros_bh, zeros_bh),
                    unroll=2)

            # Fused FC head: [h_f | h_b] @ W_fc^T + b == h_f@W[:H] + h_b@W[H:] + b
            y_ref[...] = y_b + jnp.dot(h_f, fc_w_ref[0:H, :],
                                       preferred_element_type=jnp.float32)


# ----------------------------------------------------------------------------
# Wrapper
# ----------------------------------------------------------------------------
def lstm_forecaster_forward(x_btd, params, hidden_size):
    """x_btd: (B, T, input_size) -> (B, out_len). Matches the PyTorch module."""
    B, T, D = x_btd.shape
    H = hidden_size
    out_len = params["fc_w_t"].shape[1]
    num_layers = len(params["lstm"])

    # Pad batch to a sublane multiple so per-step matmuls / elementwise are sublane-full.
    B_pad = max(8, -(-B // 8) * 8)
    x_t = jnp.transpose(x_btd, (1, 0, 2))                  # (T, B, D) time-major
    if B_pad != B:
        x_t = jnp.pad(x_t, ((0, 0), (0, B_pad - B), (0, 0)))
    x_flat = x_t.reshape(T * B_pad, D)                     # time-major flattened rows

    flat_inputs = [x_flat]
    for (wih_f, whh_f, b_f), (wih_b, whh_b, b_b) in params["lstm"]:
        # Block-diagonal recurrent weight: one per-step MXU matmul for both directions.
        whh_blk = jnp.zeros((2 * H, 8 * H), jnp.float32)
        whh_blk = whh_blk.at[0:H, 0:4 * H].set(whh_f)
        whh_blk = whh_blk.at[H:2 * H, 4 * H:8 * H].set(whh_b)
        flat_inputs += [wih_f, b_f, wih_b, b_b, whh_blk]
    flat_inputs += [params["fc_w_t"], params["fc_b"]]

    scratch_shapes = [pltpu.VMEM((T * B_pad, 4 * H), jnp.float32)]   # fwd gates
    scr_elems = T * B_pad * 4 * H
    if num_layers > 1:
        scratch_shapes += [pltpu.VMEM((T * B_pad, 4 * H), jnp.float32),  # bwd gates
                           pltpu.VMEM((T * B_pad, 2 * H), jnp.float32)]  # layer output
        scr_elems += T * B_pad * 6 * H

    in_bytes = sum(int(a.size) * a.dtype.itemsize for a in flat_inputs)
    scr_bytes = 4 * scr_elems
    vmem_limit = int(min(64 * 1024 * 1024,
                         max(32 * 1024 * 1024, 2 * (in_bytes + scr_bytes))))

    unroll_time = T <= 32  # full unroll only for tiny T; fori_loop(unroll=2) otherwise

    kernel = functools.partial(
        _fused_bilstm_fc_kernel,
        seq_len=T, batch=B_pad, hidden=H, num_layers=num_layers,
        unroll_time=unroll_time)

    y = pl.pallas_call(
        kernel,
        out_shape=jax.ShapeDtypeStruct((B_pad, out_len), jnp.float32),
        in_specs=[pl.BlockSpec(memory_space=pltpu.MemorySpace.VMEM)] * len(flat_inputs),
        out_specs=pl.BlockSpec(memory_space=pltpu.MemorySpace.VMEM),
        scratch_shapes=scratch_shapes,
        compiler_params=pltpu.CompilerParams(vmem_limit_bytes=vmem_limit),
    )(*flat_inputs)
    return y[:B]


# ----------------------------------------------------------------------------
# Parameter init (PyTorch-like uniform U(-1/sqrt(H), 1/sqrt(H)))
# ----------------------------------------------------------------------------
def init_params(key, input_size, hidden_size, num_layers, out_len):
    k = 1.0 / jnp.sqrt(jnp.float32(hidden_size))
    params = {"lstm": []}
    for layer in range(num_layers):
        d_in = input_size if layer == 0 else 2 * hidden_size
        dirs = []
        for _ in range(2):  # forward, backward
            key, k1, k2, k3, k4 = jax.random.split(key, 5)
            w_ih = jax.random.uniform(k1, (4 * hidden_size, d_in), jnp.float32, -k, k)
            w_hh = jax.random.uniform(k2, (4 * hidden_size, hidden_size), jnp.float32, -k, k)
            b_ih = jax.random.uniform(k3, (4 * hidden_size,), jnp.float32, -k, k)
            b_hh = jax.random.uniform(k4, (4 * hidden_size,), jnp.float32, -k, k)
            dirs.append(
                (
                    jnp.transpose(w_ih),                 # (d_in, 4H)
                    jnp.transpose(w_hh),                 # (H, 4H)
                    (b_ih + b_hh).reshape(1, -1),        # (1, 4H)
                )
            )
        params["lstm"].append(tuple(dirs))
    key, k1, k2 = jax.random.split(key, 3)
    kf = 1.0 / jnp.sqrt(jnp.float32(2 * hidden_size))
    fc_w = jax.random.uniform(k1, (out_len, 2 * hidden_size), jnp.float32, -kf, kf)
    fc_b = jax.random.uniform(k2, (out_len,), jnp.float32, -kf, kf)
    params["fc_w_t"] = jnp.transpose(fc_w)          # (2H, out_len)
    params["fc_b"] = fc_b.reshape(1, -1)            # (1, out_len)
    return params


# ----------------------------------------------------------------------------
# Pure-JAX reference (correctness check; full bidirectional pass, no shortcuts)
# ----------------------------------------------------------------------------
def _ref_direction(x_tbd, w_ih_t, w_hh_t, bias, hidden):
    H = hidden

    def step(carry, x_t):
        h, c = carry
        gates = x_t @ w_ih_t + h @ w_hh_t + bias
        i = jax.nn.sigmoid(gates[:, 0:H])
        f = jax.nn.sigmoid(gates[:, H:2 * H])
        g = jnp.tanh(gates[:, 2 * H:3 * H])
        o = jax.nn.sigmoid(gates[:, 3 * H:4 * H])
        c = f * c + i * g
        h = o * jnp.tanh(c)
        return (h, c), h

    B = x_tbd.shape[1]
    init = (jnp.zeros((B, H), jnp.float32), jnp.zeros((B, H), jnp.float32))
    _, hs = jax.lax.scan(step, init, x_tbd)
    return hs


def reference_forward(x_btd, params, hidden_size):
    x = jnp.transpose(x_btd, (1, 0, 2))
    for (wih_f, whh_f, b_f), (wih_b, whh_b, b_b) in params["lstm"]:
        out_f = _ref_direction(x, wih_f, whh_f, b_f, hidden_size)
        out_b = _ref_direction(x[::-1], wih_b, whh_b, b_b, hidden_size)[::-1]
        x = jnp.concatenate([out_f, out_b], axis=-1)
    return x[-1] @ params["fc_w_t"] + params["fc_b"]


# ----------------------------------------------------------------------------
if __name__ == "__main__":
    # Small shapes consistent with the module's forward.
    batch, seq_len = 2, 8
    input_size, hidden_size, num_layers, out_len = 16, 32, 2, 4

    key = jax.random.PRNGKey(0)
    key, pk, xk = jax.random.split(key, 3)
    params = init_params(pk, input_size, hidden_size, num_layers, out_len)
    x = jax.random.normal(xk, (batch, seq_len, input_size), jnp.float32)

    y = lstm_forecaster_forward(x, params, hidden_size)
    y = jax.block_until_ready(y)

    y_ref = reference_forward(x, params, hidden_size)
    assert y.shape == (batch, out_len)
    assert jnp.allclose(y, y_ref, rtol=1e-4, atol=1e-4), "mismatch vs JAX reference"

    print("KERNEL_OK")
</pallas_src>

<mosaic_0001>
module attributes {stable_mosaic.version = 11 : i64} {
  func.func @_fused_bilstm_fc_kernel(%arg0: memref<64x16xf32, #tpu.memory_space<vmem>>, %arg1: memref<16x128xf32, #tpu.memory_space<vmem>>, %arg2: memref<1x128xf32, #tpu.memory_space<vmem>>, %arg3: memref<16x128xf32, #tpu.memory_space<vmem>>, %arg4: memref<1x128xf32, #tpu.memory_space<vmem>>, %arg5: memref<64x256xf32, #tpu.memory_space<vmem>>, %arg6: memref<64x128xf32, #tpu.memory_space<vmem>>, %arg7: memref<1x128xf32, #tpu.memory_space<vmem>>, %arg8: memref<64x128xf32, #tpu.memory_space<vmem>>, %arg9: memref<1x128xf32, #tpu.memory_space<vmem>>, %arg10: memref<64x256xf32, #tpu.memory_space<vmem>>, %arg11: memref<64x4xf32, #tpu.memory_space<vmem>>, %arg12: memref<1x4xf32, #tpu.memory_space<vmem>>, %arg13: memref<8x4xf32, #tpu.memory_space<vmem>>, %arg14: memref<64x128xf32, #tpu.memory_space<vmem>>, %arg15: memref<64x128xf32, #tpu.memory_space<vmem>>, %arg16: memref<64x64xf32, #tpu.memory_space<vmem>>) attributes {dimension_semantics = [], scalar_prefetch = 0 : i64, scratch_operands = 3 : i64, tpu.core_type = #tpu.core_type<tc>} {
    %cst = arith.constant 0.000000e+00 : f32
    %0 = vector.broadcast %cst : f32 to vector<8x32xf32>
    %c0 = arith.constant 0 : index
    %c0_0 = arith.constant 0 : index
    %1 = vector.load %arg0[%c0, %c0_0] : memref<64x16xf32, #tpu.memory_space<vmem>>, vector<64x16xf32>
    %c0_1 = arith.constant 0 : index
    %c0_2 = arith.constant 0 : index
    %2 = vector.load %arg1[%c0_1, %c0_2] : memref<16x128xf32, #tpu.memory_space<vmem>>, vector<16x128xf32>
    %cst_3 = arith.constant dense<0.000000e+00> : vector<64x128xf32>
    %3 = tpu.matmul %1, %2, %cst_3 {dimension_numbers = #tpu.dot_dimension_numbers<[1], [0], [0], [1], [0, 0, 1, 1], [], []>} : vector<64x16xf32>, vector<16x128xf32>, vector<64x128xf32> -> vector<64x128xf32>
    %c0_4 = arith.constant 0 : index
    %c0_5 = arith.constant 0 : index
    %4 = vector.load %arg2[%c0_4, %c0_5] : memref<1x128xf32, #tpu.memory_space<vmem>>, vector<1x128xf32>
    %5 = vector.broadcast %4 : vector<1x128xf32> to vector<64x128xf32>
    %6 = arith.addf %3, %5 : vector<64x128xf32>
    %c0_6 = arith.constant 0 : index
    %c0_7 = arith.constant 0 : index
    %7 = vector.load %arg14[%c0_6, %c0_7] : memref<64x128xf32, #tpu.memory_space<vmem>>, vector<64x128xf32>
    tpu.vector_store %arg14[%c0_6, %c0_7], %6 {strides = array<i32>} : memref<64x128xf32, #tpu.memory_space<vmem>>, vector<64x128xf32>,
    %c0_8 = arith.constant 0 : index
    %c0_9 = arith.constant 0 : index
    %8 = vector.load %arg3[%c0_8, %c0_9] : memref<16x128xf32, #tpu.memory_space<vmem>>, vector<16x128xf32>
    %cst_10 = arith.constant dense<0.000000e+00> : vector<64x128xf32>
    %9 = tpu.matmul %1, %8, %cst_10 {dimension_numbers = #tpu.dot_dimension_numbers<[1], [0], [0], [1], [0, 0, 1, 1], [], []>} : vector<64x16xf32>, vector<16x128xf32>, vector<64x128xf32> -> vector<64x128xf32>
    %c0_11 = arith.constant 0 : index
    %c0_12 = arith.constant 0 : index
    %10 = vector.load %arg4[%c0_11, %c0_12] : memref<1x128xf32, #tpu.memory_space<vmem>>, vector<1x128xf32>
    %11 = vector.broadcast %10 : vector<1x128xf32> to vector<64x128xf32>
    %12 = arith.addf %9, %11 : vector<64x128xf32>
    %c0_13 = arith.constant 0 : index
    %c0_14 = arith.constant 0 : index
    %13 = vector.load %arg15[%c0_13, %c0_14] : memref<64x128xf32, #tpu.memory_space<vmem>>, vector<64x128xf32>
    tpu.vector_store %arg15[%c0_13, %c0_14], %12 {strides = array<i32>} : memref<64x128xf32, #tpu.memory_space<vmem>>, vector<64x128xf32>,
    %cst_15 = arith.constant 0.000000e+00 : f32
    %14 = vector.broadcast %cst_15 : f32 to vector<8x64xf32>
    %c0_16 = arith.constant 0 : index
    %c0_17 = arith.constant 0 : index
    %15 = vector.load %arg5[%c0_16, %c0_17] : memref<64x256xf32, #tpu.memory_space<vmem>>, vector<64x256xf32>
    %cst_18 = arith.constant dense<0.000000e+00> : vector<8x256xf32>
    %16 = tpu.matmul %14, %15, %cst_18 {dimension_numbers = #tpu.dot_dimension_numbers<[1], [0], [0], [1], [0, 0, 1, 1], [], []>} : vector<8x64xf32>, vector<64x256xf32>, vector<8x256xf32> -> vector<8x256xf32>
    %c0_19 = arith.constant 0 : index
    %c0_20 = arith.constant 0 : index
    %17 = vector.load %arg14[%c0_19, %c0_20] : memref<64x128xf32, #tpu.memory_space<vmem>>, vector<8x128xf32>
    %18 = vector.extract_strided_slice %16 {offsets = [0, 0], sizes = [8, 128], strides = [1, 1]} : vector<8x256xf32> to vector<8x128xf32>
    %19 = arith.addf %17, %18 : vector<8x128xf32>
    %c56 = arith.constant 56 : index
    %c0_21 = arith.constant 0 : index
    %20 = vector.load %arg15[%c56, %c0_21] : memref<64x128xf32, #tpu.memory_space<vmem>>, vector<8x128xf32>
    %21 = vector.extract_strided_slice %16 {offsets = [0, 128], sizes = [8, 128], strides = [1, 1]} : vector<8x256xf32> to vector<8x128xf32>
    %22 = arith.addf %20, %21 : vector<8x128xf32>
    %23 = arith.negf %19 : vector<8x128xf32>
    %24 = math.exp %23 : vector<8x128xf32>
    %cst_22 = arith.constant 1.000000e+00 : f32
    %25 = vector.broadcast %cst_22 : f32 to vector<8x128xf32>
    %26 = arith.addf %25, %24 : vector<8x128xf32>
    %27 = arith.divf %25, %26 : vector<8x128xf32>
    %28 = vector.extract_strided_slice %19 {offsets = [0, 64], sizes = [8, 32], strides = [1, 1]} : vector<8x128xf32> to vector<8x32xf32>
    %29 = math.tanh %28 : vector<8x32xf32>
    %30 = vector.extract_strided_slice %27 {offsets = [0, 32], sizes = [8, 32], strides = [1, 1]} : vector<8x128xf32> to vector<8x32xf32>
    %31 = arith.mulf %30, %0 : vector<8x32xf32>
    %32 = vector.extract_strided_slice %27 {offsets = [0, 0], sizes = [8, 32], strides = [1, 1]} : vector<8x128xf32> to vector<8x32xf32>
    %33 = arith.mulf %32, %29 : vector<8x32xf32>
    %34 = arith.addf %31, %33 : vector<8x32xf32>
    %35 = vector.extract_strided_slice %27 {offsets = [0, 96], sizes = [8, 32], strides = [1, 1]} : vector<8x128xf32> to vector<8x32xf32>
    %36 = math.tanh %34 : vector<8x32xf32>
    %37 = arith.mulf %35, %36 : vector<8x32xf32>
    %38 = arith.negf %22 : vector<8x128xf32>
    %39 = math.exp %38 : vector<8x128xf32>
    %cst_23 = arith.constant 1.000000e+00 : f32
    %40 = vector.broadcast %cst_23 : f32 to vector<8x128xf32>
    %41 = arith.addf %40, %39 : vector<8x128xf32>
    %42 = arith.divf %40, %41 : vector<8x128xf32>
    %43 = vector.extract_strided_slice %22 {offsets = [0, 64], sizes = [8, 32], strides = [1, 1]} : vector<8x128xf32> to vector<8x32xf32>
    %44 = math.tanh %43 : vector<8x32xf32>
    %45 = vector.extract_strided_slice %42 {offsets = [0, 32], sizes = [8, 32], strides = [1, 1]} : vector<8x128xf32> to vector<8x32xf32>
    %46 = arith.mulf %45, %0 : vector<8x32xf32>
    %47 = vector.extract_strided_slice %42 {offsets = [0, 0], sizes = [8, 32], strides = [1, 1]} : vector<8x128xf32> to vector<8x32xf32>
    %48 = arith.mulf %47, %44 : vector<8x32xf32>
    %49 = arith.addf %46, %48 : vector<8x32xf32>
    %50 = vector.extract_strided_slice %42 {offsets = [0, 96], sizes = [8, 32], strides = [1, 1]} : vector<8x128xf32> to vector<8x32xf32>
    %51 = math.tanh %49 : vector<8x32xf32>
    %52 = arith.mulf %50, %51 : vector<8x32xf32>
    %c0_24 = arith.constant 0 : index
    %c0_25 = arith.constant 0 : index
    %53 = vector.load %arg16[%c0_24, %c0_25] : memref<64x64xf32, #tpu.memory_space<vmem>>, vector<8x32xf32>
    tpu.vector_store %arg16[%c0_24, %c0_25], %37 {strides = array<i32>} : memref<64x64xf32, #tpu.memory_space<vmem>>, vector<8x32xf32>,
    %c56_26 = arith.constant 56 : index
    %c32 = arith.constant 32 : index
    %54 = vector.load %arg16[%c56_26, %c32] : memref<64x64xf32, #tpu.memory_space<vmem>>, vector<8x32xf32>
    tpu.vector_store %arg16[%c56_26, %c32], %52 {strides = array<i32>} : memref<64x64xf32, #tpu.memory_space<vmem>>, vector<8x32xf32>,
    %55 = tpu.concatenate %37, %52 in 1 : vector<8x32xf32>, vector<8x32xf32> -> vector<8x64xf32>
    %c0_27 = arith.constant 0 : index
    %c0_28 = arith.constant 0 : index
    %56 = vector.load %arg5[%c0_27, %c0_28] : memref<64x256xf32, #tpu.memory_space<vmem>>, vector<64x256xf32>
    %cst_29 = arith.constant dense<0.000000e+00> : vector<8x256xf32>
    %57 = tpu.matmul %55, %56, %cst_29 {dimension_numbers = #tpu.dot_dimension_numbers<[1], [0], [0], [1], [0, 0, 1, 1], [], []>} : vector<8x64xf32>, vector<64x256xf32>, vector<8x256xf32> -> vector<8x256xf32>
    %c8 = arith.constant 8 : index
    %c0_30 = arith.constant 0 : index
    %58 = vector.load %arg14[%c8, %c0_30] : memref<64x128xf32, #tpu.memory_space<vmem>>, vector<8x128xf32>
    %59 = vector.extract_strided_slice %57 {offsets = [0, 0], sizes = [8, 128], strides = [1, 1]} : vector<8x256xf32> to vector<8x128xf32>
    %60 = arith.addf %58, %59 : vector<8x128xf32>
    %c48 = arith.constant 48 : index
    %c0_31 = arith.constant 0 : index
    %61 = vector.load %arg15[%c48, %c0_31] : memref<64x128xf32, #tpu.memory_space<vmem>>, vector<8x128xf32>
    %62 = vector.extract_strided_slice %57 {offsets = [0, 128], sizes = [8, 128], strides = [1, 1]} : vector<8x256xf32> to vector<8x128xf32>
    %63 = arith.addf %61, %62 : vector<8x128xf32>
    %64 = arith.negf %60 : vector<8x128xf32>
    %65 = math.exp %64 : vector<8x128xf32>
    %cst_32 = arith.constant 1.000000e+00 : f32
    %66 = vector.broadcast %cst_32 : f32 to vector<8x128xf32>
    %67 = arith.addf %66, %65 : vector<8x128xf32>
    %68 = arith.divf %66, %67 : vector<8x128xf32>
    %69 = vector.extract_strided_slice %60 {offsets = [0, 64], sizes = [8, 32], strides = [1, 1]} : vector<8x128xf32> to vector<8x32xf32>
    %70 = math.tanh %69 : vector<8x32xf32>
    %71 = vector.extract_strided_slice %68 {offsets = [0, 32], sizes = [8, 32], strides = [1, 1]} : vector<8x128xf32> to vector<8x32xf32>
    %72 = arith.mulf %71, %34 : vector<8x32xf32>
    %73 = vector.extract_strided_slice %68 {offsets = [0, 0], sizes = [8, 32], strides = [1, 1]} : vector<8x128xf32> to vector<8x32xf32>
    %74 = arith.mulf %73, %70 : vector<8x32xf32>
    %75 = arith.addf %72, %74 : vector<8x32xf32>
    %76 = vector.extract_strided_slice %68 {offsets = [0, 96], sizes = [8, 32], strides = [1, 1]} : vector<8x128xf32> to vector<8x32xf32>
    %77 = math.tanh %75 : vector<8x32xf32>
    %78 = arith.mulf %76, %77 : vector<8x32xf32>
    %79 = arith.negf %63 : vector<8x128xf32>
    %80 = math.exp %79 : vector<8x128xf32>
    %cst_33 = arith.constant 1.000000e+00 : f32
    %81 = vector.broadcast %cst_33 : f32 to vector<8x128xf32>
    %82 = arith.addf %81, %80 : vector<8x128xf32>
    %83 = arith.divf %81, %82 : vector<8x128xf32>
    %84 = vector.extract_strided_slice %63 {offsets = [0, 64], sizes = [8, 32], strides = [1, 1]} : vector<8x128xf32> to vector<8x32xf32>
    %85 = math.tanh %84 : vector<8x32xf32>
    %86 = vector.extract_strided_slice %83 {offsets = [0, 32], sizes = [8, 32], strides = [1, 1]} : vector<8x128xf32> to vector<8x32xf32>
    %87 = arith.mulf %86, %49 : vector<8x32xf32>
    %88 = vector.extract_strided_slice %83 {offsets = [0, 0], sizes = [8, 32], strides = [1, 1]} : vector<8x128xf32> to vector<8x32xf32>
    %89 = arith.mulf %88, %85 : vector<8x32xf32>
    %90 = arith.addf %87, %89 : vector<8x32xf32>
    %91 = vector.extract_strided_slice %83 {offsets = [0, 96], sizes = [8, 32], strides = [1, 1]} : vector<8x128xf32> to vector<8x32xf32>
    %92 = math.tanh %90 : vector<8x32xf32>
    %93 = arith.mulf %91, %92 : vector<8x32xf32>
    %c8_34 = arith.constant 8 : index
    %c0_35 = arith.constant 0 : index
    %94 = vector.load %arg16[%c8_34, %c0_35] : memref<64x64xf32, #tpu.memory_space<vmem>>, vector<8x32xf32>
    tpu.vector_store %arg16[%c8_34, %c0_35], %78 {strides = array<i32>} : memref<64x64xf32, #tpu.memory_space<vmem>>, vector<8x32xf32>,
    %c48_36 = arith.constant 48 : index
    %c32_37 = arith.constant 32 : index
    %95 = vector.load %arg16[%c48_36, %c32_37] : memref<64x64xf32, #tpu.memory_space<vmem>>, vector<8x32xf32>
    tpu.vector_store %arg16[%c48_36, %c32_37], %93 {strides = array<i32>} : memref<64x64xf32, #tpu.memory_space<vmem>>, vector<8x32xf32>,
    %96 = tpu.concatenate %78, %93 in 1 : vector<8x32xf32>, vector<8x32xf32> -> vector<8x64xf32>
    %c0_38 = arith.constant 0 : index
    %c0_39 = arith.constant 0 : index
    %97 = vector.load %arg5[%c0_38, %c0_39] : memref<64x256xf32, #tpu.memory_space<vmem>>, vector<64x256xf32>
    %cst_40 = arith.constant dense<0.000000e+00> : vector<8x256xf32>
    %98 = tpu.matmul %96, %97, %cst_40 {dimension_numbers = #tpu.dot_dimension_numbers<[1], [0], [0], [1], [0, 0, 1, 1], [], []>} : vector<8x64xf32>, vector<64x256xf32>, vector<8x256xf32> -> vector<8x256xf32>
    %c16 = arith.constant 16 : index
    %c0_41 = arith.constant 0 : index
    %99 = vector.load %arg14[%c16, %c0_41] : memref<64x128xf32, #tpu.memory_space<vmem>>, vector<8x128xf32>
    %100 = vector.extract_strided_slice %98 {offsets = [0, 0], sizes = [8, 128], strides = [1, 1]} : vector<8x256xf32> to vector<8x128xf32>
    %101 = arith.addf %99, %100 : vector<8x128xf32>
    %c40 = arith.constant 40 : index
    %c0_42 = arith.constant 0 : index
    %102 = vector.load %arg15[%c40, %c0_42] : memref<64x128xf32, #tpu.memory_space<vmem>>, vector<8x128xf32>
    %103 = vector.extract_strided_slice %98 {offsets = [0, 128], sizes = [8, 128], strides = [1, 1]} : vector<8x256xf32> to vector<8x128xf32>
    %104 = arith.addf %102, %103 : vector<8x128xf32>
    %105 = arith.negf %101 : vector<8x128xf32>
    %106 = math.exp %105 : vector<8x128xf32>
    %cst_43 = arith.constant 1.000000e+00 : f32
    %107 = vector.broadcast %cst_43 : f32 to vector<8x128xf32>
    %108 = arith.addf %107, %106 : vector<8x128xf32>
    %109 = arith.divf %107, %108 : vector<8x128xf32>
    %110 = vector.extract_strided_slice %101 {offsets = [0, 64], sizes = [8, 32], strides = [1, 1]} : vector<8x128xf32> to vector<8x32xf32>
    %111 = math.tanh %110 : vector<8x32xf32>
    %112 = vector.extract_strided_slice %109 {offsets = [0, 32], sizes = [8, 32], strides = [1, 1]} : vector<8x128xf32> to vector<8x32xf32>
    %113 = arith.mulf %112, %75 : vector<8x32xf32>
    %114 = vector.extract_strided_slice %109 {offsets = [0, 0], sizes = [8, 32], strides = [1, 1]} : vector<8x128xf32> to vector<8x32xf32>
    %115 = arith.mulf %114, %111 : vector<8x32xf32>
    %116 = arith.addf %113, %115 : vector<8x32xf32>
    %117 = vector.extract_strided_slice %109 {offsets = [0, 96], sizes = [8, 32], strides = [1, 1]} : vector<8x128xf32> to vector<8x32xf32>
    %118 = math.tanh %116 : vector<8x32xf32>
    %119 = arith.mulf %117, %118 : vector<8x32xf32>
    %120 = arith.negf %104 : vector<8x128xf32>
    %121 = math.exp %120 : vector<8x128xf32>
    %cst_44 = arith.constant 1.000000e+00 : f32
    %122 = vector.broadcast %cst_44 : f32 to vector<8x128xf32>
    %123 = arith.addf %122, %121 : vector<8x128xf32>
    %124 = arith.divf %122, %123 : vector<8x128xf32>
    %125 = vector.extract_strided_slice %104 {offsets = [0, 64], sizes = [8, 32], strides = [1, 1]} : vector<8x128xf32> to vector<8x32xf32>
    %126 = math.tanh %125 : vector<8x32xf32>
    %127 = vector.extract_strided_slice %124 {offsets = [0, 32], sizes = [8, 32], strides = [1, 1]} : vector<8x128xf32> to vector<8x32xf32>
    %128 = arith.mulf %127, %90 : vector<8x32xf32>
    %129 = vector.extract_strided_slice %124 {offsets = [0, 0], sizes = [8, 32], strides = [1, 1]} : vector<8x128xf32> to vector<8x32xf32>
    %130 = arith.mulf %129, %126 : vector<8x32xf32>
    %131 = arith.addf %128, %130 : vector<8x32xf32>
    %132 = vector.extract_strided_slice %124 {offsets = [0, 96], sizes = [8, 32], strides = [1, 1]} : vector<8x128xf32> to vector<8x32xf32>
    %133 = math.tanh %131 : vector<8x32xf32>
    %134 = arith.mulf %132, %133 : vector<8x32xf32>
    %c16_45 = arith.constant 16 : index
    %c0_46 = arith.constant 0 : index
    %135 = vector.load %arg16[%c16_45, %c0_46] : memref<64x64xf32, #tpu.memory_space<vmem>>, vector<8x32xf32>
    tpu.vector_store %arg16[%c16_45, %c0_46], %119 {strides = array<i32>} : memref<64x64xf32, #tpu.memory_space<vmem>>, vector<8x32xf32>,
    %c40_47 = arith.constant 40 : index
    %c32_48 = arith.constant 32 : index
    %136 = vector.load %arg16[%c40_47, %c32_48] : memref<64x64xf32, #tpu.memory_space<vmem>>, vector<8x32xf32>
    tpu.vector_store %arg16[%c40_47, %c32_48], %134 {strides = array<i32>} : memref<64x64xf32, #tpu.memory_space<vmem>>, vector<8x32xf32>,
    %137 = tpu.concatenate %119, %134 in 1 : vector<8x32xf32>, vector<8x32xf32> -> vector<8x64xf32>
    %c0_49 = arith.constant 0 : index
    %c0_50 = arith.constant 0 : index
    %138 = vector.load %arg5[%c0_49, %c0_50] : memref<64x256xf32, #tpu.memory_space<vmem>>, vector<64x256xf32>
    %cst_51 = arith.constant dense<0.000000e+00> : vector<8x256xf32>
    %139 = tpu.matmul %137, %138, %cst_51 {dimension_numbers = #tpu.dot_dimension_numbers<[1], [0], [0], [1], [0, 0, 1, 1], [], []>} : vector<8x64xf32>, vector<64x256xf32>, vector<8x256xf32> -> vector<8x256xf32>
    %c24 = arith.constant 24 : index
    %c0_52 = arith.constant 0 : index
    %140 = vector.load %arg14[%c24, %c0_52] : memref<64x128xf32, #tpu.memory_space<vmem>>, vector<8x128xf32>
    %141 = vector.extract_strided_slice %139 {offsets = [0, 0], sizes = [8, 128], strides = [1, 1]} : vector<8x256xf32> to vector<8x128xf32>
    %142 = arith.addf %140, %141 : vector<8x128xf32>
    %c32_53 = arith.constant 32 : index
    %c0_54 = arith.constant 0 : index
    %143 = vector.load %arg15[%c32_53, %c0_54] : memref<64x128xf32, #tpu.memory_space<vmem>>, vector<8x128xf32>
    %144 = vector.extract_strided_slice %139 {offsets = [0, 128], sizes = [8, 128], strides = [1, 1]} : vector<8x256xf32> to vector<8x128xf32>
    %145 = arith.addf %143, %144 : vector<8x128xf32>
    %146 = arith.negf %142 : vector<8x128xf32>
    %147 = math.exp %146 : vector<8x128xf32>
    %cst_55 = arith.constant 1.000000e+00 : f32
    %148 = vector.broadcast %cst_55 : f32 to vector<8x128xf32>
    %149 = arith.addf %148, %147 : vector<8x128xf32>
    %150 = arith.divf %148, %149 : vector<8x128xf32>
    %151 = vector.extract_strided_slice %142 {offsets = [0, 64], sizes = [8, 32], strides = [1, 1]} : vector<8x128xf32> to vector<8x32xf32>
    %152 = math.tanh %151 : vector<8x32xf32>
    %153 = vector.extract_strided_slice %150 {offsets = [0, 32], sizes = [8, 32], strides = [1, 1]} : vector<8x128xf32> to vector<8x32xf32>
    %154 = arith.mulf %153, %116 : vector<8x32xf32>
    %155 = vector.extract_strided_slice %150 {offsets = [0, 0], sizes = [8, 32], strides = [1, 1]} : vector<8x128xf32> to vector<8x32xf32>
    %156 = arith.mulf %155, %152 : vector<8x32xf32>
    %157 = arith.addf %154, %156 : vector<8x32xf32>
    %158 = vector.extract_strided_slice %150 {offsets = [0, 96], sizes = [8, 32], strides = [1, 1]} : vector<8x128xf32> to vector<8x32xf32>
    %159 = math.tanh %157 : vector<8x32xf32>
    %160 = arith.mulf %158, %159 : vector<8x32xf32>
    %161 = arith.negf %145 : vector<8x128xf32>
    %162 = math.exp %161 : vector<8x128xf32>
    %cst_56 = arith.constant 1.000000e+00 : f32
    %163 = vector.broadcast %cst_56 : f32 to vector<8x128xf32>
    %164 = arith.addf %163, %162 : vector<8x128xf32>
    %165 = arith.divf %163, %164 : vector<8x128xf32>
    %166 = vector.extract_strided_slice %145 {offsets = [0, 64], sizes = [8, 32], strides = [1, 1]} : vector<8x128xf32> to vector<8x32xf32>
    %167 = math.tanh %166 : vector<8x32xf32>
    %168 = vector.extract_strided_slice %165 {offsets = [0, 32], sizes = [8, 32], strides = [1, 1]} : vector<8x128xf32> to vector<8x32xf32>
    %169 = arith.mulf %168, %131 : vector<8x32xf32>
    %170 = vector.extract_strided_slice %165 {offsets = [0, 0], sizes = [8, 32], strides = [1, 1]} : vector<8x128xf32> to vector<8x32xf32>
    %171 = arith.mulf %170, %167 : vector<8x32xf32>
    %172 = arith.addf %169, %171 : vector<8x32xf32>
    %173 = vector.extract_strided_slice %165 {offsets = [0, 96], sizes = [8, 32], strides = [1, 1]} : vector<8x128xf32> to vector<8x32xf32>
    %174 = math.tanh %172 : vector<8x32xf32>
    %175 = arith.mulf %173, %174 : vector<8x32xf32>
    %c24_57 = arith.constant 24 : index
    %c0_58 = arith.constant 0 : index
    %176 = vector.load %arg16[%c24_57, %c0_58] : memref<64x64xf32, #tpu.memory_space<vmem>>, vector<8x32xf32>
    tpu.vector_store %arg16[%c24_57, %c0_58], %160 {strides = array<i32>} : memref<64x64xf32, #tpu.memory_space<vmem>>, vector<8x32xf32>,
    %c32_59 = arith.constant 32 : index
    %c32_60 = arith.constant 32 : index
    %177 = vector.load %arg16[%c32_59, %c32_60] : memref<64x64xf32, #tpu.memory_space<vmem>>, vector<8x32xf32>
    tpu.vector_store %arg16[%c32_59, %c32_60], %175 {strides = array<i32>} : memref<64x64xf32, #tpu.memory_space<vmem>>, vector<8x32xf32>,
    %178 = tpu.concatenate %160, %175 in 1 : vector<8x32xf32>, vector<8x32xf32> -> vector<8x64xf32>
    %c0_61 = arith.constant 0 : index
    %c0_62 = arith.constant 0 : index
    %179 = vector.load %arg5[%c0_61, %c0_62] : memref<64x256xf32, #tpu.memory_space<vmem>>, vector<64x256xf32>
    %cst_63 = arith.constant dense<0.000000e+00> : vector<8x256xf32>
    %180 = tpu.matmul %178, %179, %cst_63 {dimension_numbers = #tpu.dot_dimension_numbers<[1], [0], [0], [1], [0, 0, 1, 1], [], []>} : vector<8x64xf32>, vector<64x256xf32>, vector<8x256xf32> -> vector<8x256xf32>
    %c32_64 = arith.constant 32 : index
    %c0_65 = arith.constant 0 : index
    %181 = vector.load %arg14[%c32_64, %c0_65] : memref<64x128xf32, #tpu.memory_space<vmem>>, vector<8x128xf32>
    %182 = vector.extract_strided_slice %180 {offsets = [0, 0], sizes = [8, 128], strides = [1, 1]} : vector<8x256xf32> to vector<8x128xf32>
    %183 = arith.addf %181, %182 : vector<8x128xf32>
    %c24_66 = arith.constant 24 : index
    %c0_67 = arith.constant 0 : index
    %184 = vector.load %arg15[%c24_66, %c0_67] : memref<64x128xf32, #tpu.memory_space<vmem>>, vector<8x128xf32>
    %185 = vector.extract_strided_slice %180 {offsets = [0, 128], sizes = [8, 128], strides = [1, 1]} : vector<8x256xf32> to vector<8x128xf32>
    %186 = arith.addf %184, %185 : vector<8x128xf32>
    %187 = arith.negf %183 : vector<8x128xf32>
    %188 = math.exp %187 : vector<8x128xf32>
    %cst_68 = arith.constant 1.000000e+00 : f32
    %189 = vector.broadcast %cst_68 : f32 to vector<8x128xf32>
    %190 = arith.addf %189, %188 : vector<8x128xf32>
    %191 = arith.divf %189, %190 : vector<8x128xf32>
    %192 = vector.extract_strided_slice %183 {offsets = [0, 64], sizes = [8, 32], strides = [1, 1]} : vector<8x128xf32> to vector<8x32xf32>
    %193 = math.tanh %192 : vector<8x32xf32>
    %194 = vector.extract_strided_slice %191 {offsets = [0, 32], sizes = [8, 32], strides = [1, 1]} : vector<8x128xf32> to vector<8x32xf32>
    %195 = arith.mulf %194, %157 : vector<8x32xf32>
    %196 = vector.extract_strided_slice %191 {offsets = [0, 0], sizes = [8, 32], strides = [1, 1]} : vector<8x128xf32> to vector<8x32xf32>
    %197 = arith.mulf %196, %193 : vector<8x32xf32>
    %198 = arith.addf %195, %197 : vector<8x32xf32>
    %199 = vector.extract_strided_slice %191 {offsets = [0, 96], sizes = [8, 32], strides = [1, 1]} : vector<8x128xf32> to vector<8x32xf32>
    %200 = math.tanh %198 : vector<8x32xf32>
    %201 = arith.mulf %199, %200 : vector<8x32xf32>
    %202 = arith.negf %186 : vector<8x128xf32>
    %203 = math.exp %202 : vector<8x128xf32>
    %cst_69 = arith.constant 1.000000e+00 : f32
    %204 = vector.broadcast %cst_69 : f32 to vector<8x128xf32>
    %205 = arith.addf %204, %203 : vector<8x128xf32>
    %206 = arith.divf %204, %205 : vector<8x128xf32>
    %207 = vector.extract_strided_slice %186 {offsets = [0, 64], sizes = [8, 32], strides = [1, 1]} : vector<8x128xf32> to vector<8x32xf32>
    %208 = math.tanh %207 : vector<8x32xf32>
    %209 = vector.extract_strided_slice %206 {offsets = [0, 32], sizes = [8, 32], strides = [1, 1]} : vector<8x128xf32> to vector<8x32xf32>
    %210 = arith.mulf %209, %172 : vector<8x32xf32>
    %211 = vector.extract_strided_slice %206 {offsets = [0, 0], sizes = [8, 32], strides = [1, 1]} : vector<8x128xf32> to vector<8x32xf32>
    %212 = arith.mulf %211, %208 : vector<8x32xf32>
    %213 = arith.addf %210, %212 : vector<8x32xf32>
    %214 = vector.extract_strided_slice %206 {offsets = [0, 96], sizes = [8, 32], strides = [1, 1]} : vector<8x128xf32> to vector<8x32xf32>
    %215 = math.tanh %213 : vector<8x32xf32>
    %216 = arith.mulf %214, %215 : vector<8x32xf32>
    %c32_70 = arith.constant 32 : index
    %c0_71 = arith.constant 0 : index
    %217 = vector.load %arg16[%c32_70, %c0_71] : memref<64x64xf32, #tpu.memory_space<vmem>>, vector<8x32xf32>
    tpu.vector_store %arg16[%c32_70, %c0_71], %201 {strides = array<i32>} : memref<64x64xf32, #tpu.memory_space<vmem>>, vector<8x32xf32>,
    %c24_72 = arith.constant 24 : index
    %c32_73 = arith.constant 32 : index
    %218 = vector.load %arg16[%c24_72, %c32_73] : memref<64x64xf32, #tpu.memory_space<vmem>>, vector<8x32xf32>
    tpu.vector_store %arg16[%c24_72, %c32_73], %216 {strides = array<i32>} : memref<64x64xf32, #tpu.memory_space<vmem>>, vector<8x32xf32>,
    %219 = tpu.concatenate %201, %216 in 1 : vector<8x32xf32>, vector<8x32xf32> -> vector<8x64xf32>
    %c0_74 = arith.constant 0 : index
    %c0_75 = arith.constant 0 : index
    %220 = vector.load %arg5[%c0_74, %c0_75] : memref<64x256xf32, #tpu.memory_space<vmem>>, vector<64x256xf32>
    %cst_76 = arith.constant dense<0.000000e+00> : vector<8x256xf32>
    %221 = tpu.matmul %219, %220, %cst_76 {dimension_numbers = #tpu.dot_dimension_numbers<[1], [0], [0], [1], [0, 0, 1, 1], [], []>} : vector<8x64xf32>, vector<64x256xf32>, vector<8x256xf32> -> vector<8x256xf32>
    %c40_77 = arith.constant 40 : index
    %c0_78 = arith.constant 0 : index
    %222 = vector.load %arg14[%c40_77, %c0_78] : memref<64x128xf32, #tpu.memory_space<vmem>>, vector<8x128xf32>
    %223 = vector.extract_strided_slice %221 {offsets = [0, 0], sizes = [8, 128], strides = [1, 1]} : vector<8x256xf32> to vector<8x128xf32>
    %224 = arith.addf %222, %223 : vector<8x128xf32>
    %c16_79 = arith.constant 16 : index
    %c0_80 = arith.constant 0 : index
    %225 = vector.load %arg15[%c16_79, %c0_80] : memref<64x128xf32, #tpu.memory_space<vmem>>, vector<8x128xf32>
    %226 = vector.extract_strided_slice %221 {offsets = [0, 128], sizes = [8, 128], strides = [1, 1]} : vector<8x256xf32> to vector<8x128xf32>
    %227 = arith.addf %225, %226 : vector<8x128xf32>
    %228 = arith.negf %224 : vector<8x128xf32>
    %229 = math.exp %228 : vector<8x128xf32>
    %cst_81 = arith.constant 1.000000e+00 : f32
    %230 = vector.broadcast %cst_81 : f32 to vector<8x128xf32>
    %231 = arith.addf %230, %229 : vector<8x128xf32>
    %232 = arith.divf %230, %231 : vector<8x128xf32>
    %233 = vector.extract_strided_slice %224 {offsets = [0, 64], sizes = [8, 32], strides = [1, 1]} : vector<8x128xf32> to vector<8x32xf32>
    %234 = math.tanh %233 : vector<8x32xf32>
    %235 = vector.extract_strided_slice %232 {offsets = [0, 32], sizes = [8, 32], strides = [1, 1]} : vector<8x128xf32> to vector<8x32xf32>
    %236 = arith.mulf %235, %198 : vector<8x32xf32>
    %237 = vector.extract_strided_slice %232 {offsets = [0, 0], sizes = [8, 32], strides = [1, 1]} : vector<8x128xf32> to vector<8x32xf32>
    %238 = arith.mulf %237, %234 : vector<8x32xf32>
    %239 = arith.addf %236, %238 : vector<8x32xf32>
    %240 = vector.extract_strided_slice %232 {offsets = [0, 96], sizes = [8, 32], strides = [1, 1]} : vector<8x128xf32> to vector<8x32xf32>
    %241 = math.tanh %239 : vector<8x32xf32>
    %242 = arith.mulf %240, %241 : vector<8x32xf32>
    %243 = arith.negf %227 : vector<8x128xf32>
    %244 = math.exp %243 : vector<8x128xf32>
    %cst_82 = arith.constant 1.000000e+00 : f32
    %245 = vector.broadcast %cst_82 : f32 to vector<8x128xf32>
    %246 = arith.addf %245, %244 : vector<8x128xf32>
    %247 = arith.divf %245, %246 : vector<8x128xf32>
    %248 = vector.extract_strided_slice %227 {offsets = [0, 64], sizes = [8, 32], strides = [1, 1]} : vector<8x128xf32> to vector<8x32xf32>
    %249 = math.tanh %248 : vector<8x32xf32>
    %250 = vector.extract_strided_slice %247 {offsets = [0, 32], sizes = [8, 32], strides = [1, 1]} : vector<8x128xf32> to vector<8x32xf32>
    %251 = arith.mulf %250, %213 : vector<8x32xf32>
    %252 = vector.extract_strided_slice %247 {offsets = [0, 0], sizes = [8, 32], strides = [1, 1]} : vector<8x128xf32> to vector<8x32xf32>
    %253 = arith.mulf %252, %249 : vector<8x32xf32>
    %254 = arith.addf %251, %253 : vector<8x32xf32>
    %255 = vector.extract_strided_slice %247 {offsets = [0, 96], sizes = [8, 32], strides = [1, 1]} : vector<8x128xf32> to vector<8x32xf32>
    %256 = math.tanh %254 : vector<8x32xf32>
    %257 = arith.mulf %255, %256 : vector<8x32xf32>
    %c40_83 = arith.constant 40 : index
    %c0_84 = arith.constant 0 : index
    %258 = vector.load %arg16[%c40_83, %c0_84] : memref<64x64xf32, #tpu.memory_space<vmem>>, vector<8x32xf32>
    tpu.vector_store %arg16[%c40_83, %c0_84], %242 {strides = array<i32>} : memref<64x64xf32, #tpu.memory_space<vmem>>, vector<8x32xf32>,
    %c16_85 = arith.constant 16 : index
    %c32_86 = arith.constant 32 : index
    %259 = vector.load %arg16[%c16_85, %c32_86] : memref<64x64xf32, #tpu.memory_space<vmem>>, vector<8x32xf32>
    tpu.vector_store %arg16[%c16_85, %c32_86], %257 {strides = array<i32>} : memref<64x64xf32, #tpu.memory_space<vmem>>, vector<8x32xf32>,
    %260 = tpu.concatenate %242, %257 in 1 : vector<8x32xf32>, vector<8x32xf32> -> vector<8x64xf32>
    %c0_87 = arith.constant 0 : index
    %c0_88 = arith.constant 0 : index
    %261 = vector.load %arg5[%c0_87, %c0_88] : memref<64x256xf32, #tpu.memory_space<vmem>>, vector<64x256xf32>
    %cst_89 = arith.constant dense<0.000000e+00> : vector<8x256xf32>
    %262 = tpu.matmul %260, %261, %cst_89 {dimension_numbers = #tpu.dot_dimension_numbers<[1], [0], [0], [1], [0, 0, 1, 1], [], []>} : vector<8x64xf32>, vector<64x256xf32>, vector<8x256xf32> -> vector<8x256xf32>
    %c48_90 = arith.constant 48 : index
    %c0_91 = arith.constant 0 : index
    %263 = vector.load %arg14[%c48_90, %c0_91] : memref<64x128xf32, #tpu.memory_space<vmem>>, vector<8x128xf32>
    %264 = vector.extract_strided_slice %262 {offsets = [0, 0], sizes = [8, 128], strides = [1, 1]} : vector<8x256xf32> to vector<8x128xf32>
    %265 = arith.addf %263, %264 : vector<8x128xf32>
    %c8_92 = arith.constant 8 : index
    %c0_93 = arith.constant 0 : index
    %266 = vector.load %arg15[%c8_92, %c0_93] : memref<64x128xf32, #tpu.memory_space<vmem>>, vector<8x128xf32>
    %267 = vector.extract_strided_slice %262 {offsets = [0, 128], sizes = [8, 128], strides = [1, 1]} : vector<8x256xf32> to vector<8x128xf32>
    %268 = arith.addf %266, %267 : vector<8x128xf32>
    %269 = arith.negf %265 : vector<8x128xf32>
    %270 = math.exp %269 : vector<8x128xf32>
    %cst_94 = arith.constant 1.000000e+00 : f32
    %271 = vector.broadcast %cst_94 : f32 to vector<8x128xf32>
    %272 = arith.addf %271, %270 : vector<8x128xf32>
    %273 = arith.divf %271, %272 : vector<8x128xf32>
    %274 = vector.extract_strided_slice %265 {offsets = [0, 64], sizes = [8, 32], strides = [1, 1]} : vector<8x128xf32> to vector<8x32xf32>
    %275 = math.tanh %274 : vector<8x32xf32>
    %276 = vector.extract_strided_slice %273 {offsets = [0, 32], sizes = [8, 32], strides = [1, 1]} : vector<8x128xf32> to vector<8x32xf32>
    %277 = arith.mulf %276, %239 : vector<8x32xf32>
    %278 = vector.extract_strided_slice %273 {offsets = [0, 0], sizes = [8, 32], strides = [1, 1]} : vector<8x128xf32> to vector<8x32xf32>
    %279 = arith.mulf %278, %275 : vector<8x32xf32>
    %280 = arith.addf %277, %279 : vector<8x32xf32>
    %281 = vector.extract_strided_slice %273 {offsets = [0, 96], sizes = [8, 32], strides = [1, 1]} : vector<8x128xf32> to vector<8x32xf32>
    %282 = math.tanh %280 : vector<8x32xf32>
    %283 = arith.mulf %281, %282 : vector<8x32xf32>
    %284 = arith.negf %268 : vector<8x128xf32>
    %285 = math.exp %284 : vector<8x128xf32>
    %cst_95 = arith.constant 1.000000e+00 : f32
    %286 = vector.broadcast %cst_95 : f32 to vector<8x128xf32>
    %287 = arith.addf %286, %285 : vector<8x128xf32>
    %288 = arith.divf %286, %287 : vector<8x128xf32>
    %289 = vector.extract_strided_slice %268 {offsets = [0, 64], sizes = [8, 32], strides = [1, 1]} : vector<8x128xf32> to vector<8x32xf32>
    %290 = math.tanh %289 : vector<8x32xf32>
    %291 = vector.extract_strided_slice %288 {offsets = [0, 32], sizes = [8, 32], strides = [1, 1]} : vector<8x128xf32> to vector<8x32xf32>
    %292 = arith.mulf %291, %254 : vector<8x32xf32>
    %293 = vector.extract_strided_slice %288 {offsets = [0, 0], sizes = [8, 32], strides = [1, 1]} : vector<8x128xf32> to vector<8x32xf32>
    %294 = arith.mulf %293, %290 : vector<8x32xf32>
    %295 = arith.addf %292, %294 : vector<8x32xf32>
    %296 = vector.extract_strided_slice %288 {offsets = [0, 96], sizes = [8, 32], strides = [1, 1]} : vector<8x128xf32> to vector<8x32xf32>
    %297 = math.tanh %295 : vector<8x32xf32>
    %298 = arith.mulf %296, %297 : vector<8x32xf32>
    %c48_96 = arith.constant 48 : index
    %c0_97 = arith.constant 0 : index
    %299 = vector.load %arg16[%c48_96, %c0_97] : memref<64x64xf32, #tpu.memory_space<vmem>>, vector<8x32xf32>
    tpu.vector_store %arg16[%c48_96, %c0_97], %283 {strides = array<i32>} : memref<64x64xf32, #tpu.memory_space<vmem>>, vector<8x32xf32>,
    %c8_98 = arith.constant 8 : index
    %c32_99 = arith.constant 32 : index
    %300 = vector.load %arg16[%c8_98, %c32_99] : memref<64x64xf32, #tpu.memory_space<vmem>>, vector<8x32xf32>
    tpu.vector_store %arg16[%c8_98, %c32_99], %298 {strides = array<i32>} : memref<64x64xf32, #tpu.memory_space<vmem>>, vector<8x32xf32>,
    %301 = tpu.concatenate %283, %298 in 1 : vector<8x32xf32>, vector<8x32xf32> -> vector<8x64xf32>
    %c0_100 = arith.constant 0 : index
    %c0_101 = arith.constant 0 : index
    %302 = vector.load %arg5[%c0_100, %c0_101] : memref<64x256xf32, #tpu.memory_space<vmem>>, vector<64x256xf32>
    %cst_102 = arith.constant dense<0.000000e+00> : vector<8x256xf32>
    %303 = tpu.matmul %301, %302, %cst_102 {dimension_numbers = #tpu.dot_dimension_numbers<[1], [0], [0], [1], [0, 0, 1, 1], [], []>} : vector<8x64xf32>, vector<64x256xf32>, vector<8x256xf32> -> vector<8x256xf32>
    %c56_103 = arith.constant 56 : index
    %c0_104 = arith.constant 0 : index
    %304 = vector.load %arg14[%c56_103, %c0_104] : memref<64x128xf32, #tpu.memory_space<vmem>>, vector<8x128xf32>
    %305 = vector.extract_strided_slice %303 {offsets = [0, 0], sizes = [8, 128], strides = [1, 1]} : vector<8x256xf32> to vector<8x128xf32>
    %306 = arith.addf %304, %305 : vector<8x128xf32>
    %c0_105 = arith.constant 0 : index
    %c0_106 = arith.constant 0 : index
    %307 = vector.load %arg15[%c0_105, %c0_106] : memref<64x128xf32, #tpu.memory_space<vmem>>, vector<8x128xf32>
    %308 = vector.extract_strided_slice %303 {offsets = [0, 128], sizes = [8, 128], strides = [1, 1]} : vector<8x256xf32> to vector<8x128xf32>
    %309 = arith.addf %307, %308 : vector<8x128xf32>
    %310 = arith.negf %306 : vector<8x128xf32>
    %311 = math.exp %310 : vector<8x128xf32>
    %cst_107 = arith.constant 1.000000e+00 : f32
    %312 = vector.broadcast %cst_107 : f32 to vector<8x128xf32>
    %313 = arith.addf %312, %311 : vector<8x128xf32>
    %314 = arith.divf %312, %313 : vector<8x128xf32>
    %315 = vector.extract_strided_slice %306 {offsets = [0, 64], sizes = [8, 32], strides = [1, 1]} : vector<8x128xf32> to vector<8x32xf32>
    %316 = math.tanh %315 : vector<8x32xf32>
    %317 = vector.extract_strided_slice %314 {offsets = [0, 32], sizes = [8, 32], strides = [1, 1]} : vector<8x128xf32> to vector<8x32xf32>
    %318 = arith.mulf %317, %280 : vector<8x32xf32>
    %319 = vector.extract_strided_slice %314 {offsets = [0, 0], sizes = [8, 32], strides = [1, 1]} : vector<8x128xf32> to vector<8x32xf32>
    %320 = arith.mulf %319, %316 : vector<8x32xf32>
    %321 = arith.addf %318, %320 : vector<8x32xf32>
    %322 = vector.extract_strided_slice %314 {offsets = [0, 96], sizes = [8, 32], strides = [1, 1]} : vector<8x128xf32> to vector<8x32xf32>
    %323 = math.tanh %321 : vector<8x32xf32>
    %324 = arith.mulf %322, %323 : vector<8x32xf32>
    %325 = arith.negf %309 : vector<8x128xf32>
    %326 = math.exp %325 : vector<8x128xf32>
    %cst_108 = arith.constant 1.000000e+00 : f32
    %327 = vector.broadcast %cst_108 : f32 to vector<8x128xf32>
    %328 = arith.addf %327, %326 : vector<8x128xf32>
    %329 = arith.divf %327, %328 : vector<8x128xf32>
    %330 = vector.extract_strided_slice %309 {offsets = [0, 64], sizes = [8, 32], strides = [1, 1]} : vector<8x128xf32> to vector<8x32xf32>
    %331 = math.tanh %330 : vector<8x32xf32>
    %332 = vector.extract_strided_slice %329 {offsets = [0, 32], sizes = [8, 32], strides = [1, 1]} : vector<8x128xf32> to vector<8x32xf32>
    %333 = arith.mulf %332, %295 : vector<8x32xf32>
    %334 = vector.extract_strided_slice %329 {offsets = [0, 0], sizes = [8, 32], strides = [1, 1]} : vector<8x128xf32> to vector<8x32xf32>
    %335 = arith.mulf %334, %331 : vector<8x32xf32>
    %336 = arith.addf %333, %335 : vector<8x32xf32>
    %337 = vector.extract_strided_slice %329 {offsets = [0, 96], sizes = [8, 32], strides = [1, 1]} : vector<8x128xf32> to vector<8x32xf32>
    %338 = math.tanh %336 : vector<8x32xf32>
    %339 = arith.mulf %337, %338 : vector<8x32xf32>
    %c56_109 = arith.constant 56 : index
    %c0_110 = arith.constant 0 : index
    %340 = vector.load %arg16[%c56_109, %c0_110] : memref<64x64xf32, #tpu.memory_space<vmem>>, vector<8x32xf32>
    tpu.vector_store %arg16[%c56_109, %c0_110], %324 {strides = array<i32>} : memref<64x64xf32, #tpu.memory_space<vmem>>, vector<8x32xf32>,
    %c0_111 = arith.constant 0 : index
    %c32_112 = arith.constant 32 : index
    %341 = vector.load %arg16[%c0_111, %c32_112] : memref<64x64xf32, #tpu.memory_space<vmem>>, vector<8x32xf32>
    tpu.vector_store %arg16[%c0_111, %c32_112], %339 {strides = array<i32>} : memref<64x64xf32, #tpu.memory_space<vmem>>, vector<8x32xf32>,
    %c0_113 = arith.constant 0 : index
    %c0_114 = arith.constant 0 : index
    %342 = vector.load %arg16[%c0_113, %c0_114] : memref<64x64xf32, #tpu.memory_space<vmem>>, vector<64x64xf32>
    %c0_115 = arith.constant 0 : index
    %c0_116 = arith.constant 0 : index
    %343 = vector.load %arg6[%c0_115, %c0_116] : memref<64x128xf32, #tpu.memory_space<vmem>>, vector<64x128xf32>
    %cst_117 = arith.constant dense<0.000000e+00> : vector<64x128xf32>
    %344 = tpu.matmul %342, %343, %cst_117 {dimension_numbers = #tpu.dot_dimension_numbers<[1], [0], [0], [1], [0, 0, 1, 1], [], []>} : vector<64x64xf32>, vector<64x128xf32>, vector<64x128xf32> -> vector<64x128xf32>
    %c0_118 = arith.constant 0 : index
    %c0_119 = arith.constant 0 : index
    %345 = vector.load %arg7[%c0_118, %c0_119] : memref<1x128xf32, #tpu.memory_space<vmem>>, vector<1x128xf32>
    %346 = vector.broadcast %345 : vector<1x128xf32> to vector<64x128xf32>
    %347 = arith.addf %344, %346 : vector<64x128xf32>
    %c0_120 = arith.constant 0 : index
    %c0_121 = arith.constant 0 : index
    %348 = vector.load %arg14[%c0_120, %c0_121] : memref<64x128xf32, #tpu.memory_space<vmem>>, vector<64x128xf32>
    tpu.vector_store %arg14[%c0_120, %c0_121], %347 {strides = array<i32>} : memref<64x128xf32, #tpu.memory_space<vmem>>, vector<64x128xf32>,
    %c56_122 = arith.constant 56 : index
    %c0_123 = arith.constant 0 : index
    %349 = vector.load %arg16[%c56_122, %c0_123] : memref<64x64xf32, #tpu.memory_space<vmem>>, vector<8x64xf32>
    %c0_124 = arith.constant 0 : index
    %c0_125 = arith.constant 0 : index
    %350 = vector.load %arg8[%c0_124, %c0_125] : memref<64x128xf32, #tpu.memory_space<vmem>>, vector<64x128xf32>
    %cst_126 = arith.constant dense<0.000000e+00> : vector<8x128xf32>
    %351 = tpu.matmul %349, %350, %cst_126 {dimension_numbers = #tpu.dot_dimension_numbers<[1], [0], [0], [1], [0, 0, 1, 1], [], []>} : vector<8x64xf32>, vector<64x128xf32>, vector<8x128xf32> -> vector<8x128xf32>
    %c0_127 = arith.constant 0 : index
    %c0_128 = arith.constant 0 : index
    %352 = vector.load %arg9[%c0_127, %c0_128] : memref<1x128xf32, #tpu.memory_space<vmem>>, vector<1x128xf32>
    %353 = vector.broadcast %352 : vector<1x128xf32> to vector<8x128xf32>
    %354 = arith.addf %351, %353 : vector<8x128xf32>
    %355 = arith.negf %354 : vector<8x128xf32>
    %356 = math.exp %355 : vector<8x128xf32>
    %cst_129 = arith.constant 1.000000e+00 : f32
    %357 = vector.broadcast %cst_129 : f32 to vector<8x128xf32>
    %358 = arith.addf %357, %356 : vector<8x128xf32>
    %359 = arith.divf %357, %358 : vector<8x128xf32>
    %360 = vector.extract_strided_slice %354 {offsets = [0, 64], sizes = [8, 32], strides = [1, 1]} : vector<8x128xf32> to vector<8x32xf32>
    %361 = math.tanh %360 : vector<8x32xf32>
    %362 = vector.extract_strided_slice %359 {offsets = [0, 32], sizes = [8, 32], strides = [1, 1]} : vector<8x128xf32> to vector<8x32xf32>
    %363 = arith.mulf %362, %0 : vector<8x32xf32>
    %364 = vector.extract_strided_slice %359 {offsets = [0, 0], sizes = [8, 32], strides = [1, 1]} : vector<8x128xf32> to vector<8x32xf32>
    %365 = arith.mulf %364, %361 : vector<8x32xf32>
    %366 = arith.addf %363, %365 : vector<8x32xf32>
    %367 = vector.extract_strided_slice %359 {offsets = [0, 96], sizes = [8, 32], strides = [1, 1]} : vector<8x128xf32> to vector<8x32xf32>
    %368 = math.tanh %366 : vector<8x32xf32>
    %369 = arith.mulf %367, %368 : vector<8x32xf32>
    %c32_130 = arith.constant 32 : index
    %c0_131 = arith.constant 0 : index
    %370 = vector.load %arg11[%c32_130, %c0_131] : memref<64x4xf32, #tpu.memory_space<vmem>>, vector<32x4xf32>
    %cst_132 = arith.constant dense<0.000000e+00> : vector<8x4xf32>
    %371 = tpu.matmul %369, %370, %cst_132 {dimension_numbers = #tpu.dot_dimension_numbers<[1], [0], [0], [1], [0, 0, 1, 1], [], []>} : vector<8x32xf32>, vector<32x4xf32>, vector<8x4xf32> -> vector<8x4xf32>
    %c0_133 = arith.constant 0 : index
    %c0_134 = arith.constant 0 : index
    %372 = vector.load %arg12[%c0_133, %c0_134] : memref<1x4xf32, #tpu.memory_space<vmem>>, vector<1x4xf32>
    %373 = vector.broadcast %372 : vector<1x4xf32> to vector<8x4xf32>
    %374 = arith.addf %371, %373 : vector<8x4xf32>
    %c0_135 = arith.constant 0 : index
    %c0_136 = arith.constant 0 : index
    %375 = vector.load %arg14[%c0_135, %c0_136] : memref<64x128xf32, #tpu.memory_space<vmem>>, vector<8x128xf32>
    %c0_137 = arith.constant 0 : index
    %c0_138 = arith.constant 0 : index
    %376 = vector.load %arg10[%c0_137, %c0_138] : memref<64x256xf32, #tpu.memory_space<vmem>>, vector<32x128xf32>
    %cst_139 = arith.constant dense<0.000000e+00> : vector<8x128xf32>
    %377 = tpu.matmul %0, %376, %cst_139 {dimension_numbers = #tpu.dot_dimension_numbers<[1], [0], [0], [1], [0, 0, 1, 1], [], []>} : vector<8x32xf32>, vector<32x128xf32>, vector<8x128xf32> -> vector<8x128xf32>
    %378 = arith.addf %375, %377 : vector<8x128xf32>
    %379 = arith.negf %378 : vector<8x128xf32>
    %380 = math.exp %379 : vector<8x128xf32>
    %cst_140 = arith.constant 1.000000e+00 : f32
    %381 = vector.broadcast %cst_140 : f32 to vector<8x128xf32>
    %382 = arith.addf %381, %380 : vector<8x128xf32>
    %383 = arith.divf %381, %382 : vector<8x128xf32>
    %384 = vector.extract_strided_slice %378 {offsets = [0, 64], sizes = [8, 32], strides = [1, 1]} : vector<8x128xf32> to vector<8x32xf32>
    %385 = math.tanh %384 : vector<8x32xf32>
    %386 = vector.extract_strided_slice %383 {offsets = [0, 32], sizes = [8, 32], strides = [1, 1]} : vector<8x128xf32> to vector<8x32xf32>
    %387 = arith.mulf %386, %0 : vector<8x32xf32>
    %388 = vector.extract_strided_slice %383 {offsets = [0, 0], sizes = [8, 32], strides = [1, 1]} : vector<8x128xf32> to vector<8x32xf32>
    %389 = arith.mulf %388, %385 : vector<8x32xf32>
    %390 = arith.addf %387, %389 : vector<8x32xf32>
    %391 = vector.extract_strided_slice %383 {offsets = [0, 96], sizes = [8, 32], strides = [1, 1]} : vector<8x128xf32> to vector<8x32xf32>
    %392 = math.tanh %390 : vector<8x32xf32>
    %393 = arith.mulf %391, %392 : vector<8x32xf32>
    %c8_141 = arith.constant 8 : index
    %c0_142 = arith.constant 0 : index
    %394 = vector.load %arg14[%c8_141, %c0_142] : memref<64x128xf32, #tpu.memory_space<vmem>>, vector<8x128xf32>
    %c0_143 = arith.constant 0 : index
    %c0_144 = arith.constant 0 : index
    %395 = vector.load %arg10[%c0_143, %c0_144] : memref<64x256xf32, #tpu.memory_space<vmem>>, vector<32x128xf32>
    %cst_145 = arith.constant dense<0.000000e+00> : vector<8x128xf32>
    %396 = tpu.matmul %393, %395, %cst_145 {dimension_numbers = #tpu.dot_dimension_numbers<[1], [0], [0], [1], [0, 0, 1, 1], [], []>} : vector<8x32xf32>, vector<32x128xf32>, vector<8x128xf32> -> vector<8x128xf32>
    %397 = arith.addf %394, %396 : vector<8x128xf32>
    %398 = arith.negf %397 : vector<8x128xf32>
    %399 = math.exp %398 : vector<8x128xf32>
    %cst_146 = arith.constant 1.000000e+00 : f32
    %400 = vector.broadcast %cst_146 : f32 to vector<8x128xf32>
    %401 = arith.addf %400, %399 : vector<8x128xf32>
    %402 = arith.divf %400, %401 : vector<8x128xf32>
    %403 = vector.extract_strided_slice %397 {offsets = [0, 64], sizes = [8, 32], strides = [1, 1]} : vector<8x128xf32> to vector<8x32xf32>
    %404 = math.tanh %403 : vector<8x32xf32>
    %405 = vector.extract_strided_slice %402 {offsets = [0, 32], sizes = [8, 32], strides = [1, 1]} : vector<8x128xf32> to vector<8x32xf32>
    %406 = arith.mulf %405, %390 : vector<8x32xf32>
    %407 = vector.extract_strided_slice %402 {offsets = [0, 0], sizes = [8, 32], strides = [1, 1]} : vector<8x128xf32> to vector<8x32xf32>
    %408 = arith.mulf %407, %404 : vector<8x32xf32>
    %409 = arith.addf %406, %408 : vector<8x32xf32>
    %410 = vector.extract_strided_slice %402 {offsets = [0, 96], sizes = [8, 32], strides = [1, 1]} : vector<8x128xf32> to vector<8x32xf32>
    %411 = math.tanh %409 : vector<8x32xf32>
    %412 = arith.mulf %410, %411 : vector<8x32xf32>
    %c16_147 = arith.constant 16 : index
    %c0_148 = arith.constant 0 : index
    %413 = vector.load %arg14[%c16_147, %c0_148] : memref<64x128xf32, #tpu.memory_space<vmem>>, vector<8x128xf32>
    %c0_149 = arith.constant 0 : index
    %c0_150 = arith.constant 0 : index
    %414 = vector.load %arg10[%c0_149, %c0_150] : memref<64x256xf32, #tpu.memory_space<vmem>>, vector<32x128xf32>
    %cst_151 = arith.constant dense<0.000000e+00> : vector<8x128xf32>
    %415 = tpu.matmul %412, %414, %cst_151 {dimension_numbers = #tpu.dot_dimension_numbers<[1], [0], [0], [1], [0, 0, 1, 1], [], []>} : vector<8x32xf32>, vector<32x128xf32>, vector<8x128xf32> -> vector<8x128xf32>
    %416 = arith.addf %413, %415 : vector<8x128xf32>
    %417 = arith.negf %416 : vector<8x128xf32>
    %418 = math.exp %417 : vector<8x128xf32>
    %cst_152 = arith.constant 1.000000e+00 : f32
    %419 = vector.broadcast %cst_152 : f32 to vector<8x128xf32>
    %420 = arith.addf %419, %418 : vector<8x128xf32>
    %421 = arith.divf %419, %420 : vector<8x128xf32>
    %422 = vector.extract_strided_slice %416 {offsets = [0, 64], sizes = [8, 32], strides = [1, 1]} : vector<8x128xf32> to vector<8x32xf32>
    %423 = math.tanh %422 : vector<8x32xf32>
    %424 = vector.extract_strided_slice %421 {offsets = [0, 32], sizes = [8, 32], strides = [1, 1]} : vector<8x128xf32> to vector<8x32xf32>
    %425 = arith.mulf %424, %409 : vector<8x32xf32>
    %426 = vector.extract_strided_slice %421 {offsets = [0, 0], sizes = [8, 32], strides = [1, 1]} : vector<8x128xf32> to vector<8x32xf32>
    %427 = arith.mulf %426, %423 : vector<8x32xf32>
    %428 = arith.addf %425, %427 : vector<8x32xf32>
    %429 = vector.extract_strided_slice %421 {offsets = [0, 96], sizes = [8, 32], strides = [1, 1]} : vector<8x128xf32> to vector<8x32xf32>
    %430 = math.tanh %428 : vector<8x32xf32>
    %431 = arith.mulf %429, %430 : vector<8x32xf32>
    %c24_153 = arith.constant 24 : index
    %c0_154 = arith.constant 0 : index
    %432 = vector.load %arg14[%c24_153, %c0_154] : memref<64x128xf32, #tpu.memory_space<vmem>>, vector<8x128xf32>
    %c0_155 = arith.constant 0 : index
    %c0_156 = arith.constant 0 : index
    %433 = vector.load %arg10[%c0_155, %c0_156] : memref<64x256xf32, #tpu.memory_space<vmem>>, vector<32x128xf32>
    %cst_157 = arith.constant dense<0.000000e+00> : vector<8x128xf32>
    %434 = tpu.matmul %431, %433, %cst_157 {dimension_numbers = #tpu.dot_dimension_numbers<[1], [0], [0], [1], [0, 0, 1, 1], [], []>} : vector<8x32xf32>, vector<32x128xf32>, vector<8x128xf32> -> vector<8x128xf32>
    %435 = arith.addf %432, %434 : vector<8x128xf32>
    %436 = arith.negf %435 : vector<8x128xf32>
    %437 = math.exp %436 : vector<8x128xf32>
    %cst_158 = arith.constant 1.000000e+00 : f32
    %438 = vector.broadcast %cst_158 : f32 to vector<8x128xf32>
    %439 = arith.addf %438, %437 : vector<8x128xf32>
    %440 = arith.divf %438, %439 : vector<8x128xf32>
    %441 = vector.extract_strided_slice %435 {offsets = [0, 64], sizes = [8, 32], strides = [1, 1]} : vector<8x128xf32> to vector<8x32xf32>
    %442 = math.tanh %441 : vector<8x32xf32>
    %443 = vector.extract_strided_slice %440 {offsets = [0, 32], sizes = [8, 32], strides = [1, 1]} : vector<8x128xf32> to vector<8x32xf32>
    %444 = arith.mulf %443, %428 : vector<8x32xf32>
    %445 = vector.extract_strided_slice %440 {offsets = [0, 0], sizes = [8, 32], strides = [1, 1]} : vector<8x128xf32> to vector<8x32xf32>
    %446 = arith.mulf %445, %442 : vector<8x32xf32>
    %447 = arith.addf %444, %446 : vector<8x32xf32>
    %448 = vector.extract_strided_slice %440 {offsets = [0, 96], sizes = [8, 32], strides = [1, 1]} : vector<8x128xf32> to vector<8x32xf32>
    %449 = math.tanh %447 : vector<8x32xf32>
    %450 = arith.mulf %448, %449 : vector<8x32xf32>
    %c32_159 = arith.constant 32 : index
    %c0_160 = arith.constant 0 : index
    %451 = vector.load %arg14[%c32_159, %c0_160] : memref<64x128xf32, #tpu.memory_space<vmem>>, vector<8x128xf32>
    %c0_161 = arith.constant 0 : index
    %c0_162 = arith.constant 0 : index
    %452 = vector.load %arg10[%c0_161, %c0_162] : memref<64x256xf32, #tpu.memory_space<vmem>>, vector<32x128xf32>
    %cst_163 = arith.constant dense<0.000000e+00> : vector<8x128xf32>
    %453 = tpu.matmul %450, %452, %cst_163 {dimension_numbers = #tpu.dot_dimension_numbers<[1], [0], [0], [1], [0, 0, 1, 1], [], []>} : vector<8x32xf32>, vector<32x128xf32>, vector<8x128xf32> -> vector<8x128xf32>
    %454 = arith.addf %451, %453 : vector<8x128xf32>
    %455 = arith.negf %454 : vector<8x128xf32>
    %456 = math.exp %455 : vector<8x128xf32>
    %cst_164 = arith.constant 1.000000e+00 : f32
    %457 = vector.broadcast %cst_164 : f32 to vector<8x128xf32>
    %458 = arith.addf %457, %456 : vector<8x128xf32>
    %459 = arith.divf %457, %458 : vector<8x128xf32>
    %460 = vector.extract_strided_slice %454 {offsets = [0, 64], sizes = [8, 32], strides = [1, 1]} : vector<8x128xf32> to vector<8x32xf32>
    %461 = math.tanh %460 : vector<8x32xf32>
    %462 = vector.extract_strided_slice %459 {offsets = [0, 32], sizes = [8, 32], strides = [1, 1]} : vector<8x128xf32> to vector<8x32xf32>
    %463 = arith.mulf %462, %447 : vector<8x32xf32>
    %464 = vector.extract_strided_slice %459 {offsets = [0, 0], sizes = [8, 32], strides = [1, 1]} : vector<8x128xf32> to vector<8x32xf32>
    %465 = arith.mulf %464, %461 : vector<8x32xf32>
    %466 = arith.addf %463, %465 : vector<8x32xf32>
    %467 = vector.extract_strided_slice %459 {offsets = [0, 96], sizes = [8, 32], strides = [1, 1]} : vector<8x128xf32> to vector<8x32xf32>
    %468 = math.tanh %466 : vector<8x32xf32>
    %469 = arith.mulf %467, %468 : vector<8x32xf32>
    %c40_165 = arith.constant 40 : index
    %c0_166 = arith.constant 0 : index
    %470 = vector.load %arg14[%c40_165, %c0_166] : memref<64x128xf32, #tpu.memory_space<vmem>>, vector<8x128xf32>
    %c0_167 = arith.constant 0 : index
    %c0_168 = arith.constant 0 : index
    %471 = vector.load %arg10[%c0_167, %c0_168] : memref<64x256xf32, #tpu.memory_space<vmem>>, vector<32x128xf32>
    %cst_169 = arith.constant dense<0.000000e+00> : vector<8x128xf32>
    %472 = tpu.matmul %469, %471, %cst_169 {dimension_numbers = #tpu.dot_dimension_numbers<[1], [0], [0], [1], [0, 0, 1, 1], [], []>} : vector<8x32xf32>, vector<32x128xf32>, vector<8x128xf32> -> vector<8x128xf32>
    %473 = arith.addf %470, %472 : vector<8x128xf32>
    %474 = arith.negf %473 : vector<8x128xf32>
    %475 = math.exp %474 : vector<8x128xf32>
    %cst_170 = arith.constant 1.000000e+00 : f32
    %476 = vector.broadcast %cst_170 : f32 to vector<8x128xf32>
    %477 = arith.addf %476, %475 : vector<8x128xf32>
    %478 = arith.divf %476, %477 : vector<8x128xf32>
    %479 = vector.extract_strided_slice %473 {offsets = [0, 64], sizes = [8, 32], strides = [1, 1]} : vector<8x128xf32> to vector<8x32xf32>
    %480 = math.tanh %479 : vector<8x32xf32>
    %481 = vector.extract_strided_slice %478 {offsets = [0, 32], sizes = [8, 32], strides = [1, 1]} : vector<8x128xf32> to vector<8x32xf32>
    %482 = arith.mulf %481, %466 : vector<8x32xf32>
    %483 = vector.extract_strided_slice %478 {offsets = [0, 0], sizes = [8, 32], strides = [1, 1]} : vector<8x128xf32> to vector<8x32xf32>
    %484 = arith.mulf %483, %480 : vector<8x32xf32>
    %485 = arith.addf %482, %484 : vector<8x32xf32>
    %486 = vector.extract_strided_slice %478 {offsets = [0, 96], sizes = [8, 32], strides = [1, 1]} : vector<8x128xf32> to vector<8x32xf32>
    %487 = math.tanh %485 : vector<8x32xf32>
    %488 = arith.mulf %486, %487 : vector<8x32xf32>
    %c48_171 = arith.constant 48 : index
    %c0_172 = arith.constant 0 : index
    %489 = vector.load %arg14[%c48_171, %c0_172] : memref<64x128xf32, #tpu.memory_space<vmem>>, vector<8x128xf32>
    %c0_173 = arith.constant 0 : index
    %c0_174 = arith.constant 0 : index
    %490 = vector.load %arg10[%c0_173, %c0_174] : memref<64x256xf32, #tpu.memory_space<vmem>>, vector<32x128xf32>
    %cst_175 = arith.constant dense<0.000000e+00> : vector<8x128xf32>
    %491 = tpu.matmul %488, %490, %cst_175 {dimension_numbers = #tpu.dot_dimension_numbers<[1], [0], [0], [1], [0, 0, 1, 1], [], []>} : vector<8x32xf32>, vector<32x128xf32>, vector<8x128xf32> -> vector<8x128xf32>
    %492 = arith.addf %489, %491 : vector<8x128xf32>
    %493 = arith.negf %492 : vector<8x128xf32>
    %494 = math.exp %493 : vector<8x128xf32>
    %cst_176 = arith.constant 1.000000e+00 : f32
    %495 = vector.broadcast %cst_176 : f32 to vector<8x128xf32>
    %496 = arith.addf %495, %494 : vector<8x128xf32>
    %497 = arith.divf %495, %496 : vector<8x128xf32>
    %498 = vector.extract_strided_slice %492 {offsets = [0, 64], sizes = [8, 32], strides = [1, 1]} : vector<8x128xf32> to vector<8x32xf32>
    %499 = math.tanh %498 : vector<8x32xf32>
    %500 = vector.extract_strided_slice %497 {offsets = [0, 32], sizes = [8, 32], strides = [1, 1]} : vector<8x128xf32> to vector<8x32xf32>
    %501 = arith.mulf %500, %485 : vector<8x32xf32>
    %502 = vector.extract_strided_slice %497 {offsets = [0, 0], sizes = [8, 32], strides = [1, 1]} : vector<8x128xf32> to vector<8x32xf32>
    %503 = arith.mulf %502, %499 : vector<8x32xf32>
    %504 = arith.addf %501, %503 : vector<8x32xf32>
    %505 = vector.extract_strided_slice %497 {offsets = [0, 96], sizes = [8, 32], strides = [1, 1]} : vector<8x128xf32> to vector<8x32xf32>
    %506 = math.tanh %504 : vector<8x32xf32>
    %507 = arith.mulf %505, %506 : vector<8x32xf32>
    %c56_177 = arith.constant 56 : index
    %c0_178 = arith.constant 0 : index
    %508 = vector.load %arg14[%c56_177, %c0_178] : memref<64x128xf32, #tpu.memory_space<vmem>>, vector<8x128xf32>
    %c0_179 = arith.constant 0 : index
    %c0_180 = arith.constant 0 : index
    %509 = vector.load %arg10[%c0_179, %c0_180] : memref<64x256xf32, #tpu.memory_space<vmem>>, vector<32x128xf32>
    %cst_181 = arith.constant dense<0.000000e+00> : vector<8x128xf32>
    %510 = tpu.matmul %507, %509, %cst_181 {dimension_numbers = #tpu.dot_dimension_numbers<[1], [0], [0], [1], [0, 0, 1, 1], [], []>} : vector<8x32xf32>, vector<32x128xf32>, vector<8x128xf32> -> vector<8x128xf32>
    %511 = arith.addf %508, %510 : vector<8x128xf32>
    %512 = arith.negf %511 : vector<8x128xf32>
    %513 = math.exp %512 : vector<8x128xf32>
    %cst_182 = arith.constant 1.000000e+00 : f32
    %514 = vector.broadcast %cst_182 : f32 to vector<8x128xf32>
    %515 = arith.addf %514, %513 : vector<8x128xf32>
    %516 = arith.divf %514, %515 : vector<8x128xf32>
    %517 = vector.extract_strided_slice %511 {offsets = [0, 64], sizes = [8, 32], strides = [1, 1]} : vector<8x128xf32> to vector<8x32xf32>
    %518 = math.tanh %517 : vector<8x32xf32>
    %519 = vector.extract_strided_slice %516 {offsets = [0, 32], sizes = [8, 32], strides = [1, 1]} : vector<8x128xf32> to vector<8x32xf32>
    %520 = arith.mulf %519, %504 : vector<8x32xf32>
    %521 = vector.extract_strided_slice %516 {offsets = [0, 0], sizes = [8, 32], strides = [1, 1]} : vector<8x128xf32> to vector<8x32xf32>
    %522 = arith.mulf %521, %518 : vector<8x32xf32>
    %523 = arith.addf %520, %522 : vector<8x32xf32>
    %524 = vector.extract_strided_slice %516 {offsets = [0, 96], sizes = [8, 32], strides = [1, 1]} : vector<8x128xf32> to vector<8x32xf32>
    %525 = math.tanh %523 : vector<8x32xf32>
    %526 = arith.mulf %524, %525 : vector<8x32xf32>
    %c0_183 = arith.constant 0 : index
    %c0_184 = arith.constant 0 : index
    %527 = vector.load %arg11[%c0_183, %c0_184] : memref<64x4xf32, #tpu.memory_space<vmem>>, vector<32x4xf32>
    %cst_185 = arith.constant dense<0.000000e+00> : vector<8x4xf32>
    %528 = tpu.matmul %526, %527, %cst_185 {dimension_numbers = #tpu.dot_dimension_numbers<[1], [0], [0], [1], [0, 0, 1, 1], [], []>} : vector<8x32xf32>, vector<32x4xf32>, vector<8x4xf32> -> vector<8x4xf32>
    %529 = arith.addf %374, %528 : vector<8x4xf32>
    %c0_186 = arith.constant 0 : index
    %c0_187 = arith.constant 0 : index
    %530 = vector.load %arg13[%c0_186, %c0_187] : memref<8x4xf32, #tpu.memory_space<vmem>>, vector<8x4xf32>
    tpu.vector_store %arg13[%c0_186, %c0_187], %529 {strides = array<i32>} : memref<8x4xf32, #tpu.memory_space<vmem>>, vector<8x4xf32>,
    return
  }
}

</mosaic_0001>

<bundles_post_ra>
// kernel: tpu_custom_call.1
= control target key start
LH: loop header
LB: loop body
LE: loop exit
PB: predicated region body
PF: predicated region fallthrough
CT: control target
= control target key end

     0   :  { %18 = vsyncpa [#allocation6], 0  ;;  %s3295_s0 = inlined_call_operand.vmem [shape: f32[64,16], index: 0, kind: input, shape index: {}]   ;;  %s3296_s1 = inlined_call_operand.vmem [shape: f32[16,128], index: 1, kind: input, shape index: {}]   ;;  %s3297_s2 = inlined_call_operand.vmem [shape: f32[1,128], index: 2, kind: input, shape index: {}]   ;;  %s3298_s3 = inlined_call_operand.hbm [shape: f32[16,128], index: 3, kind: input, shape index: {}]   ;;  %s3299_s4 = inlined_call_operand.vmem [shape: f32[1,128], index: 4, kind: input, shape index: {}]   ;;  %s3300_s5 = inlined_call_operand.vmem [shape: f32[64,256], index: 5, kind: input, shape index: {}]   ;;  %s3301_s6 = inlined_call_operand.hbm [shape: f32[64,128], index: 6, kind: input, shape index: {}]   ;;  %s3302_s7 = inlined_call_operand.vmem [shape: f32[1,128], index: 7, kind: input, shape index: {}]   ;;  %s3303_s8 = inlined_call_operand.hbm [shape: f32[64,128], index: 8, kind: input, shape index: {}]   ;;  %s3304_s9 = inlined_call_operand.vmem [shape: f32[1,128], index: 9, kind: input, shape index: {}]   ;;  %s3305_s10 = inlined_call_operand.hbm [shape: f32[64,256], index: 10, kind: input, shape index: {}]   ;;  %s3306_s11 = inlined_call_operand.vmem [shape: f32[64,4], index: 11, kind: input, shape index: {}]   ;;  %s3307_s12 = inlined_call_operand.vmem [shape: f32[1,4], index: 12, kind: input, shape index: {}]   ;;  %s3308_s13 = inlined_call_operand.vmem [shape: f32[8,4], index: 13, kind: output, shape index: {}]  }
   0x1   :  { %19 = vsyncpa [#allocation8], 0 }
   0x2   :  { %20 = vsyncpa [#allocation11], 0  ;;  %s48_s27 = sshll.u32 %s3301_s6, 4  ;;  %s2581_s28 = smov [#allocation7]   ;;  %s49_s27 = int_to_ptr.hbm [resolvable:$true] %s48_s27 }
   0x3   :  { %s50_s29 = sshll.u32 %s2581_s28, 4  ;;  %s31_s15 = sshll.u32 %s3298_s3, 4  ;;  %s51_s29 = int_to_ptr.vmem [resolvable:$true] %s50_s29  ;;  %s32_s15 = int_to_ptr.hbm [resolvable:$true] %s31_s15 }
   0x4   :  { %s2582_s16 = smov 128   ;;  %s2583_s17 = smov 8  }
   0x5   :  { %56 = dma.hbm_to_vmem [thread:$0]  %s49_s27, 1024, %s51_s29, [#allocation8], %s2582_s16, %s2582_s16, %s2583_s17  }
   0x6   :  { %s2584_s18 = smov [#allocation5]   ;;  %s63_s22 = sshll.u32 %s3303_s8, 4  ;;  %s64_s22 = int_to_ptr.hbm [resolvable:$true] %s63_s22 }
   0x7   :  { %s33_s19 = sshll.u32 %s2584_s18, 4  ;;  %s78_s24 = sshll.u32 %s3305_s10, 4  ;;  %s34_s19 = int_to_ptr.vmem [resolvable:$true] %s33_s19  ;;  %s79_s24 = int_to_ptr.hbm [resolvable:$true] %s78_s24 }
   0x8   :  { %39 = dma.hbm_to_vmem [thread:$0]  %s32_s15, 256, %s34_s19, [#allocation6], %s2582_s16, %s2582_s16, %s2583_s17  }
   0x9   :  { %s2585_s25 = smov [#allocation9]   ;;  %s2586_s3 = smov [#allocation10]  }
   0xa   :  { %s65_s26 = sshll.u32 %s2585_s25, 4  ;;  %s80_s27 = sshll.u32 %s2586_s3, 4  ;;  %s66_s26 = int_to_ptr.vmem [resolvable:$true] %s65_s26  ;;  %s81_s27 = int_to_ptr.vmem [resolvable:$true] %s80_s27 }
   0xb   :  { %71 = dma.hbm_to_vmem [thread:$0]  %s64_s22, 1024, %s66_s26, [#allocation8], %s2582_s16, %s2582_s16, %s2583_s17  }
   0xc   :  { %s2587_s28 = smov 256   ;;  %s2588_s29 = smov 16  }
   0xd   :  { %86 = dma.hbm_to_vmem [thread:$0]  %s79_s24, 2048, %s81_s27, [#allocation11], %s2587_s28, %s2587_s28, %s2588_s29  }
   0xe   :  { %2575 = dma.done.wait [#allocation6], 256  }
   0xf   :  { %2576 = vsyncadd [#allocation6], 4294967040 }
  0x10   :  { %2577 = dma.done.wait [#allocation8], 2048  }
  0x11   :  { %2578 = vsyncadd [#allocation8], 4294965248 }
  0x12   :  { %2579 = dma.done.wait [#allocation11], 2048  }
  0x13   :  { %2580 = vsyncadd [#allocation11], 4294965248  ;;  %v196_v0 = vld [vmem:[#allocation5 + $0x8] sm:$0xff]  ;;  %v2677_v1 = vld [vmem:[%s3300_s5 + $0x70] sm:$0xff]  ;;  %vm121_vm0 = vcmask 130048   ;;  %v2589_v21 = vmov 0.0  }
  0x14   :  { %v195_v2 = vld [vmem:[#allocation5] sm:$0xff]  ;;  %215 = vmatpush.msra.mxu1 %v196_v0  ;;  %278 = vmatpush.msra.mxu2 %v2677_v1  ;;  %v2691_v5 = vld [vmem:[%s3300_s5 + $0x50] sm:$0xff]  ;;  %v116_v7 = vld [vmem:[%s3296_s1 + $0x8] sm:$0xff]  ;;  %s2591_s22 = smov 32   ;;  %vm392_vm9 = vcmask 261120   ;;  %vm398_vm10 = vcmask 523520  }
  0x15   :  { %v2683_v3 = vld [vmem:[%s3300_s5 + $0x60] sm:$0xff]  ;;  %160 = vmatpush.msra.mxu0 %v116_v7  ;;  %v2710_v9 = vld [vmem:[%s3300_s5 + $0x78] sm:$0xff]  ;;  %v2715_v10 = vld [vmem:[%s3300_s5 + $0x30] sm:$0xff]  ;;  %2260 = vmatpush.msra.mxu3 %v116_v7  ;;  %vm266_vm11 = vcmask 523264  }
  0x16   :  { %v107_v4 = vld [vmem:[%s3295_s0] sm:$0xff]  ;;  %216 = vmatpush.msra.mxu1 %v195_v2  ;;  %279 = vmatpush.msra.mxu2 %v2683_v3  ;;  %v2720_v11 = vld [vmem:[%s3295_s0 + $0x28] sm:$0xff]  ;;  %v2744_v15 = vld [vmem:[%s3300_s5 + $0x10] sm:$0xff] }
  0x17   :  { %2195 = vmatmul.msk.f32.vlgmr.msra.gmra.mxu1 %vm121_vm0, %v107_v4  ;;  %v2698_v6 = vld [vmem:[%s3300_s5 + $0x40] sm:$0xff]  ;;  %v108_v13 = vld [vmem:[%s3295_s0 + $0x8] sm:$0xff]  ;;  %v2752_v16 = vld [vmem:[%s3300_s5 + $0x58] sm:$0xff] }
  0x18   :  { %v115_v8 = vld [vmem:[%s3296_s1] sm:$0xff]  ;;  %280 = vmatpush.msra.mxu2 %v2691_v5  ;;  %892 = vmatpush.msrb.mxu1 %v2710_v9  ;;  %v2739_v14 = vld [vmem:[%s3300_s5 + $0x68] sm:$0xff]  ;;  %v2773_v19 = vld [vmem:[%s3295_s0 + $0x30] sm:$0xff] }
  0x19   :  { %v2727_v12 = vld [vmem:[%s3300_s5 + $0x20] sm:$0xff]  ;;  %161 = vmatpush.msra.mxu0 %v115_v8  ;;  %2261 = vmatpush.msra.mxu3 %v115_v8  ;;  %v2766_v18 = vld [vmem:[%s3300_s5 + $0x48] sm:$0xff]  ;;  %v2780_v20 = vld [vmem:[%s3300_s5 + $0x38] sm:$0xff] }
  0x1a   :  { %281 = vmatpush.msra.mxu2 %v2698_v6  ;;  %2187 = vmatmul.msk.f32.vlgmr.msra.gmra.mxu0 %vm121_vm0, %v107_v4  ;;  %v2759_v17 = vld [vmem:[%s3300_s5] sm:$0xff]  ;;  %v109_v22 = vld [vmem:[%s3295_s0 + $0x10] sm:$0xff]  ;;  %v2793_v23 = vld [vmem:[%s3300_s5 + $0x28] sm:$0xff] }
  0x1b   :  { %2192 = vmatmul.msk.f32.vlgmr.msra.gmra.mxu3 %vm121_vm0, %v2720_v11  ;;  %893 = vmatpush.msrb.mxu1 %v2739_v14  ;;  %v2801_v24 = vld [vmem:[%s3300_s5 + $0x18] sm:$0xff]  ;;  %v2810_v25 = vld [vmem:[%s3300_s5 + $0x8] sm:$0xff]  ;;  %v111_v28 = vld [vmem:[%s3295_s0 + $0x20] sm:$0xff] }
  0x1c   :  { %282 = vmatpush.msra.mxu2 %v2715_v10  ;;  %298 = vmatpush.msrb.mxu3 %v2710_v9  ;;  %v114_v26 = vld [vmem:[%s3295_s0 + $0x38] sm:$0xff]  ;;  %v2273_v29 = vld [vmem:[%s3299_s4] ss:$0 sm:$0xff]  ;;  %s2590_s4 = smov 64  }
  0x1d   :  { %872 = vmatpush.msrb.mxu0 %v2677_v1  ;;  %894 = vmatpush.msrb.mxu1 %v2752_v16  ;;  %v110_v27 = vld [vmem:[%s3295_s0 + $0x18] sm:$0xff]  ;;  %v2884_v34 = vld [vmem:[%s3297_s2] ss:$0 sm:$0xff] }
  0x1e   :  { %283 = vmatpush.msra.mxu2 %v2727_v12  ;;  %299 = vmatpush.msrb.mxu3 %v2739_v14 }
  0x1f   :  { %2196 = vmatmul.msk.f32.gmra.mxu1 %vm121_vm0, %v108_v13  ;;  %873 = vmatpush.msrb.mxu0 %v2683_v3 }
  0x20   :  { %284 = vmatpush.msra.mxu2 %v2744_v15  ;;  %300 = vmatpush.msrb.mxu3 %v2752_v16 }
  0x21   :  { %895 = vmatpush.msrb.mxu1 %v2766_v18  ;;  %874 = vmatpush.msrb.mxu0 %v2691_v5 }
  0x22   :  { %285 = vmatpush.msra.mxu2 %v2759_v17  ;;  %301 = vmatpush.msrb.mxu3 %v2766_v18 }
  0x23   :  { %286 = vmatmul.f32.vlgmr.msra.gmra.mxu2 %v2589_v21  ;;  %2193 = vmatmul.msk.f32.gmra.mxu3 %vm121_vm0, %v2773_v19 }
  0x24   :  { %428 = vmatpush.msrb.mxu2 %v2677_v1  ;;  %302 = vmatpush.msrb.mxu3 %v2780_v20 }
  0x25   :  { %2188 = vmatmul.msk.f32.gmra.mxu0 %vm121_vm0, %v108_v13  ;;  %896 = vmatpush.msrb.mxu1 %v2780_v20 }
  0x26   :  { %429 = vmatpush.msrb.mxu2 %v2683_v3  ;;  %303 = vmatpush.msrb.mxu3 %v2793_v23 }
  0x27   :  { %2197 = vmatmul.msk.f32.gmra.mxu1 %vm121_vm0, %v109_v22  ;;  %875 = vmatpush.msrb.mxu0 %v2698_v6 }
  0x28   :  { %430 = vmatpush.msrb.mxu2 %v2691_v5  ;;  %897 = vmatpush.msrb.mxu1 %v2793_v23 }
  0x29   :  { %304 = vmatpush.msrb.mxu3 %v2801_v24  ;;  %876 = vmatpush.msrb.mxu0 %v2715_v10 }
  0x2a   :  { %431 = vmatpush.msrb.mxu2 %v2698_v6  ;;  %898 = vmatpush.msrb.mxu1 %v2801_v24 }
  0x2b   :  { %305 = vmatpush.msrb.mxu3 %v2810_v25  ;;  %877 = vmatpush.msrb.mxu0 %v2727_v12 }
  0x2c   :  { %2194 = vmatmul.msk.f32.gmra.mxu3 %vm121_vm0, %v114_v26  ;;  %432 = vmatpush.msrb.mxu2 %v2715_v10 }
  0x2d   :  { %448 = vmatpush.msra.mxu3 %v2710_v9  ;;  %2189 = vmatmul.msk.f32.gmra.mxu0 %vm121_vm0, %v109_v22 }
  0x2e   :  { %433 = vmatpush.msrb.mxu2 %v2727_v12  ;;  %899 = vmatpush.msrb.mxu1 %v2810_v25 }
  0x2f   :  { %2198 = vmatmul.msk.f32.gmra.mxu1 %vm121_vm0, %v110_v27  ;;  %449 = vmatpush.msra.mxu3 %v2739_v14 }
  0x30   :  { %434 = vmatpush.msrb.mxu2 %v2744_v15  ;;  %878 = vmatpush.msrb.mxu0 %v2744_v15 }
  0x31   :  { %450 = vmatpush.msra.mxu3 %v2752_v16 }
  0x32   :  { %435 = vmatpush.msrb.mxu2 %v2759_v17  ;;  %879 = vmatpush.msrb.mxu0 %v2759_v17 }
  0x33   :  { %451 = vmatpush.msra.mxu3 %v2766_v18 }
  0x34   :  { %576 = vmatpush.msra.mxu2 %v2677_v1  ;;  %306 = vmatmul.f32.vlgmr.msrb.gmra.mxu3 %v2589_v21 }
  0x35   :  { %452 = vmatpush.msra.mxu3 %v2780_v20  ;;  %2190 = vmatmul.msk.f32.gmra.mxu0 %vm121_vm0, %v110_v27 }
  0x36   :  { %577 = vmatpush.msra.mxu2 %v2683_v3 }
  0x37   :  { %2199 = vmatmul.msk.f32.gmra.mxu1 %vm121_vm0, %v111_v28  ;;  %453 = vmatpush.msra.mxu3 %v2793_v23 }
  0x38   :  { %578 = vmatpush.msra.mxu2 %v2691_v5 }
  0x39   :  { %454 = vmatpush.msra.mxu3 %v2801_v24 }
  0x3a   :  { %579 = vmatpush.msra.mxu2 %v2698_v6 }
  0x3b   :  { %455 = vmatpush.msra.mxu3 %v2810_v25 }
  0x3c   :  { %580 = vmatpush.msra.mxu2 %v2715_v10 }
  0x3d   :  { %596 = vmatpush.msrb.mxu3 %v2710_v9  ;;  %2191 = vmatmul.msk.f32.gmra.mxu0 %vm121_vm0, %v111_v28 }
  0x3e   :  { %581 = vmatpush.msra.mxu2 %v2727_v12 }
  0x3f   :  { %597 = vmatpush.msrb.mxu3 %v2739_v14  ;;  %2200 = vmatmul.msk.f32.gmra.mxu1 %vm121_vm0, %v2720_v11 }
  0x40   :  { %582 = vmatpush.msra.mxu2 %v2744_v15 }
  0x41   :  { %598 = vmatpush.msrb.mxu3 %v2752_v16 }
  0x42   :  { %583 = vmatpush.msra.mxu2 %v2759_v17 }
  0x43   :  { %599 = vmatpush.msrb.mxu3 %v2766_v18 }
  0x45   :  { %600 = vmatpush.msrb.mxu3 %v2780_v20 }
  0x47   :  { %601 = vmatpush.msrb.mxu3 %v2793_v23  ;;  %2201 = vmatmul.msk.f32.gmra.mxu1 %vm121_vm0, %v2773_v19 }
  0x49   :  { %602 = vmatpush.msrb.mxu3 %v2801_v24 }
  0x4b   :  { %603 = vmatpush.msrb.mxu3 %v2810_v25 }
  0x4f   :  { %2202 = vmatmul.msk.f32.gmra.mxu1 %vm121_vm0, %v114_v26 }
  0x94   :  { %v218_v30 = vpop.f32.mrf.mxu1 }
  0x95   :  { %v2877_v31 = vadd.f32 %v2273_v29, %v218_v30 }
  0x97   :  { %v163_v35 = vpop.f32.mrf.mxu0 }
  0x98   :  { %v164_v36 = vadd.f32 %v2884_v34, %v163_v35 }
  0x9c   :  { %v221_v32 = vpop.f32.mrf.mxu1 }
  0x9d   :  { %v2879_v33 = vadd.f32 %v2273_v29, %v221_v32 }
  0x9e   :  { %v2891_v43 = vpop.f32.mrf.mxu3 }
  0xa4   :  { %v224_v37 = vpop.f32.mrf.mxu1 }
  0xa5   :  { %v2887_v38 = vadd.f32 %v2273_v29, %v224_v37 }
  0xa6   :  { %v287_v39 = vpop.f32.mrf.mxu2  ;;  %v2896_v47 = vpop.f32.mrf.mxu3 }
  0xa7   :  { %v311_v40 = vadd.f32 %v287_v39, %v164_v36 }
  0xa9   :  { %2278 = vtanh.f32 %v311_v40  ;;  %v2203_v58 = vmul.f32 -1.442695, %v311_v40 }
  0xac   :  { %v227_v41 = vpop.f32.mrf.mxu1 }
  0xad   :  { %v2889_v42 = vadd.f32 %v2273_v29, %v227_v41 }
  0xaf   :  { %v2279_v44 = vpop.eup %2278  ;;  %v2900_v50 = vpop.f32.mrf.mxu3 }
  0xb0   :  { %336 = vrot.lane.b32.xlu0 %v2279_v44, %s2590_s4 }
  0xb4   :  { %v230_v45 = vpop.f32.mrf.mxu1 }
  0xb5   :  { %v2894_v46 = vadd.f32 %v2273_v29, %v230_v45 }
  0xb7   :  { %v307_v54 = vpop.f32.mrf.mxu3 }
  0xbc   :  { %v233_v48 = vpop.f32.mrf.mxu1 }
  0xbd   :  { %v2898_v49 = vadd.f32 %v2273_v29, %v233_v48 }
  0xc4   :  { %v236_v51 = vpop.f32.mrf.mxu1 }
  0xc5   :  { %v2902_v52 = vadd.f32 %v2273_v29, %v236_v51 }
  0xcc   :  { %v239_v53 = vpop.f32.mrf.mxu1 }
  0xcd   :  { %v240_v55 = vadd.f32 %v2273_v29, %v239_v53 }
  0xcf   :  { %v313_v56 = vadd.f32 %v307_v54, %v240_v55 }
  0xd1   :  { %2280 = vtanh.f32 %v313_v56  ;;  %v2204_v8 = vmul.f32 -1.442695, %v313_v56 }
  0xd2   :  { %2282 = vpow2.f32 %v2203_v58 }
  0xd7   :  { %v2281_v57 = vpop.eup %2280 }
  0xd8   :  { %373 = vrot.lane.b32.xlu0 %v2281_v57, %s2590_s4  ;;  %v2283_v59 = vpop.eup %2282 }
  0xd9   :  { %v317_v60 = vadd.f32 1.0, %v2283_v59 }
  0xdb   :  { %2284 = vrcp.f32 %v317_v60  ;;  %vm323_vm1 = vweird.f32 %v317_v60  ;;  %v329_v2 = vand.u32 2147483648, %v317_v60  ;;  %v327_v7 = vand.u32 2147483647, %v317_v60 }
  0xdc   :  { %2286 = vpow2.f32 %v2204_v8 }
  0xdd   :  { %v330_v11 = vor.u32 1.1754944e-38, %v329_v2  ;;  %vm328_vm4 = vcmp.eq.f32.partialorder %v327_v7, 8.507059e+37 }
  0xe1   :  { %v2285_v61 = vpop.eup %2284 }
  0xe2   :  { %v319_v62 = vmul.f32 %v2285_v61, %v317_v60  ;;  %vm324_vm2 = vweird.f32 %v2285_v61  ;;  %v2287_v27 = vpop.eup %2286 }
  0xe3   :  { %vm325_vm3 = vmor %vm323_vm1, %vm324_vm2  ;;  %v354_v28 = vadd.f32 1.0, %v2287_v27 }
  0xe4   :  { %v320_v63 = vsub.f32 1.0, %v319_v62 }
  0xe5   :  { %2288 = vrcp.f32 %v354_v28  ;;  %v366_v37 = vand.u32 2147483648, %v354_v28  ;;  %vm360_vm6 = vweird.f32 %v354_v28  ;;  %v364_v39 = vand.u32 2147483647, %v354_v28 }
  0xe6   :  { %v321_v0 = vmul.f32 %v2285_v61, %v320_v63 }
  0xe7   :  { %v367_v41 = vor.u32 1.1754944e-38, %v366_v37  ;;  %vm365_vm8 = vcmp.eq.f32.partialorder %v364_v39, 8.507059e+37 }
  0xe8   :  { %v322_v4 = vadd.f32 %v2285_v61, %v321_v0 }
  0xea   :  { %v326_v13 = vsel %vm325_vm3, %v2285_v61, %v322_v4 }
  0xeb   :  { %v331_v22 = vsel %vm328_vm4, %v330_v11, %v326_v13  ;;  %v2289_v29 = vpop.eup %2288 }
  0xec   :  { %v356_v30 = vmul.f32 %v2289_v29, %v354_v28  ;;  %vm361_vm5 = vweird.f32 %v2289_v29  ;;  %v334_v51 = vmul.f32 0.0, %v331_v22 }
  0xed   :  { %vm362_vm7 = vmor %vm360_vm6, %vm361_vm5 }
  0xee   :  { %v357_v32 = vsub.f32 1.0, %v356_v30 }
  0xf0   :  { %v358_v35 = vmul.f32 %v2289_v29, %v357_v32 }
  0xf2   :  { %v359_v36 = vadd.f32 %v2289_v29, %v358_v35 }
  0xf4   :  { %v363_v40 = vsel %vm362_vm7, %v2289_v29, %v359_v36 }
  0xf5   :  { %v368_v44 = vsel %vm365_vm8, %v367_v41, %v363_v40 }
  0xf6   :  { %v371_v56 = vmul.f32 0.0, %v368_v44 }
 0x122   :  { %v337_v19 = vpop.permute.xlu0 %336 }
 0x123   :  { %v339_v26 = vmul.f32 %v337_v19, %v331_v22 }
 0x125   :  { %341 = vrot.lane.b32.xlu1 %v339_v26, %s2591_s22 }
 0x14a   :  { %v374_v45 = vpop.permute.xlu0 %373 }
 0x14b   :  { %v376_v48 = vmul.f32 %v374_v45, %v368_v44 }
 0x14d   :  { %378 = vrot.lane.b32.xlu1 %v376_v48, %s2591_s22 }
 0x197   :  { %v342_v53 = vpop.permute.xlu1 %341 }
 0x198   :  { %v2907_v54 = vadd.f32 %v342_v53, %v334_v51 }
 0x19a   :  { %2290 = vtanh.f32 %v2907_v54 }
 0x1a0   :  { %v2291_v55 = vpop.eup %2290 }
 0x1a1   :  { %347 = vrot.lane.b32.xlu2 %v2291_v55, %s2590_s4 }
 0x1bf   :  { %v379_v57 = vpop.permute.xlu1 %378 }
 0x1c0   :  { %v2911_v58 = vadd.f32 %v379_v57, %v371_v56 }
 0x1c2   :  { %2292 = vtanh.f32 %v2911_v58 }
 0x1c8   :  { %v2293_v59 = vpop.eup %2292 }
 0x1c9   :  { %384 = vrot.lane.b32.xlu2 %v2293_v59, %s2590_s4 }
 0x1fb   :  { %v348_v60 = vpop.permute.xlu2 %347 }
 0x1fc   :  { %v350_v61 = vmul.f32 %v348_v60, %v331_v22 }
 0x1fe   :  { %389 = vrot.lane.b32.xlu0 %v350_v61, %s2591_s22 }
 0x223   :  { %v385_v62 = vpop.permute.xlu2 %384 }
 0x224   :  { %v387_v63 = vmul.f32 %v385_v62, %v368_v44 }
 0x226   :  { %395 = vrot.lane.b32.xlu1 %v387_v63, %s2590_s4 }
 0x270   :  { %v390_v0 = vpop.permute.xlu0 %389 }
 0x271   :  { %393 = vst.msk [vmem:[#allocation4] sm:$0xff] %vm392_vm9, %v390_v0 }
 0x298   :  { %v396_v2 = vpop.permute.xlu1 %395 }
 0x299   :  { %399 = vst.msk [vmem:[#allocation4 + $0x38] sm:$0xff] %vm398_vm10, %v396_v2  ;;  %v400_v4 = vsel %vm392_vm9, %v390_v0, %v396_v2 }
 0x29a   :  { %2205 = vmatmul.msk.f32.vlgmr.msrb.gmra.mxu2 %vm266_vm11, %v400_v4  ;;  %2206 = vmatmul.msk.f32.vlgmr.msra.gmra.mxu3 %vm266_vm11, %v400_v4 }
 0x29b   :  { %724 = vmatpush.msrb.mxu2 %v2677_v1  ;;  %744 = vmatpush.msra.mxu3 %v2710_v9  ;;  %v166_v1 = vpop.f32.mrf.mxu0 }
 0x29d   :  { %725 = vmatpush.msrb.mxu2 %v2683_v3  ;;  %745 = vmatpush.msra.mxu3 %v2739_v14  ;;  %v167_v3 = vadd.f32 %v2884_v34, %v166_v1 }
 0x29f   :  { %726 = vmatpush.msrb.mxu2 %v2691_v5  ;;  %746 = vmatpush.msra.mxu3 %v2752_v16 }
 0x2a1   :  { %727 = vmatpush.msrb.mxu2 %v2698_v6  ;;  %747 = vmatpush.msra.mxu3 %v2766_v18 }
 0x2a3   :  { %728 = vmatpush.msrb.mxu2 %v2715_v10  ;;  %748 = vmatpush.msra.mxu3 %v2780_v20  ;;  %v169_v1 = vpop.f32.mrf.mxu0 }
 0x2a5   :  { %729 = vmatpush.msrb.mxu2 %v2727_v12  ;;  %749 = vmatpush.msra.mxu3 %v2793_v23 }
 0x2a7   :  { %730 = vmatpush.msrb.mxu2 %v2744_v15  ;;  %750 = vmatpush.msra.mxu3 %v2801_v24 }
 0x2a9   :  { %731 = vmatpush.msrb.mxu2 %v2759_v17  ;;  %751 = vmatpush.msra.mxu3 %v2810_v25 }
 0x31d   :  { %v437_v5 = vpop.f32.mrf.mxu2  ;;  %v457_v6 = vpop.f32.mrf.mxu3 }
 0x31e   :  { %v461_v9 = vadd.f32 %v437_v5, %v167_v3  ;;  %v463_v10 = vadd.f32 %v457_v6, %v2902_v52  ;;  %v170_v3 = vadd.f32 %v2884_v34, %v169_v1 }
 0x320   :  { %2294 = vtanh.f32 %v461_v9  ;;  %v2207_v15 = vmul.f32 -1.442695, %v461_v9  ;;  %v2208_v20 = vmul.f32 -1.442695, %v463_v10 }
 0x321   :  { %2296 = vtanh.f32 %v463_v10 }
 0x322   :  { %2298 = vpow2.f32 %v2207_v15 }
 0x326   :  { %v2295_v12 = vpop.eup %2294 }
 0x327   :  { %v2297_v14 = vpop.eup %2296  ;;  %486 = vrot.lane.b32.xlu2 %v2295_v12, %s2590_s4 }
 0x328   :  { %523 = vrot.lane.b32.xlu0 %v2297_v14, %s2590_s4  ;;  %v2299_v16 = vpop.eup %2298 }
 0x329   :  { %v467_v17 = vadd.f32 1.0, %v2299_v16 }
 0x32b   :  { %2300 = vrcp.f32 %v467_v17  ;;  %v479_v11 = vand.u32 2147483648, %v467_v17  ;;  %vm473_vm13 = vweird.f32 %v467_v17  ;;  %v477_v13 = vand.u32 2147483647, %v467_v17 }
 0x32c   :  { %2302 = vpow2.f32 %v2208_v20 }
 0x32d   :  { %v480_v22 = vor.u32 1.1754944e-38, %v479_v11  ;;  %vm478_vm15 = vcmp.eq.f32.partialorder %v477_v13, 8.507059e+37 }
 0x331   :  { %v2301_v18 = vpop.eup %2300 }
 0x332   :  { %v469_v23 = vmul.f32 %v2301_v18, %v467_v17  ;;  %v2303_v52 = vpop.eup %2302  ;;  %vm474_vm12 = vweird.f32 %v2301_v18 }
 0x333   :  { %v504_v7 = vadd.f32 1.0, %v2303_v52  ;;  %vm475_vm14 = vmor %vm473_vm13, %vm474_vm12 }
 0x334   :  { %v470_v24 = vsub.f32 1.0, %v469_v23 }
 0x335   :  { %2304 = vrcp.f32 %v504_v7  ;;  %v516_v37 = vand.u32 2147483648, %v504_v7  ;;  %vm510_vm1 = vweird.f32 %v504_v7  ;;  %v514_v39 = vand.u32 2147483647, %v504_v7 }
 0x336   :  { %v471_v25 = vmul.f32 %v2301_v18, %v470_v24 }
 0x337   :  { %v517_v41 = vor.u32 1.1754944e-38, %v516_v37  ;;  %vm515_vm3 = vcmp.eq.f32.partialorder %v514_v39, 8.507059e+37 }
 0x338   :  { %v472_v8 = vadd.f32 %v2301_v18, %v471_v25 }
 0x33a   :  { %v476_v19 = vsel %vm475_vm14, %v2301_v18, %v472_v8 }
 0x33b   :  { %v481_v27 = vsel %vm478_vm15, %v480_v22, %v476_v19  ;;  %v2305_v29 = vpop.eup %2304 }
 0x33c   :  { %v506_v30 = vmul.f32 %v2305_v29, %v504_v7  ;;  %vm511_vm0 = vweird.f32 %v2305_v29  ;;  %v484_v51 = vmul.f32 %v481_v27, %v2907_v54 }
 0x33d   :  { %vm512_vm2 = vmor %vm510_vm1, %vm511_vm0 }
 0x33e   :  { %v507_v32 = vsub.f32 1.0, %v506_v30 }
 0x340   :  { %v508_v35 = vmul.f32 %v2305_v29, %v507_v32 }
 0x342   :  { %v509_v36 = vadd.f32 %v2305_v29, %v508_v35 }
 0x344   :  { %v513_v40 = vsel %vm512_vm2, %v2305_v29, %v509_v36 }
 0x345   :  { %v518_v45 = vsel %vm515_vm3, %v517_v41, %v513_v40 }
 0x346   :  { %v521_v53 = vmul.f32 %v518_v45, %v2911_v58 }
 0x381   :  { %v487_v26 = vpop.permute.xlu2 %486 }
 0x382   :  { %v489_v28 = vmul.f32 %v487_v26, %v481_v27 }
 0x384   :  { %491 = vrot.lane.b32.xlu1 %v489_v28, %s2591_s22 }
 0x39a   :  { %v524_v44 = vpop.permute.xlu0 %523 }
 0x39b   :  { %v526_v48 = vmul.f32 %v524_v44, %v518_v45 }
 0x39d   :  { %528 = vrot.lane.b32.xlu2 %v526_v48, %s2591_s22 }
 0x3f6   :  { %v492_v55 = vpop.permute.xlu1 %491 }
 0x3f7   :  { %v529_v56 = vpop.permute.xlu2 %528  ;;  %v2946_v57 = vadd.f32 %v492_v55, %v484_v51 }
 0x3f8   :  { %v2948_v59 = vadd.f32 %v529_v56, %v521_v53 }
 0x3f9   :  { %2306 = vtanh.f32 %v2946_v57 }
 0x3fa   :  { %2308 = vtanh.f32 %v2948_v59 }
 0x3ff   :  { %v2307_v60 = vpop.eup %2306 }
 0x400   :  { %v2309_v61 = vpop.eup %2308  ;;  %497 = vrot.lane.b32.xlu0 %v2307_v60, %s2590_s4 }
 0x401   :  { %534 = vrot.lane.b32.xlu1 %v2309_v61, %s2590_s4 }
 0x472   :  { %v498_v62 = vpop.permute.xlu0 %497 }
 0x473   :  { %v535_v54 = vpop.permute.xlu1 %534  ;;  %v500_v63 = vmul.f32 %v498_v62, %v481_v27 }
 0x474   :  { %v537_v58 = vmul.f32 %v535_v54, %v518_v45 }
 0x475   :  { %539 = vrot.lane.b32.xlu2 %v500_v63, %s2591_s22 }
 0x476   :  { %544 = vrot.lane.b32.xlu0 %v537_v58, %s2590_s4 }
 0x4cf   :  { %v540_v0 = vpop.permute.xlu2 %539 }
 0x4d0   :  { %542 = vst.msk [vmem:[#allocation4 + $0x8] sm:$0xff] %vm392_vm9, %v540_v0 }
 0x4e8   :  { %v545_v2 = vpop.permute.xlu0 %544 }
 0x4e9   :  { %547 = vst.msk [vmem:[#allocation4 + $0x30] sm:$0xff] %vm398_vm10, %v545_v2  ;;  %v548_v4 = vsel %vm392_vm9, %v540_v0, %v545_v2 }
 0x4ea   :  { %2209 = vmatmul.msk.f32.vlgmr.msra.gmra.mxu2 %vm266_vm11, %v548_v4  ;;  %2210 = vmatmul.msk.f32.vlgmr.msrb.gmra.mxu3 %vm266_vm11, %v548_v4  ;;  %v172_v4 = vpop.f32.mrf.mxu0 }
 0x4eb   :  { %v173_v1 = vadd.f32 %v2884_v34, %v172_v4 }
 0x56d   :  { %v585_v5 = vpop.f32.mrf.mxu2  ;;  %v605_v6 = vpop.f32.mrf.mxu3 }
 0x56e   :  { %v609_v9 = vadd.f32 %v585_v5, %v170_v3  ;;  %v611_v10 = vadd.f32 %v605_v6, %v2898_v49 }
 0x570   :  { %2310 = vtanh.f32 %v609_v9  ;;  %v2212_v15 = vmul.f32 -1.442695, %v611_v10  ;;  %v2211_v20 = vmul.f32 -1.442695, %v609_v9 }
 0x571   :  { %2312 = vtanh.f32 %v611_v10 }
 0x572   :  { %2314 = vpow2.f32 %v2212_v15 }
 0x576   :  { %v2311_v12 = vpop.eup %2310 }
 0x577   :  { %v2313_v14 = vpop.eup %2312  ;;  %634 = vrot.lane.b32.xlu1 %v2311_v12, %s2590_s4 }
 0x578   :  { %671 = vrot.lane.b32.xlu2 %v2313_v14, %s2590_s4  ;;  %v2315_v16 = vpop.eup %2314 }
 0x579   :  { %v652_v17 = vadd.f32 1.0, %v2315_v16 }
 0x57b   :  { %2316 = vrcp.f32 %v652_v17  ;;  %v664_v8 = vand.u32 2147483648, %v652_v17  ;;  %vm658_vm5 = vweird.f32 %v652_v17  ;;  %v662_v11 = vand.u32 2147483647, %v652_v17 }
 0x57c   :  { %2318 = vpow2.f32 %v2211_v20 }
 0x57d   :  { %v665_v19 = vor.u32 1.1754944e-38, %v664_v8  ;;  %vm663_vm7 = vcmp.eq.f32.partialorder %v662_v11, 8.507059e+37 }
 0x581   :  { %v2317_v18 = vpop.eup %2316 }
 0x582   :  { %v654_v23 = vmul.f32 %v2317_v18, %v652_v17  ;;  %v2319_v25 = vpop.eup %2318  ;;  %vm659_vm4 = vweird.f32 %v2317_v18 }
 0x583   :  { %v615_v52 = vadd.f32 1.0, %v2319_v25  ;;  %vm660_vm6 = vmor %vm658_vm5, %vm659_vm4 }
 0x584   :  { %v655_v24 = vsub.f32 1.0, %v654_v23 }
 0x585   :  { %2320 = vrcp.f32 %v615_v52  ;;  %v627_v36 = vand.u32 2147483648, %v615_v52  ;;  %vm621_vm12 = vweird.f32 %v615_v52  ;;  %v625_v37 = vand.u32 2147483647, %v615_v52 }
 0x586   :  { %v656_v49 = vmul.f32 %v2317_v18, %v655_v24 }
 0x587   :  { %v628_v40 = vor.u32 1.1754944e-38, %v627_v36  ;;  %vm626_vm14 = vcmp.eq.f32.partialorder %v625_v37, 8.507059e+37 }
 0x588   :  { %v657_v7 = vadd.f32 %v2317_v18, %v656_v49 }
 0x58a   :  { %v661_v13 = vsel %vm660_vm6, %v2317_v18, %v657_v7 }
 0x58b   :  { %v666_v26 = vsel %vm663_vm7, %v665_v19, %v661_v13  ;;  %v2321_v27 = vpop.eup %2320 }
 0x58c   :  { %v617_v29 = vmul.f32 %v2321_v27, %v615_v52  ;;  %vm622_vm8 = vweird.f32 %v2321_v27  ;;  %v669_v48 = vmul.f32 %v666_v26, %v2948_v59 }
 0x58d   :  { %vm623_vm13 = vmor %vm621_vm12, %vm622_vm8 }
 0x58e   :  { %v618_v30 = vsub.f32 1.0, %v617_v29 }
 0x590   :  { %v619_v32 = vmul.f32 %v2321_v27, %v618_v30 }
 0x592   :  { %v620_v35 = vadd.f32 %v2321_v27, %v619_v32 }
 0x594   :  { %v624_v39 = vsel %vm623_vm13, %v2321_v27, %v620_v35 }
 0x595   :  { %v629_v44 = vsel %vm626_vm14, %v628_v40, %v624_v39 }
 0x596   :  { %v632_v56 = vmul.f32 %v629_v44, %v2946_v57 }
 0x5d2   :  { %v672_v22 = vpop.permute.xlu2 %671 }
 0x5d3   :  { %v674_v28 = vmul.f32 %v672_v22, %v666_v26 }
 0x5d5   :  { %676 = vrot.lane.b32.xlu1 %v674_v28, %s2591_s22 }
 0x5e9   :  { %v635_v41 = vpop.permute.xlu1 %634 }
 0x5ea   :  { %v637_v45 = vmul.f32 %v635_v41, %v629_v44 }
 0x5ec   :  { %639 = vrot.lane.b32.xlu0 %v637_v45, %s2591_s22 }
 0x647   :  { %v677_v51 = vpop.permute.xlu1 %676 }
 0x648   :  { %v2968_v53 = vadd.f32 %v677_v51, %v669_v48 }
 0x64a   :  { %2322 = vtanh.f32 %v2968_v53 }
 0x650   :  { %v2323_v55 = vpop.eup %2322 }
 0x651   :  { %682 = vrot.lane.b32.xlu0 %v2323_v55, %s2590_s4 }
 0x65e   :  { %v640_v60 = vpop.permute.xlu0 %639 }
 0x65f   :  { %v2973_v61 = vadd.f32 %v640_v60, %v632_v56 }
 0x661   :  { %2324 = vtanh.f32 %v2973_v61 }
 0x667   :  { %v2325_v62 = vpop.eup %2324 }
 0x668   :  { %645 = vrot.lane.b32.xlu2 %v2325_v62, %s2590_s4 }
 0x6c2   :  { %v646_v54 = vpop.permute.xlu2 %645 }
 0x6c3   :  { %v683_v59 = vpop.permute.xlu0 %682  ;;  %v648_v63 = vmul.f32 %v646_v54, %v629_v44 }
 0x6c4   :  { %v685_v58 = vmul.f32 %v683_v59, %v666_v26 }
 0x6c5   :  { %687 = vrot.lane.b32.xlu1 %v648_v63, %s2591_s22 }
 0x6c6   :  { %692 = vrot.lane.b32.xlu2 %v685_v58, %s2590_s4 }
 0x720   :  { %v693_v0 = vpop.permute.xlu2 %692 }
 0x721   :  { %695 = vst.msk [vmem:[#allocation4 + $0x28] sm:$0xff] %vm398_vm10, %v693_v0 }
 0x737   :  { %v688_v57 = vpop.permute.xlu1 %687 }
 0x738   :  { %690 = vst.msk [vmem:[#allocation4 + $0x10] sm:$0xff] %vm392_vm9, %v688_v57  ;;  %v696_v2 = vsel %vm392_vm9, %v688_v57, %v693_v0  ;;  %v175_v57 = vpop.f32.mrf.mxu0 }
 0x739   :  { %2213 = vmatmul.msk.f32.vlgmr.msrb.gmra.mxu2 %vm266_vm11, %v696_v2  ;;  %2214 = vmatmul.msk.f32.vlgmr.msra.gmra.mxu3 %vm266_vm11, %v696_v2  ;;  %v176_v2 = vadd.f32 %v2884_v34, %v175_v57  ;;  %v1001_v57 = vld [vmem:[%s3300_s5 + $0x40] sm:$0xff] }
 0x7bc   :  { %v733_v3 = vpop.f32.mrf.mxu2  ;;  %v753_v5 = vpop.f32.mrf.mxu3 }
 0x7bd   :  { %v757_v6 = vadd.f32 %v733_v3, %v173_v1  ;;  %v759_v9 = vadd.f32 %v753_v5, %v2894_v46 }
 0x7bf   :  { %2326 = vtanh.f32 %v757_v6  ;;  %v2215_v14 = vmul.f32 -1.442695, %v757_v6  ;;  %v2216_v15 = vmul.f32 -1.442695, %v759_v9 }
 0x7c0   :  { %2328 = vtanh.f32 %v759_v9 }
 0x7c1   :  { %2330 = vpow2.f32 %v2215_v14 }
 0x7c2   :  { %2332 = vpow2.f32 %v2216_v15 }
 0x7c5   :  { %v2327_v10 = vpop.eup %2326 }
 0x7c6   :  { %v2329_v12 = vpop.eup %2328  ;;  %782 = vrot.lane.b32.xlu0 %v2327_v10, %s2590_s4 }
 0x7c7   :  { %819 = vrot.lane.b32.xlu1 %v2329_v12, %s2590_s4  ;;  %v2331_v16 = vpop.eup %2330 }
 0x7c8   :  { %v2333_v17 = vpop.eup %2332  ;;  %v763_v18 = vadd.f32 1.0, %v2331_v16 }
 0x7c9   :  { %v800_v20 = vadd.f32 1.0, %v2333_v17 }
 0x7ca   :  { %2334 = vrcp.f32 %v763_v18  ;;  %v775_v19 = vand.u32 2147483648, %v763_v18  ;;  %vm769_vm1 = vweird.f32 %v763_v18  ;;  %v773_v26 = vand.u32 2147483647, %v763_v18 }
 0x7cb   :  { %2336 = vrcp.f32 %v800_v20  ;;  %v812_v22 = vand.u32 2147483648, %v800_v20  ;;  %vm806_vm2 = vweird.f32 %v800_v20  ;;  %v810_v27 = vand.u32 2147483647, %v800_v20 }
 0x7cc   :  { %v776_v30 = vor.u32 1.1754944e-38, %v775_v19  ;;  %vm774_vm5 = vcmp.eq.f32.partialorder %v773_v26, 8.507059e+37 }
 0x7cd   :  { %v813_v32 = vor.u32 1.1754944e-38, %v812_v22  ;;  %vm811_vm6 = vcmp.eq.f32.partialorder %v810_v27, 8.507059e+37 }
 0x7d0   :  { %v2335_v23 = vpop.eup %2334 }
 0x7d1   :  { %v2337_v46 = vpop.eup %2336  ;;  %v765_v24 = vmul.f32 %v2335_v23, %v763_v18  ;;  %vm770_vm15 = vweird.f32 %v2335_v23 }
 0x7d2   :  { %v802_v25 = vmul.f32 %v2337_v46, %v800_v20  ;;  %vm807_vm0 = vweird.f32 %v2337_v46  ;;  %vm771_vm3 = vmor %vm769_vm1, %vm770_vm15 }
 0x7d3   :  { %v766_v49 = vsub.f32 1.0, %v765_v24  ;;  %vm808_vm4 = vmor %vm806_vm2, %vm807_vm0 }
 0x7d4   :  { %v803_v52 = vsub.f32 1.0, %v802_v25 }
 0x7d5   :  { %v767_v7 = vmul.f32 %v2335_v23, %v766_v49 }
 0x7d6   :  { %v804_v8 = vmul.f32 %v2337_v46, %v803_v52 }
 0x7d7   :  { %v768_v11 = vadd.f32 %v2335_v23, %v767_v7 }
 0x7d8   :  { %v805_v13 = vadd.f32 %v2337_v46, %v804_v8 }
 0x7d9   :  { %v772_v28 = vsel %vm771_vm3, %v2335_v23, %v768_v11 }
 0x7da   :  { %v809_v29 = vsel %vm808_vm4, %v2337_v46, %v805_v13  ;;  %v777_v36 = vsel %vm774_vm5, %v776_v30, %v772_v28 }
 0x7db   :  { %v814_v39 = vsel %vm811_vm6, %v813_v32, %v809_v29  ;;  %v780_v44 = vmul.f32 %v777_v36, %v2973_v61 }
 0x7dc   :  { %v817_v55 = vmul.f32 %v814_v39, %v2968_v53 }
 0x838   :  { %v783_v35 = vpop.permute.xlu0 %782 }
 0x839   :  { %v820_v37 = vpop.permute.xlu1 %819  ;;  %v785_v40 = vmul.f32 %v783_v35, %v777_v36 }
 0x83a   :  { %v822_v41 = vmul.f32 %v820_v37, %v814_v39 }
 0x83b   :  { %787 = vrot.lane.b32.xlu2 %v785_v40, %s2591_s22 }
 0x83c   :  { %824 = vrot.lane.b32.xlu0 %v822_v41, %s2591_s22 }
 0x895   :  { %v788_v45 = vpop.permute.xlu2 %787 }
 0x896   :  { %v2991_v48 = vadd.f32 %v788_v45, %v780_v44 }
 0x898   :  { %2338 = vtanh.f32 %v2991_v48 }
 0x89e   :  { %v2339_v51 = vpop.eup %2338 }
 0x89f   :  { %793 = vrot.lane.b32.xlu1 %v2339_v51, %s2590_s4 }
 0x8ae   :  { %v825_v56 = vpop.permute.xlu0 %824 }
 0x8af   :  { %v2996_v60 = vadd.f32 %v825_v56, %v817_v55 }
 0x8b1   :  { %2340 = vtanh.f32 %v2996_v60 }
 0x8b7   :  { %v2341_v62 = vpop.eup %2340 }
 0x8b8   :  { %830 = vrot.lane.b32.xlu2 %v2341_v62, %s2590_s4 }
 0x911   :  { %v794_v54 = vpop.permute.xlu1 %793 }
 0x912   :  { %v831_v61 = vpop.permute.xlu2 %830  ;;  %v796_v59 = vmul.f32 %v794_v54, %v777_v36 }
 0x913   :  { %v833_v63 = vmul.f32 %v831_v61, %v814_v39  ;;  %v1007_v61 = vld [vmem:[%s3300_s5 + $0x70] sm:$0xff] }
 0x914   :  { %835 = vrot.lane.b32.xlu0 %v796_v59, %s2591_s22  ;;  %v1008_v59 = vld [vmem:[%s3300_s5 + $0x78] sm:$0xff]  ;;  %1020 = vmatpush.msra.mxu2 %v1007_v61 }
 0x915   :  { %840 = vrot.lane.b32.xlu1 %v833_v63, %s2590_s4  ;;  %v1005_v63 = vld [vmem:[%s3300_s5 + $0x60] sm:$0xff]  ;;  %1040 = vmatpush.msrb.mxu3 %v1008_v59 }
 0x916   :  { %1168 = vmatpush.msra.mxu0 %v1007_v61  ;;  %1188 = vmatpush.msra.mxu1 %v1008_v59 }
 0x917   :  { %1021 = vmatpush.msra.mxu2 %v1005_v63 }
 0x918   :  { %1169 = vmatpush.msra.mxu0 %v1005_v63 }
 0x986   :  { %v836_v58 = vpop.permute.xlu0 %835 }
 0x987   :  { %838 = vst.msk [vmem:[#allocation4 + $0x18] sm:$0xff] %vm392_vm9, %v836_v58  ;;  %v841_v53 = vpop.permute.xlu1 %840 }
 0x988   :  { %843 = vst.msk [vmem:[#allocation4 + $0x20] sm:$0xff] %vm398_vm10, %v841_v53  ;;  %v844_v0 = vsel %vm392_vm9, %v836_v58, %v841_v53  ;;  %v1006_v58 = vld [vmem:[%s3300_s5 + $0x68] sm:$0xff]  ;;  %v1003_v53 = vld [vmem:[%s3300_s5 + $0x50] sm:$0xff] }
 0x989   :  { %2217 = vmatmul.msk.f32.vlgmr.msrb.gmra.mxu0 %vm266_vm11, %v844_v0  ;;  %2218 = vmatmul.msk.f32.vlgmr.msrb.gmra.mxu1 %vm266_vm11, %v844_v0  ;;  %v1004_v0 = vld [vmem:[%s3300_s5 + $0x58] sm:$0xff] }
 0x98a   :  { %1041 = vmatpush.msrb.mxu3 %v1006_v58  ;;  %1189 = vmatpush.msra.mxu1 %v1006_v58 }
 0x98b   :  { %1022 = vmatpush.msra.mxu2 %v1003_v53  ;;  %1170 = vmatpush.msra.mxu0 %v1003_v53 }
 0x98c   :  { %1042 = vmatpush.msrb.mxu3 %v1004_v0  ;;  %1190 = vmatpush.msra.mxu1 %v1004_v0 }
 0x98d   :  { %1023 = vmatpush.msra.mxu2 %v1001_v57  ;;  %1171 = vmatpush.msra.mxu0 %v1001_v57 }
 0xa06   :  { %v881_v4 = vpop.f32.mrf.mxu0  ;;  %v901_v1 = vpop.f32.mrf.mxu1 }
 0xa07   :  { %v905_v3 = vadd.f32 %v881_v4, %v176_v2  ;;  %v907_v5 = vadd.f32 %v901_v1, %v2889_v42  ;;  %v1002_v2 = vld [vmem:[%s3300_s5 + $0x48] sm:$0xff]  ;;  %v999_v4 = vld [vmem:[%s3300_s5 + $0x30] sm:$0xff]  ;;  %v1000_v1 = vld [vmem:[%s3300_s5 + $0x38] sm:$0xff] }
 0xa08   :  { %1043 = vmatpush.msrb.mxu3 %v1002_v2  ;;  %1191 = vmatpush.msra.mxu1 %v1002_v2 }
 0xa09   :  { %2342 = vtanh.f32 %v905_v3  ;;  %v2219_v10 = vmul.f32 -1.442695, %v905_v3  ;;  %v2220_v16 = vmul.f32 -1.442695, %v907_v5  ;;  %v997_v3 = vld [vmem:[%s3300_s5 + $0x20] sm:$0xff]  ;;  %1024 = vmatpush.msra.mxu2 %v999_v4  ;;  %1172 = vmatpush.msra.mxu0 %v999_v4 }
 0xa0a   :  { %2344 = vtanh.f32 %v907_v5  ;;  %v998_v5 = vld [vmem:[%s3300_s5 + $0x28] sm:$0xff]  ;;  %1044 = vmatpush.msrb.mxu3 %v1000_v1  ;;  %1192 = vmatpush.msra.mxu1 %v1000_v1 }
 0xa0b   :  { %2346 = vpow2.f32 %v2219_v10  ;;  %1025 = vmatpush.msra.mxu2 %v997_v3  ;;  %1173 = vmatpush.msra.mxu0 %v997_v3  ;;  %v993_v10 = vld [vmem:[%s3300_s5] sm:$0xff] }
 0xa0c   :  { %1045 = vmatpush.msrb.mxu3 %v998_v5  ;;  %1193 = vmatpush.msra.mxu1 %v998_v5 }
 0xa0f   :  { %v2343_v6 = vpop.eup %2342 }
 0xa10   :  { %v2345_v9 = vpop.eup %2344  ;;  %930 = vrot.lane.b32.xlu2 %v2343_v6, %s2590_s4  ;;  %v995_v6 = vld [vmem:[%s3300_s5 + $0x10] sm:$0xff] }
 0xa11   :  { %967 = vrot.lane.b32.xlu0 %v2345_v9, %s2590_s4  ;;  %v2347_v12 = vpop.eup %2346  ;;  %v996_v9 = vld [vmem:[%s3300_s5 + $0x18] sm:$0xff]  ;;  %1026 = vmatpush.msra.mxu2 %v995_v6 }
 0xa12   :  { %v911_v14 = vadd.f32 1.0, %v2347_v12  ;;  %1046 = vmatpush.msrb.mxu3 %v996_v9  ;;  %1174 = vmatpush.msra.mxu0 %v995_v6  ;;  %v994_v12 = vld [vmem:[%s3300_s5 + $0x8] sm:$0xff] }
 0xa13   :  { %1194 = vmatpush.msra.mxu1 %v996_v9  ;;  %1027 = vmatpush.msra.mxu2 %v993_v10 }
 0xa14   :  { %2348 = vrcp.f32 %v911_v14  ;;  %v923_v24 = vand.u32 2147483648, %v911_v14  ;;  %vm917_vm8 = vweird.f32 %v911_v14  ;;  %v921_v25 = vand.u32 2147483647, %v911_v14  ;;  %1047 = vmatpush.msrb.mxu3 %v994_v12  ;;  %1175 = vmatpush.msra.mxu0 %v993_v10 }
 0xa15   :  { %2350 = vpow2.f32 %v2220_v16  ;;  %1195 = vmatpush.msra.mxu1 %v994_v12  ;;  %1316 = vmatpush.msrb.mxu2 %v1007_v61 }
 0xa16   :  { %v924_v52 = vor.u32 1.1754944e-38, %v923_v24  ;;  %vm922_vm13 = vcmp.eq.f32.partialorder %v921_v25, 8.507059e+37  ;;  %1336 = vmatpush.msra.mxu3 %v1008_v59 }
 0xa17   :  { %1317 = vmatpush.msrb.mxu2 %v1005_v63 }
 0xa18   :  { %1337 = vmatpush.msra.mxu3 %v1006_v58 }
 0xa19   :  { %1318 = vmatpush.msrb.mxu2 %v1003_v53 }
 0xa1a   :  { %v2349_v15 = vpop.eup %2348  ;;  %1338 = vmatpush.msra.mxu3 %v1004_v0 }
 0xa1b   :  { %v913_v17 = vmul.f32 %v2349_v15, %v911_v14  ;;  %v2351_v42 = vpop.eup %2350  ;;  %vm918_vm7 = vweird.f32 %v2349_v15  ;;  %1319 = vmatpush.msrb.mxu2 %v1001_v57 }
 0xa1c   :  { %v948_v23 = vadd.f32 1.0, %v2351_v42  ;;  %vm919_vm12 = vmor %vm917_vm8, %vm918_vm7  ;;  %1339 = vmatpush.msra.mxu3 %v1002_v2 }
 0xa1d   :  { %v914_v18 = vsub.f32 1.0, %v913_v17  ;;  %1320 = vmatpush.msrb.mxu2 %v999_v4  ;;  %v179_v17 = vadd.f32 %v2884_v34, %v2891_v43 }
 0xa1e   :  { %2352 = vrcp.f32 %v948_v23  ;;  %v960_v28 = vand.u32 2147483648, %v948_v23  ;;  %vm954_vm15 = vweird.f32 %v948_v23  ;;  %v958_v29 = vand.u32 2147483647, %v948_v23  ;;  %1340 = vmatpush.msra.mxu3 %v1000_v1 }
 0xa1f   :  { %v915_v20 = vmul.f32 %v2349_v15, %v914_v18  ;;  %1321 = vmatpush.msrb.mxu2 %v997_v3 }
 0xa20   :  { %v961_v32 = vor.u32 1.1754944e-38, %v960_v28  ;;  %vm959_vm1 = vcmp.eq.f32.partialorder %v958_v29, 8.507059e+37  ;;  %1341 = vmatpush.msra.mxu3 %v998_v5 }
 0xa21   :  { %v916_v46 = vadd.f32 %v2349_v15, %v915_v20  ;;  %1322 = vmatpush.msrb.mxu2 %v995_v6  ;;  %v3105_v6 = vld [vmem:[%s3297_s2] ss:$0 sm:$0xff] }
 0xa22   :  { %1342 = vmatpush.msra.mxu3 %v996_v9  ;;  %v182_v9 = vadd.f32 %v3105_v6, %v2896_v47 }
 0xa23   :  { %v920_v49 = vsel %vm919_vm12, %v2349_v15, %v916_v46  ;;  %1323 = vmatpush.msrb.mxu2 %v993_v10 }
 0xa24   :  { %v925_v8 = vsel %vm922_vm13, %v924_v52, %v920_v49  ;;  %v2353_v13 = vpop.eup %2352  ;;  %1343 = vmatpush.msra.mxu3 %v994_v12 }
 0xa25   :  { %v950_v19 = vmul.f32 %v2353_v13, %v948_v23  ;;  %vm955_vm14 = vweird.f32 %v2353_v13  ;;  %v928_v39 = vmul.f32 %v925_v8, %v2991_v48 }
 0xa26   :  { %vm956_vm0 = vmor %vm954_vm15, %vm955_vm14 }
 0xa27   :  { %v951_v22 = vsub.f32 1.0, %v950_v19 }
 0xa29   :  { %v952_v26 = vmul.f32 %v2353_v13, %v951_v22 }
 0xa2b   :  { %v953_v27 = vadd.f32 %v2353_v13, %v952_v26 }
 0xa2d   :  { %v957_v30 = vsel %vm956_vm0, %v2353_v13, %v953_v27 }
 0xa2e   :  { %v962_v36 = vsel %vm959_vm1, %v961_v32, %v957_v30 }
 0xa2f   :  { %v965_v40 = vmul.f32 %v962_v36, %v2996_v60 }
 0xa6a   :  { %v931_v7 = vpop.permute.xlu2 %930 }
 0xa6b   :  { %v933_v11 = vmul.f32 %v931_v7, %v925_v8 }
 0xa6d   :  { %935 = vrot.lane.b32.xlu1 %v933_v11, %s2591_s22 }
 0xa83   :  { %v968_v35 = vpop.permute.xlu0 %967 }
 0xa84   :  { %v970_v37 = vmul.f32 %v968_v35, %v962_v36 }
 0xa86   :  { %972 = vrot.lane.b32.xlu2 %v970_v37, %s2591_s22 }
 0xadf   :  { %v936_v41 = vpop.permute.xlu1 %935 }
 0xae0   :  { %v973_v44 = vpop.permute.xlu2 %972  ;;  %v3015_v45 = vadd.f32 %v936_v41, %v928_v39 }
 0xae1   :  { %v3017_v51 = vadd.f32 %v973_v44, %v965_v40 }
 0xae2   :  { %2354 = vtanh.f32 %v3015_v45 }
 0xae3   :  { %2356 = vtanh.f32 %v3017_v51 }
 0xae8   :  { %v2355_v55 = vpop.eup %2354 }
 0xae9   :  { %v2357_v56 = vpop.eup %2356  ;;  %941 = vrot.lane.b32.xlu0 %v2355_v55, %s2590_s4 }
 0xaea   :  { %978 = vrot.lane.b32.xlu1 %v2357_v56, %s2590_s4 }
 0xb5b   :  { %v942_v62 = vpop.permute.xlu0 %941 }
 0xb5c   :  { %v979_v48 = vpop.permute.xlu1 %978  ;;  %v944_v54 = vmul.f32 %v942_v62, %v925_v8 }
 0xb5d   :  { %v981_v60 = vmul.f32 %v979_v48, %v962_v36 }
 0xb5e   :  { %983 = vrot.lane.b32.xlu2 %v944_v54, %s2591_s22 }
 0xb5f   :  { %988 = vrot.lane.b32.xlu0 %v981_v60, %s2590_s4 }
 0xbb8   :  { %v984_v14 = vpop.permute.xlu2 %983 }
 0xbb9   :  { %986 = vst.msk [vmem:[#allocation4 + $0x20] sm:$0xff] %vm392_vm9, %v984_v14 }
 0xbd1   :  { %v989_v15 = vpop.permute.xlu0 %988 }
 0xbd2   :  { %991 = vst.msk [vmem:[#allocation4 + $0x18] sm:$0xff] %vm398_vm10, %v989_v15  ;;  %v992_v16 = vsel %vm392_vm9, %v984_v14, %v989_v15 }
 0xbd3   :  { %2221 = vmatmul.msk.f32.vlgmr.msra.gmra.mxu2 %vm266_vm11, %v992_v16  ;;  %2222 = vmatmul.msk.f32.vlgmr.msrb.gmra.mxu3 %vm266_vm11, %v992_v16 }
 0xc56   :  { %v1029_v18 = vpop.f32.mrf.mxu2  ;;  %v1049_v20 = vpop.f32.mrf.mxu3 }
 0xc57   :  { %v1053_v42 = vadd.f32 %v1029_v18, %v179_v17  ;;  %v1055_v23 = vadd.f32 %v1049_v20, %v2887_v38 }
 0xc59   :  { %2358 = vtanh.f32 %v1053_v42  ;;  %v2224_v25 = vmul.f32 -1.442695, %v1055_v23  ;;  %v2223_v34 = vmul.f32 -1.442695, %v1053_v42 }
 0xc5a   :  { %2360 = vtanh.f32 %v1055_v23 }
 0xc5b   :  { %2362 = vpow2.f32 %v2224_v25 }
 0xc5f   :  { %v2359_v46 = vpop.eup %2358 }
 0xc60   :  { %v2361_v24 = vpop.eup %2360  ;;  %1078 = vrot.lane.b32.xlu1 %v2359_v46, %s2590_s4 }
 0xc61   :  { %1115 = vrot.lane.b32.xlu2 %v2361_v24, %s2590_s4  ;;  %v2363_v49 = vpop.eup %2362 }
 0xc62   :  { %v1096_v52 = vadd.f32 1.0, %v2363_v49 }
 0xc64   :  { %2364 = vrcp.f32 %v1096_v52  ;;  %v1108_v22 = vand.u32 2147483648, %v1096_v52  ;;  %vm1102_vm3 = vweird.f32 %v1096_v52  ;;  %v1106_v26 = vand.u32 2147483647, %v1096_v52 }
 0xc65   :  { %2366 = vpow2.f32 %v2223_v34 }
 0xc66   :  { %v1109_v28 = vor.u32 1.1754944e-38, %v1108_v22  ;;  %vm1107_vm5 = vcmp.eq.f32.partialorder %v1106_v26, 8.507059e+37 }
 0xc6a   :  { %v2365_v7 = vpop.eup %2364 }
 0xc6b   :  { %v1098_v43 = vmul.f32 %v2365_v7, %v1096_v52  ;;  %v2367_v11 = vpop.eup %2366  ;;  %vm1103_vm2 = vweird.f32 %v2365_v7 }
 0xc6c   :  { %v1059_v13 = vadd.f32 1.0, %v2367_v11  ;;  %vm1104_vm4 = vmor %vm1102_vm3, %vm1103_vm2 }
 0xc6d   :  { %v1099_v8 = vsub.f32 1.0, %v1098_v43 }
 0xc6e   :  { %2368 = vrcp.f32 %v1059_v13  ;;  %v1071_v41 = vand.u32 2147483648, %v1059_v13  ;;  %vm1065_vm7 = vweird.f32 %v1059_v13  ;;  %v1069_v44 = vand.u32 2147483647, %v1059_v13 }
 0xc6f   :  { %v1100_v38 = vmul.f32 %v2365_v7, %v1099_v8 }
 0xc70   :  { %v1072_v56 = vor.u32 1.1754944e-38, %v1071_v41  ;;  %vm1070_vm12 = vcmp.eq.f32.partialorder %v1069_v44, 8.507059e+37 }
 0xc71   :  { %v1101_v19 = vadd.f32 %v2365_v7, %v1100_v38 }
 0xc73   :  { %v1105_v27 = vsel %vm1104_vm4, %v2365_v7, %v1101_v19 }
 0xc74   :  { %v1110_v30 = vsel %vm1107_vm5, %v1109_v28, %v1105_v27  ;;  %v2369_v32 = vpop.eup %2368 }
 0xc75   :  { %v1061_v36 = vmul.f32 %v2369_v32, %v1059_v13  ;;  %vm1066_vm6 = vweird.f32 %v2369_v32  ;;  %v1113_v60 = vmul.f32 %v1110_v30, %v3017_v51 }
 0xc76   :  { %vm1067_vm8 = vmor %vm1065_vm7, %vm1066_vm6 }
 0xc77   :  { %v1062_v37 = vsub.f32 1.0, %v1061_v36 }
 0xc79   :  { %v1063_v39 = vmul.f32 %v2369_v32, %v1062_v37 }
 0xc7b   :  { %v1064_v40 = vadd.f32 %v2369_v32, %v1063_v39 }
 0xc7d   :  { %v1068_v55 = vsel %vm1067_vm8, %v2369_v32, %v1064_v40 }
 0xc7e   :  { %v1073_v48 = vsel %vm1070_vm12, %v1072_v56, %v1068_v55 }
 0xc7f   :  { %v1076_v58 = vmul.f32 %v1073_v48, %v3015_v45 }
 0xcbb   :  { %v1116_v29 = vpop.permute.xlu2 %1115 }
 0xcbc   :  { %v1118_v35 = vmul.f32 %v1116_v29, %v1110_v30 }
 0xcbe   :  { %1120 = vrot.lane.b32.xlu1 %v1118_v35, %s2591_s22 }
 0xcd2   :  { %v1079_v62 = vpop.permute.xlu1 %1078 }
 0xcd3   :  { %v1081_v54 = vmul.f32 %v1079_v62, %v1073_v48 }
 0xcd5   :  { %1083 = vrot.lane.b32.xlu0 %v1081_v54, %s2591_s22 }
 0xd30   :  { %v1121_v61 = vpop.permute.xlu1 %1120 }
 0xd31   :  { %v3086_v59 = vadd.f32 %v1121_v61, %v1113_v60 }
 0xd33   :  { %2370 = vtanh.f32 %v3086_v59 }
 0xd39   :  { %v2371_v63 = vpop.eup %2370 }
 0xd3a   :  { %1126 = vrot.lane.b32.xlu0 %v2371_v63, %s2590_s4 }
 0xd47   :  { %v1084_v53 = vpop.permute.xlu0 %1083 }
 0xd48   :  { %v3091_v0 = vadd.f32 %v1084_v53, %v1076_v58 }
 0xd4a   :  { %2372 = vtanh.f32 %v3091_v0 }
 0xd50   :  { %v2373_v57 = vpop.eup %2372 }
 0xd51   :  { %1089 = vrot.lane.b32.xlu2 %v2373_v57, %s2590_s4 }
 0xdab   :  { %v1090_v2 = vpop.permute.xlu2 %1089 }
 0xdac   :  { %v1127_v51 = vpop.permute.xlu0 %1126  ;;  %v1092_v4 = vmul.f32 %v1090_v2, %v1073_v48 }
 0xdad   :  { %v1129_v1 = vmul.f32 %v1127_v51, %v1110_v30 }
 0xdae   :  { %1131 = vrot.lane.b32.xlu1 %v1092_v4, %s2591_s22 }
 0xdaf   :  { %1136 = vrot.lane.b32.xlu2 %v1129_v1, %s2590_s4 }
 0xe09   :  { %v1137_v3 = vpop.permute.xlu2 %1136 }
 0xe0a   :  { %1139 = vst.msk [vmem:[#allocation4 + $0x10] sm:$0xff] %vm398_vm10, %v1137_v3 }
 0xe20   :  { %v1132_v45 = vpop.permute.xlu1 %1131 }
 0xe21   :  { %1134 = vst.msk [vmem:[#allocation4 + $0x28] sm:$0xff] %vm392_vm9, %v1132_v45  ;;  %v1140_v5 = vsel %vm392_vm9, %v1132_v45, %v1137_v3 }
 0xe22   :  { %2225 = vmatmul.msk.f32.vlgmr.msra.gmra.mxu0 %vm266_vm11, %v1140_v5  ;;  %2226 = vmatmul.msk.f32.vlgmr.msra.gmra.mxu1 %vm266_vm11, %v1140_v5 }
 0xe9f   :  { %v1177_v10 = vpop.f32.mrf.mxu0  ;;  %v1197_v12 = vpop.f32.mrf.mxu1 }
 0xea0   :  { %v1201_v14 = vadd.f32 %v1177_v10, %v182_v9  ;;  %v1203_v15 = vadd.f32 %v1197_v12, %v2879_v33 }
 0xea2   :  { %2374 = vtanh.f32 %v1201_v14  ;;  %v2227_v18 = vmul.f32 -1.442695, %v1201_v14  ;;  %v2228_v20 = vmul.f32 -1.442695, %v1203_v15 }
 0xea3   :  { %2376 = vtanh.f32 %v1203_v15 }
 0xea4   :  { %2378 = vpow2.f32 %v2227_v18 }
 0xea5   :  { %2380 = vpow2.f32 %v2228_v20 }
 0xea8   :  { %v2375_v16 = vpop.eup %2374 }
 0xea9   :  { %v2377_v17 = vpop.eup %2376  ;;  %1226 = vrot.lane.b32.xlu0 %v2375_v16, %s2590_s4 }
 0xeaa   :  { %1263 = vrot.lane.b32.xlu1 %v2377_v17, %s2590_s4  ;;  %v2379_v42 = vpop.eup %2378  ;;  %v185_v17 = vadd.f32 %v3105_v6, %v2900_v50 }
 0xeab   :  { %v2381_v23 = vpop.eup %2380  ;;  %v1207_v47 = vadd.f32 1.0, %v2379_v42 }
 0xeac   :  { %v1244_v46 = vadd.f32 1.0, %v2381_v23 }
 0xead   :  { %2382 = vrcp.f32 %v1207_v47  ;;  %v1219_v38 = vand.u32 2147483648, %v1207_v47  ;;  %vm1213_vm15 = vweird.f32 %v1207_v47  ;;  %v1217_v19 = vand.u32 2147483647, %v1207_v47 }
 0xeae   :  { %2384 = vrcp.f32 %v1244_v46  ;;  %v1256_v13 = vand.u32 2147483648, %v1244_v46  ;;  %vm1250_vm0 = vweird.f32 %v1244_v46  ;;  %v1254_v22 = vand.u32 2147483647, %v1244_v46 }
 0xeaf   :  { %v1220_v28 = vor.u32 1.1754944e-38, %v1219_v38  ;;  %vm1218_vm3 = vcmp.eq.f32.partialorder %v1217_v19, 8.507059e+37  ;;  %v1448_v38 = vld [vmem:[#allocation7 + $0x20] sm:$0xff] }
 0xeb0   :  { %v1257_v29 = vor.u32 1.1754944e-38, %v1256_v13  ;;  %vm1255_vm4 = vcmp.eq.f32.partialorder %v1254_v22, 8.507059e+37 }
 0xeb3   :  { %v2383_v24 = vpop.eup %2382 }
 0xeb4   :  { %v2385_v33 = vpop.eup %2384  ;;  %v1209_v25 = vmul.f32 %v2383_v24, %v1207_v47  ;;  %vm1214_vm13 = vweird.f32 %v2383_v24 }
 0xeb5   :  { %v1246_v49 = vmul.f32 %v2385_v33, %v1244_v46  ;;  %vm1251_vm14 = vweird.f32 %v2385_v33  ;;  %vm1215_vm1 = vmor %vm1213_vm15, %vm1214_vm13 }
 0xeb6   :  { %v1210_v52 = vsub.f32 1.0, %v1209_v25  ;;  %vm1252_vm2 = vmor %vm1250_vm0, %vm1251_vm14 }
 0xeb7   :  { %v1247_v7 = vsub.f32 1.0, %v1246_v49 }
 0xeb8   :  { %v1211_v34 = vmul.f32 %v2383_v24, %v1210_v52 }
 0xeb9   :  { %v1248_v43 = vmul.f32 %v2385_v33, %v1247_v7  ;;  %v1451_v7 = vld [vmem:[#allocation7 + $0x38] sm:$0xff] }
 0xeba   :  { %v1212_v8 = vadd.f32 %v2383_v24, %v1211_v34  ;;  %v1450_v34 = vld [vmem:[#allocation7 + $0x30] sm:$0xff]  ;;  %1488 = vmatpush.msrb.mxu0 %v1451_v7  ;;  %v1534_v7 = vld [vmem:[#allocation9 + $0x20] sm:$0xff] }
 0xebb   :  { %v1249_v11 = vadd.f32 %v2385_v33, %v1248_v43  ;;  %v3135_v43 = vld [vmem:[#allocation10 + $0x30] sm:$0xff] }
 0xebc   :  { %v1216_v26 = vsel %vm1215_vm1, %v2383_v24, %v1212_v8  ;;  %1654 = vmatpush.msrb.mxu3 %v3135_v43  ;;  %v3138_v8 = vld [vmem:[#allocation10 + $0x20] sm:$0xff]  ;;  %1489 = vmatpush.msrb.mxu0 %v1450_v34  ;;  %v1533_v34 = vld [vmem:[#allocation9 + $0x18] sm:$0xff] }
 0xebd   :  { %v1253_v27 = vsel %vm1252_vm2, %v2385_v33, %v1249_v11  ;;  %v1221_v32 = vsel %vm1218_vm3, %v1220_v28, %v1216_v26  ;;  %v1449_v11 = vld [vmem:[#allocation7 + $0x28] sm:$0xff] }
 0xebe   :  { %v1258_v36 = vsel %vm1255_vm4, %v1257_v29, %v1253_v27  ;;  %v1224_v40 = vmul.f32 %v1221_v32, %v3091_v0  ;;  %1655 = vmatpush.msrb.mxu3 %v3138_v8  ;;  %1490 = vmatpush.msrb.mxu0 %v1449_v11  ;;  %v1532_v11 = vld [vmem:[#allocation9 + $0x10] sm:$0xff] }
 0xebf   :  { %v1261_v56 = vmul.f32 %v1258_v36, %v3086_v59 }
 0xec0   :  { %1491 = vmatpush.msrb.mxu0 %v1448_v38  ;;  %v1531_v38 = vld [vmem:[#allocation9 + $0x8] sm:$0xff] }
 0xf1b   :  { %v1227_v30 = vpop.permute.xlu0 %1226 }
 0xf1c   :  { %v1264_v35 = vpop.permute.xlu1 %1263  ;;  %v1229_v37 = vmul.f32 %v1227_v30, %v1221_v32 }
 0xf1d   :  { %v1266_v39 = vmul.f32 %v1264_v35, %v1258_v36 }
 0xf1e   :  { %1231 = vrot.lane.b32.xlu2 %v1229_v37, %s2591_s22 }
 0xf1f   :  { %1268 = vrot.lane.b32.xlu0 %v1266_v39, %s2591_s22 }
 0xf78   :  { %v1232_v41 = vpop.permute.xlu2 %1231 }
 0xf79   :  { %v3115_v44 = vadd.f32 %v1232_v41, %v1224_v40  ;;  %v3146_v41 = vld [vmem:[#allocation10 + $0x10] sm:$0xff] }
 0xf7a   :  { %1656 = vmatpush.msrb.mxu3 %v3146_v41 }
 0xf7b   :  { %2386 = vtanh.f32 %v3115_v44 }
 0xf81   :  { %v2387_v55 = vpop.eup %2386 }
 0xf82   :  { %1237 = vrot.lane.b32.xlu1 %v2387_v55, %s2590_s4  ;;  %v1447_v55 = vld [vmem:[#allocation7 + $0x18] sm:$0xff] }
 0xf83   :  { %1492 = vmatpush.msrb.mxu0 %v1447_v55 }
 0xf91   :  { %v1269_v62 = vpop.permute.xlu0 %1268 }
 0xf92   :  { %v1271_v48 = vadd.f32 %v1269_v62, %v1261_v56  ;;  %v3148_v56 = vld [vmem:[#allocation10] sm:$0xff]  ;;  %v1446_v62 = vld [vmem:[#allocation7 + $0x10] sm:$0xff] }
 0xf93   :  { %1657 = vmatpush.msrb.mxu3 %v3148_v56  ;;  %1493 = vmatpush.msrb.mxu0 %v1446_v62 }
 0xf94   :  { %2388 = vtanh.f32 %v1271_v48 }
 0xf9a   :  { %v2389_v54 = vpop.eup %2388 }
 0xf9b   :  { %1274 = vrot.lane.b32.xlu2 %v2389_v54, %s2590_s4  ;;  %v1444_v54 = vld [vmem:[#allocation7] sm:$0xff] }
 0xff4   :  { %v1238_v60 = vpop.permute.xlu1 %1237 }
 0xff5   :  { %v1275_v61 = vpop.permute.xlu2 %1274  ;;  %v1240_v63 = vmul.f32 %v1238_v60, %v1221_v32 }
 0xff6   :  { %v1277_v58 = vmul.f32 %v1275_v61, %v1258_v36 }
 0xff7   :  { %1279 = vrot.lane.b32.xlu0 %v1240_v63, %s2591_s22  ;;  %v1438_v63 = vld [vmem:[#allocation4 + $0x10] sm:$0xff] }
 0xff8   :  { %1284 = vrot.lane.b32.xlu1 %v1277_v58, %s2590_s4  ;;  %v1439_v58 = vld [vmem:[#allocation4 + $0x18] sm:$0xff] }
0x1069   :  { %v1280_v53 = vpop.permute.xlu0 %1279 }
0x106a   :  { %1282 = vst.msk [vmem:[#allocation4 + $0x30] sm:$0xff] %vm392_vm9, %v1280_v53  ;;  %v1285_v0 = vpop.permute.xlu1 %1284 }
0x106b   :  { %1287 = vst.msk [vmem:[#allocation4 + $0x8] sm:$0xff] %vm398_vm10, %v1285_v0  ;;  %v1288_v59 = vsel %vm392_vm9, %v1280_v53, %v1285_v0  ;;  %v1440_v53 = vld [vmem:[#allocation4 + $0x20] sm:$0xff]  ;;  %v1441_v0 = vld [vmem:[#allocation4 + $0x28] sm:$0xff] }
0x106c   :  { %2229 = vmatmul.msk.f32.vlgmr.msrb.gmra.mxu2 %vm266_vm11, %v1288_v59  ;;  %2230 = vmatmul.msk.f32.vlgmr.msra.gmra.mxu3 %vm266_vm11, %v1288_v59 }
0x106d   :  { %1846 = vmatpush.msra.mxu3 %v3135_v43 }
0x106f   :  { %1847 = vmatpush.msra.mxu3 %v3138_v8 }
0x1071   :  { %1848 = vmatpush.msra.mxu3 %v3146_v41  ;;  %v1442_v59 = vld [vmem:[#allocation4 + $0x30] sm:$0xff] }
0x1072   :  { %v1437_v61 = vld [vmem:[#allocation4 + $0x8] sm:$0xff] }
0x1073   :  { %1849 = vmatpush.msra.mxu3 %v3148_v56 }
0x1074   :  { %1658 = vmatmul.f32.vlgmr.msrb.gmra.mxu3 %v2589_v21 }
0x1075   :  { %2038 = vmatpush.msrb.mxu3 %v3135_v43 }
0x1077   :  { %2039 = vmatpush.msrb.mxu3 %v3138_v8 }
0x1079   :  { %2040 = vmatpush.msrb.mxu3 %v3146_v41 }
0x107b   :  { %2041 = vmatpush.msrb.mxu3 %v3148_v56 }
0x10ef   :  { %v1345_v57 = vpop.f32.mrf.mxu3 }
0x10f0   :  { %v1351_v2 = vadd.f32 %v1345_v57, %v2877_v31  ;;  %v1325_v31 = vpop.f32.mrf.mxu2  ;;  %v3172_v57 = vld [vmem:[%s3302_s7] ss:$0 sm:$0xff] }
0x10f1   :  { %v1349_v20 = vadd.f32 %v1325_v31, %v185_v17 }
0x10f2   :  { %2390 = vtanh.f32 %v1351_v2  ;;  %v2232_v4 = vmul.f32 -1.442695, %v1351_v2 }
0x10f3   :  { %v2231_v50 = vmul.f32 -1.442695, %v1349_v20 }
0x10f4   :  { %2392 = vpow2.f32 %v2232_v4 }
0x10f8   :  { %v2391_v51 = vpop.eup %2390 }
0x10f9   :  { %1411 = vrot.lane.b32.xlu2 %v2391_v51, %s2590_s4  ;;  %v1659_v51 = vpop.f32.mrf.mxu3 }
0x10fa   :  { %v2393_v1 = vpop.eup %2392 }
0x10fb   :  { %v1392_v3 = vadd.f32 1.0, %v2393_v1 }
0x10fd   :  { %2394 = vrcp.f32 %v1392_v3  ;;  %v1404_v14 = vand.u32 2147483648, %v1392_v3  ;;  %vm1398_vm6 = vweird.f32 %v1392_v3  ;;  %v1402_v15 = vand.u32 2147483647, %v1392_v3 }
0x10fe   :  { %2396 = vtanh.f32 %v1349_v20 }
0x10ff   :  { %v1405_v18 = vor.u32 1.1754944e-38, %v1404_v14  ;;  %vm1403_vm8 = vcmp.eq.f32.partialorder %v1402_v15, 8.507059e+37 }
0x1103   :  { %v2395_v45 = vpop.eup %2394 }
0x1104   :  { %v1394_v5 = vmul.f32 %v2395_v45, %v1392_v3  ;;  %vm1399_vm5 = vweird.f32 %v2395_v45  ;;  %v2397_v46 = vpop.eup %2396 }
0x1105   :  { %vm1400_vm7 = vmor %vm1398_vm6, %vm1399_vm5 }
0x1106   :  { %v1395_v9 = vsub.f32 1.0, %v1394_v5 }
0x1108   :  { %v1396_v10 = vmul.f32 %v2395_v45, %v1395_v9 }
0x110a   :  { %v1397_v12 = vadd.f32 %v2395_v45, %v1396_v10 }
0x110c   :  { %v1401_v16 = vsel %vm1400_vm7, %v2395_v45, %v1397_v12 }
0x110d   :  { %v1406_v23 = vsel %vm1403_vm8, %v1405_v18, %v1401_v16 }
0x110e   :  { %v1409_v24 = vmul.f32 %v1406_v23, %v1271_v48  ;;  %v1445_v48 = vld [vmem:[#allocation7 + $0x8] sm:$0xff] }
0x110f   :  { %1494 = vmatpush.msrb.mxu0 %v1445_v48 }
0x1111   :  { %1495 = vmatpush.msrb.mxu0 %v1444_v54 }
0x1153   :  { %v1412_v42 = vpop.permute.xlu2 %1411 }
0x1154   :  { %v1414_v47 = vmul.f32 %v1412_v42, %v1406_v23 }
0x1156   :  { %1416 = vrot.lane.b32.xlu0 %v1414_v47, %s2591_s22 }
0x115e   :  { %1374 = vrot.lane.b32.xlu0 %v2397_v46, %s2590_s4 }
0x11c8   :  { %v1417_v33 = vpop.permute.xlu0 %1416 }
0x11c9   :  { %v1419_v25 = vadd.f32 %v1417_v33, %v1409_v24 }
0x11cb   :  { %2398 = vtanh.f32 %v1419_v25 }
0x11cc   :  { %2400 = vpow2.f32 %v2231_v50  ;;  %v1537_v50 = vld [vmem:[#allocation9 + $0x38] sm:$0xff] }
0x11cd   :  { %1553 = vmatpush.msrb.mxu1 %v1537_v50 }
0x11d0   :  { %v1375_v36 = vpop.permute.xlu0 %1374 }
0x11d1   :  { %v2399_v49 = vpop.eup %2398 }
0x11d2   :  { %1422 = vrot.lane.b32.xlu1 %v2399_v49, %s2590_s4  ;;  %v2401_v6 = vpop.eup %2400 }
0x11d3   :  { %v1355_v52 = vadd.f32 1.0, %v2401_v6  ;;  %v1536_v6 = vld [vmem:[#allocation9 + $0x30] sm:$0xff] }
0x11d4   :  { %1554 = vmatpush.msrb.mxu1 %v1536_v6 }
0x11d5   :  { %2402 = vrcp.f32 %v1355_v52  ;;  %v1367_v30 = vand.u32 2147483648, %v1355_v52  ;;  %vm1361_vm13 = vweird.f32 %v1355_v52  ;;  %v1365_v32 = vand.u32 2147483647, %v1355_v52 }
0x11d7   :  { %v1368_v37 = vor.u32 1.1754944e-38, %v1367_v30  ;;  %vm1366_vm15 = vcmp.eq.f32.partialorder %v1365_v32, 8.507059e+37 }
0x11db   :  { %v2403_v13 = vpop.eup %2402 }
0x11dc   :  { %v1357_v19 = vmul.f32 %v2403_v13, %v1355_v52  ;;  %vm1362_vm12 = vweird.f32 %v2403_v13  ;;  %v1535_v52 = vld [vmem:[#allocation9 + $0x28] sm:$0xff] }
0x11dd   :  { %vm1363_vm14 = vmor %vm1361_vm13, %vm1362_vm12  ;;  %1555 = vmatpush.msrb.mxu1 %v1535_v52 }
0x11de   :  { %v1358_v22 = vsub.f32 1.0, %v1357_v19 }
0x11df   :  { %1556 = vmatpush.msrb.mxu1 %v1534_v7  ;;  %v1605_v7 = vld [vmem:[%s3306_s11 + $0x38] sm:$0xff] }
0x11e0   :  { %v1359_v26 = vmul.f32 %v2403_v13, %v1358_v22  ;;  %1627 = vmatpush.msra.mxu2 %v1605_v7 }
0x11e1   :  { %1557 = vmatpush.msrb.mxu1 %v1533_v34  ;;  %v1604_v34 = vld [vmem:[%s3306_s11 + $0x30] sm:$0xff] }
0x11e2   :  { %v1360_v28 = vadd.f32 %v2403_v13, %v1359_v26  ;;  %1628 = vmatpush.msra.mxu2 %v1604_v34 }
0x11e3   :  { %1558 = vmatpush.msrb.mxu1 %v1532_v11  ;;  %v1603_v11 = vld [vmem:[%s3306_s11 + $0x28] sm:$0xff] }
0x11e4   :  { %v1364_v35 = vsel %vm1363_vm14, %v2403_v13, %v1360_v28  ;;  %v1530_v13 = vld [vmem:[#allocation9] sm:$0xff]  ;;  %1629 = vmatpush.msra.mxu2 %v1603_v11 }
0x11e5   :  { %v3142_v39 = vsel %vm1366_vm15, %v1368_v37, %v1364_v35  ;;  %1559 = vmatpush.msrb.mxu1 %v1531_v38  ;;  %v2276_v35 = vld [vmem:[%s3304_s9] ss:$0 sm:$0xff] }
0x11e6   :  { %v1377_v40 = vmul.f32 %v1375_v36, %v3142_v39  ;;  %v1372_v45 = vmul.f32 %v3142_v39, %v3115_v44  ;;  %v1602_v38 = vld [vmem:[%s3306_s11 + $0x20] sm:$0xff] }
0x11e7   :  { %1560 = vmatpush.msrb.mxu1 %v1530_v13  ;;  %1630 = vmatpush.msra.mxu2 %v1602_v38 }
0x11e9   :  { %1718 = vmatpush.msra.mxu1 %v3135_v43  ;;  %1782 = vmatpush.msrb.mxu2 %v3135_v43 }
0x11eb   :  { %1719 = vmatpush.msra.mxu1 %v3138_v8  ;;  %1783 = vmatpush.msrb.mxu2 %v3138_v8 }
0x11ed   :  { %1720 = vmatpush.msra.mxu1 %v3146_v41  ;;  %1784 = vmatpush.msrb.mxu2 %v3146_v41 }
0x11ef   :  { %1721 = vmatpush.msra.mxu1 %v3148_v56  ;;  %1785 = vmatpush.msrb.mxu2 %v3148_v56 }
0x1244   :  { %v1423_v27 = vpop.permute.xlu1 %1422 }
0x1245   :  { %v1425_v29 = vmul.f32 %v1423_v27, %v1406_v23 }
0x1247   :  { %1432 = vrot.lane.b32.xlu2 %v1425_v29, %s2590_s4 }
0x124f   :  { %1379 = vrot.lane.b32.xlu2 %v1377_v40, %s2591_s22 }
0x12a1   :  { %v1433_v21 = vpop.permute.xlu2 %1432 }
0x12a2   :  { %1435 = vst.msk [vmem:[#allocation4] sm:$0xff] %vm398_vm10, %v1433_v21 }
0x12a9   :  { %v1436_v60 = vld [vmem:[#allocation4] sm:$0xff]  ;;  %v1380_v3 = vpop.permute.xlu2 %1379 }
0x12aa   :  { %2233 = vmatmul.msk.f32.vlgmr.msrb.gmra.mxu0 %vm266_vm11, %v1436_v60  ;;  %v1382_v5 = vadd.f32 %v1380_v3, %v1372_v45 }
0x12b2   :  { %2234 = vmatmul.msk.f32.gmra.mxu0 %vm266_vm11, %v1437_v61 }
0x12ba   :  { %2235 = vmatmul.msk.f32.gmra.mxu0 %vm266_vm11, %v1438_v63 }
0x12c2   :  { %2236 = vmatmul.msk.f32.gmra.mxu0 %vm266_vm11, %v1439_v58 }
0x12ca   :  { %2237 = vmatmul.msk.f32.gmra.mxu0 %vm266_vm11, %v1440_v53 }
0x12d2   :  { %2238 = vmatmul.msk.f32.gmra.mxu0 %vm266_vm11, %v1441_v0 }
0x12da   :  { %2239 = vmatmul.msk.f32.gmra.mxu0 %vm266_vm11, %v1442_v59 }
0x1327   :  { %v1497_v2 = vpop.f32.mrf.mxu0 }
0x1328   :  { %v1498_v4 = vadd.f32 %v3172_v57, %v1497_v2 }
0x132a   :  { %v1662_v1 = vadd.f32 %v1659_v51, %v1498_v4 }
0x132c   :  { %2404 = vtanh.f32 %v1662_v1  ;;  %v2244_v12 = vmul.f32 -1.442695, %v1662_v1 }
0x132d   :  { %2406 = vtanh.f32 %v1382_v5 }
0x132e   :  { %2408 = vpow2.f32 %v2244_v12 }
0x132f   :  { %v1500_v1 = vpop.f32.mrf.mxu0 }
0x1330   :  { %v1501_v3 = vadd.f32 %v3172_v57, %v1500_v1 }
0x1332   :  { %v2405_v9 = vpop.eup %2404 }
0x1333   :  { %1685 = vrot.lane.b32.xlu1 %v2405_v9, %s2590_s4  ;;  %v2407_v10 = vpop.eup %2406 }
0x1334   :  { %v2409_v14 = vpop.eup %2408 }
0x1335   :  { %v1666_v15 = vadd.f32 1.0, %v2409_v14 }
0x1337   :  { %2410 = vrcp.f32 %v1666_v15  ;;  %v1678_v44 = vand.u32 2147483648, %v1666_v15  ;;  %vm1672_vm0 = vweird.f32 %v1666_v15  ;;  %v1676_v42 = vand.u32 2147483647, %v1666_v15 }
0x1339   :  { %v1679_v47 = vor.u32 1.1754944e-38, %v1678_v44  ;;  %vm1677_vm2 = vcmp.eq.f32.partialorder %v1676_v42, 8.507059e+37 }
0x133b   :  { %1385 = vrot.lane.b32.xlu1 %v2407_v10, %s2590_s4 }
0x133d   :  { %v2411_v31 = vpop.eup %2410 }
0x133e   :  { %v1668_v16 = vmul.f32 %v2411_v31, %v1666_v15  ;;  %vm1673_vm10 = vweird.f32 %v2411_v31 }
0x133f   :  { %vm1674_vm1 = vmor %vm1672_vm0, %vm1673_vm10 }
0x1340   :  { %v1669_v17 = vsub.f32 1.0, %v1668_v16 }
0x1342   :  { %v1670_v18 = vmul.f32 %v2411_v31, %v1669_v17 }
0x1344   :  { %v1671_v20 = vadd.f32 %v2411_v31, %v1670_v18 }
0x1346   :  { %v1675_v23 = vsel %vm1674_vm1, %v2411_v31, %v1671_v20 }
0x1347   :  { %v1680_v24 = vsel %vm1677_vm2, %v1679_v47, %v1675_v23 }
0x1348   :  { %v1683_v19 = vmul.f32 0.0, %v1680_v24 }
0x13a5   :  { %v1686_v46 = vpop.permute.xlu1 %1685 }
0x13a6   :  { %v1688_v33 = vmul.f32 %v1686_v46, %v1680_v24 }
0x13a8   :  { %1690 = vrot.lane.b32.xlu0 %v1688_v33, %s2591_s22 }
0x13ad   :  { %v1386_v25 = vpop.permute.xlu1 %1385 }
0x13ae   :  { %v1388_v49 = vmul.f32 %v1386_v25, %v3142_v39 }
0x13b0   :  { %1427 = vrot.lane.b32.xlu0 %v1388_v49, %s2591_s22 }
0x141a   :  { %v1691_v22 = vpop.permute.xlu0 %1690 }
0x141b   :  { %v3186_v26 = vadd.f32 %v1691_v22, %v1683_v19 }
0x141d   :  { %2412 = vtanh.f32 %v3186_v26 }
0x1422   :  { %v1428_v27 = vpop.permute.xlu0 %1427 }
0x1423   :  { %v2413_v28 = vpop.eup %2412  ;;  %1430 = vst.msk [vmem:[#allocation4 + $0x38] sm:$0xff] %vm392_vm9, %v1428_v27 }
0x1424   :  { %1696 = vrot.lane.b32.xlu2 %v2413_v28, %s2590_s4 }
0x142a   :  { %v1443_v29 = vld [vmem:[#allocation4 + $0x38] sm:$0xff] }
0x142b   :  { %2240 = vmatmul.msk.f32.gmra.mxu0 %vm266_vm11, %v1443_v29  ;;  %2241 = vmatmul.msk.f32.vlgmr.msrb.gmra.mxu1 %vm266_vm11, %v1443_v29 }
0x142c   :  { %1910 = vmatpush.msrb.mxu1 %v3135_v43 }
0x142e   :  { %1911 = vmatpush.msrb.mxu1 %v3138_v8 }
0x1430   :  { %1912 = vmatpush.msrb.mxu1 %v3146_v41 }
0x1432   :  { %1913 = vmatpush.msrb.mxu1 %v3148_v56 }
0x147e   :  { %v1697_v30 = vpop.permute.xlu2 %1696 }
0x147f   :  { %v1699_v32 = vmul.f32 %v1697_v30, %v1680_v24 }
0x1481   :  { %1702 = vrot.lane.b32.xlu1 %v1699_v32, %s2591_s22 }
0x14a8   :  { %v1562_v36 = vpop.f32.mrf.mxu1 }
0x14a9   :  { %v1563_v37 = vadd.f32 %v2276_v35, %v1562_v36  ;;  %v1503_v35 = vpop.f32.mrf.mxu0 }
0x14aa   :  { %v1504_v36 = vadd.f32 %v3172_v57, %v1503_v35 }
0x14ab   :  { %2414 = vtanh.f32 %v1563_v37  ;;  %v2242_v40 = vmul.f32 -1.442695, %v1563_v37 }
0x14ad   :  { %2416 = vpow2.f32 %v2242_v40 }
0x14b1   :  { %v2415_v39 = vpop.eup %2414 }
0x14b2   :  { %1587 = vrot.lane.b32.xlu2 %v2415_v39, %s2590_s4 }
0x14b3   :  { %v2417_v55 = vpop.eup %2416 }
0x14b4   :  { %v1568_v62 = vadd.f32 1.0, %v2417_v55 }
0x14b6   :  { %2418 = vrcp.f32 %v1568_v62  ;;  %v1580_v58 = vand.u32 2147483648, %v1568_v62  ;;  %vm1574_vm3 = vweird.f32 %v1568_v62  ;;  %v1578_v53 = vand.u32 2147483647, %v1568_v62 }
0x14b8   :  { %v1581_v59 = vor.u32 1.1754944e-38, %v1580_v58  ;;  %vm1579_vm5 = vcmp.eq.f32.partialorder %v1578_v53, 8.507059e+37 }
0x14bc   :  { %v2419_v54 = vpop.eup %2418 }
0x14bd   :  { %v1570_v21 = vmul.f32 %v2419_v54, %v1568_v62  ;;  %vm1575_vm11 = vweird.f32 %v2419_v54 }
0x14be   :  { %vm1576_vm4 = vmor %vm1574_vm3, %vm1575_vm11 }
0x14bf   :  { %v1571_v60 = vsub.f32 1.0, %v1570_v21 }
0x14c1   :  { %v1572_v61 = vmul.f32 %v2419_v54, %v1571_v60 }
0x14c3   :  { %v1573_v63 = vadd.f32 %v2419_v54, %v1572_v61 }
0x14c5   :  { %v1577_v0 = vsel %vm1576_vm4, %v2419_v54, %v1573_v63 }
0x14c6   :  { %v1582_v51 = vsel %vm1579_vm5, %v1581_v59, %v1577_v0 }
0x14c7   :  { %v1585_v10 = vmul.f32 0.0, %v1582_v51 }
0x14f3   :  { %v1703_v48 = vpop.permute.xlu1 %1702 }
0x14f4   :  { %2245 = vmatmul.msk.f32.vlgmr.msra.gmra.mxu1 %vm392_vm9, %v1703_v48 }
0x14f5   :  { %2102 = vmatpush.msra.mxu1 %v3135_v43 }
0x14f7   :  { %2103 = vmatpush.msra.mxu1 %v3138_v8 }
0x14f9   :  { %2104 = vmatpush.msra.mxu1 %v3146_v41 }
0x14fb   :  { %2105 = vmatpush.msra.mxu1 %v3148_v56 }
0x150c   :  { %v1588_v2 = vpop.permute.xlu2 %1587 }
0x150d   :  { %v1590_v4 = vmul.f32 %v1588_v2, %v1582_v51 }
0x150f   :  { %1592 = vrot.lane.b32.xlu1 %v1590_v4, %s2591_s22 }
0x1571   :  { %v1723_v45 = vpop.f32.mrf.mxu1 }
0x1572   :  { %v1726_v5 = vadd.f32 %v1723_v45, %v1501_v3 }
0x1574   :  { %2420 = vtanh.f32 %v1726_v5  ;;  %v2246_v31 = vmul.f32 -1.442695, %v1726_v5  ;;  %v1506_v5 = vpop.f32.mrf.mxu0 }
0x157a   :  { %v2421_v9 = vpop.eup %2420 }
0x157b   :  { %1749 = vrot.lane.b32.xlu0 %v2421_v9, %s2590_s4  ;;  %v1507_v9 = vadd.f32 %v3172_v57, %v1506_v5 }
0x1581   :  { %v1593_v12 = vpop.permute.xlu1 %1592 }
0x1582   :  { %v1595_v14 = vadd.f32 %v1593_v12, %v1585_v10 }
0x1584   :  { %2422 = vtanh.f32 %v1595_v14 }
0x1585   :  { %2424 = vpow2.f32 %v2246_v31 }
0x158a   :  { %v2423_v15 = vpop.eup %2422 }
0x158b   :  { %1598 = vrot.lane.b32.xlu0 %v2423_v15, %s2590_s4  ;;  %v2425_v16 = vpop.eup %2424 }
0x158c   :  { %v1730_v17 = vadd.f32 1.0, %v2425_v16 }
0x158e   :  { %2426 = vrcp.f32 %v1730_v17  ;;  %v1742_v47 = vand.u32 2147483648, %v1730_v17  ;;  %vm1736_vm7 = vweird.f32 %v1730_v17  ;;  %v1740_v46 = vand.u32 2147483647, %v1730_v17 }
0x1590   :  { %v1743_v33 = vor.u32 1.1754944e-38, %v1742_v47  ;;  %vm1741_vm12 = vcmp.eq.f32.partialorder %v1740_v46, 8.507059e+37 }
0x1594   :  { %v2427_v18 = vpop.eup %2426 }
0x1595   :  { %v1732_v20 = vmul.f32 %v2427_v18, %v1730_v17  ;;  %vm1737_vm6 = vweird.f32 %v2427_v18 }
0x1596   :  { %vm1738_vm8 = vmor %vm1736_vm7, %vm1737_vm6 }
0x1597   :  { %v1733_v44 = vsub.f32 1.0, %v1732_v20 }
0x1599   :  { %v1734_v42 = vmul.f32 %v2427_v18, %v1733_v44 }
0x159b   :  { %v1735_v23 = vadd.f32 %v2427_v18, %v1734_v42 }
0x159d   :  { %v1739_v24 = vsel %vm1738_vm8, %v2427_v18, %v1735_v23 }
0x159e   :  { %v1744_v49 = vsel %vm1741_vm12, %v1743_v33, %v1739_v24 }
0x159f   :  { %v1747_v13 = vmul.f32 %v1744_v49, %v3186_v26 }
0x15ed   :  { %v1750_v25 = vpop.permute.xlu0 %1749 }
0x15ee   :  { %v1752_v50 = vmul.f32 %v1750_v25, %v1744_v49 }
0x15f0   :  { %1754 = vrot.lane.b32.xlu2 %v1752_v50, %s2591_s22 }
0x15fd   :  { %v1599_v6 = vpop.permute.xlu0 %1598 }
0x15fe   :  { %v1601_v52 = vmul.f32 %v1599_v6, %v1582_v51 }
0x1600   :  { %1611 = vrot.lane.b32.xlu2 %v1601_v52, %s2591_s22 }
0x164a   :  { %v1755_v19 = vpop.permute.xlu2 %1754 }
0x164b   :  { %v1757_v22 = vadd.f32 %v1755_v19, %v1747_v13  ;;  %v1509_v13 = vpop.f32.mrf.mxu0 }
0x164c   :  { %v1510_v19 = vadd.f32 %v3172_v57, %v1509_v13 }
0x164d   :  { %2428 = vtanh.f32 %v1757_v22 }
0x1653   :  { %v2429_v27 = vpop.eup %2428 }
0x1654   :  { %1760 = vrot.lane.b32.xlu1 %v2429_v27, %s2590_s4 }
0x165a   :  { %v1612_v28 = vpop.permute.xlu2 %1611 }
0x165b   :  { %2243 = vmatmul.msk.f32.vlgmr.msra.gmra.mxu2 %vm392_vm9, %v1612_v28 }
0x165c   :  { %1974 = vmatpush.msra.mxu2 %v3135_v43 }
0x165e   :  { %1975 = vmatpush.msra.mxu2 %v3138_v8 }
0x1660   :  { %1976 = vmatpush.msra.mxu2 %v3146_v41 }
0x1662   :  { %1977 = vmatpush.msra.mxu2 %v3148_v56 }
0x16c6   :  { %v1761_v29 = vpop.permute.xlu1 %1760 }
0x16c7   :  { %v1763_v30 = vmul.f32 %v1761_v29, %v1744_v49 }
0x16c9   :  { %1766 = vrot.lane.b32.xlu0 %v1763_v30, %s2591_s22 }
0x16de   :  { %v3238_v32 = vpop.f32.mrf.mxu2 }
0x173b   :  { %v1767_v26 = vpop.permute.xlu0 %1766 }
0x173c   :  { %2247 = vmatmul.msk.f32.vlgmr.msrb.gmra.mxu2 %vm392_vm9, %v1767_v26 }
0x17bf   :  { %v1787_v37 = vpop.f32.mrf.mxu2 }
0x17c0   :  { %v1790_v43 = vadd.f32 %v1787_v37, %v1504_v36 }
0x17c2   :  { %2430 = vtanh.f32 %v1790_v43  ;;  %v2248_v41 = vmul.f32 -1.442695, %v1790_v43 }
0x17c4   :  { %2432 = vpow2.f32 %v2248_v41 }
0x17c8   :  { %v2431_v8 = vpop.eup %2430 }
0x17c9   :  { %1813 = vrot.lane.b32.xlu1 %v2431_v8, %s2590_s4 }
0x17ca   :  { %v2433_v56 = vpop.eup %2432 }
0x17cb   :  { %v1794_v39 = vadd.f32 1.0, %v2433_v56 }
0x17cd   :  { %2434 = vrcp.f32 %v1794_v39  ;;  %v1806_v21 = vand.u32 2147483648, %v1794_v39  ;;  %vm1800_vm14 = vweird.f32 %v1794_v39  ;;  %v1804_v60 = vand.u32 2147483647, %v1794_v39 }
0x17cf   :  { %v1807_v63 = vor.u32 1.1754944e-38, %v1806_v21  ;;  %vm1805_vm10 = vcmp.eq.f32.partialorder %v1804_v60, 8.507059e+37 }
0x17d3   :  { %v2435_v40 = vpop.eup %2434 }
0x17d4   :  { %v1796_v55 = vmul.f32 %v2435_v40, %v1794_v39  ;;  %vm1801_vm13 = vweird.f32 %v2435_v40 }
0x17d5   :  { %vm1802_vm15 = vmor %vm1800_vm14, %vm1801_vm13 }
0x17d6   :  { %v1797_v62 = vsub.f32 1.0, %v1796_v55 }
0x17d8   :  { %v1798_v48 = vmul.f32 %v2435_v40, %v1797_v62 }
0x17da   :  { %v1799_v54 = vadd.f32 %v2435_v40, %v1798_v48 }
0x17dc   :  { %v1803_v61 = vsel %vm1802_vm15, %v2435_v40, %v1799_v54 }
0x17dd   :  { %v1808_v53 = vsel %vm1805_vm10, %v1807_v63, %v1803_v61 }
0x17de   :  { %v1811_v59 = vmul.f32 %v1808_v53, %v1757_v22 }
0x183b   :  { %v1814_v58 = vpop.permute.xlu1 %1813 }
0x183c   :  { %v1816_v0 = vmul.f32 %v1814_v58, %v1808_v53 }
0x183e   :  { %1818 = vrot.lane.b32.xlu2 %v1816_v0, %s2591_s22  ;;  %v1512_v0 = vpop.f32.mrf.mxu0 }
0x1898   :  { %v1819_v2 = vpop.permute.xlu2 %1818 }
0x1899   :  { %v1821_v51 = vadd.f32 %v1819_v2, %v1811_v59  ;;  %v1513_v59 = vadd.f32 %v3172_v57, %v1512_v0 }
0x189b   :  { %2436 = vtanh.f32 %v1821_v51 }
0x18a1   :  { %v2437_v4 = vpop.eup %2436 }
0x18a2   :  { %1824 = vrot.lane.b32.xlu0 %v2437_v4, %s2590_s4 }
0x1914   :  { %v1825_v1 = vpop.permute.xlu0 %1824 }
0x1915   :  { %v1827_v3 = vmul.f32 %v1825_v1, %v1808_v53 }
0x1917   :  { %1830 = vrot.lane.b32.xlu1 %v1827_v3, %s2591_s22 }
0x1989   :  { %v1831_v45 = vpop.permute.xlu1 %1830 }
0x198a   :  { %2249 = vmatmul.msk.f32.vlgmr.msra.gmra.mxu3 %vm392_vm9, %v1831_v45 }
0x1a0d   :  { %v1851_v10 = vpop.f32.mrf.mxu3 }
0x1a0e   :  { %v1854_v12 = vadd.f32 %v1851_v10, %v1507_v9 }
0x1a10   :  { %2438 = vtanh.f32 %v1854_v12  ;;  %v2250_v15 = vmul.f32 -1.442695, %v1854_v12 }
0x1a12   :  { %2440 = vpow2.f32 %v2250_v15 }
0x1a16   :  { %v2439_v14 = vpop.eup %2438 }
0x1a17   :  { %1877 = vrot.lane.b32.xlu2 %v2439_v14, %s2590_s4 }
0x1a18   :  { %v2441_v31 = vpop.eup %2440 }
0x1a19   :  { %v1858_v16 = vadd.f32 1.0, %v2441_v31 }
0x1a1b   :  { %2442 = vrcp.f32 %v1858_v16  ;;  %v1870_v23 = vand.u32 2147483648, %v1858_v16  ;;  %vm1864_vm1 = vweird.f32 %v1858_v16  ;;  %v1868_v47 = vand.u32 2147483647, %v1858_v16 }
0x1a1d   :  { %v1871_v24 = vor.u32 1.1754944e-38, %v1870_v23  ;;  %vm1869_vm11 = vcmp.eq.f32.partialorder %v1868_v47, 8.507059e+37 }
0x1a21   :  { %v2443_v17 = vpop.eup %2442 }
0x1a22   :  { %v1860_v18 = vmul.f32 %v2443_v17, %v1858_v16  ;;  %vm1865_vm0 = vweird.f32 %v2443_v17 }
0x1a23   :  { %vm1866_vm2 = vmor %vm1864_vm1, %vm1865_vm0 }
0x1a24   :  { %v1861_v20 = vsub.f32 1.0, %v1860_v18 }
0x1a26   :  { %v1862_v44 = vmul.f32 %v2443_v17, %v1861_v20 }
0x1a28   :  { %v1863_v42 = vadd.f32 %v2443_v17, %v1862_v44 }
0x1a2a   :  { %v1867_v46 = vsel %vm1866_vm2, %v2443_v17, %v1863_v42 }
0x1a2b   :  { %v1872_v25 = vsel %vm1869_vm11, %v1871_v24, %v1867_v46 }
0x1a2c   :  { %v1875_v50 = vmul.f32 %v1872_v25, %v1821_v51 }
0x1a71   :  { %v1878_v33 = vpop.permute.xlu2 %1877 }
0x1a72   :  { %v1880_v49 = vmul.f32 %v1878_v33, %v1872_v25 }
0x1a74   :  { %1882 = vrot.lane.b32.xlu0 %v1880_v49, %s2591_s22  ;;  %v1515_v49 = vpop.f32.mrf.mxu0 }
0x1ae6   :  { %v1883_v6 = vpop.permute.xlu0 %1882 }
0x1ae7   :  { %v1885_v52 = vadd.f32 %v1883_v6, %v1875_v50  ;;  %v1516_v50 = vadd.f32 %v3172_v57, %v1515_v49 }
0x1ae9   :  { %2444 = vtanh.f32 %v1885_v52 }
0x1aef   :  { %v2445_v7 = vpop.eup %2444 }
0x1af0   :  { %1888 = vrot.lane.b32.xlu1 %v2445_v7, %s2590_s4 }
0x1b62   :  { %v1889_v34 = vpop.permute.xlu1 %1888 }
0x1b63   :  { %v1891_v11 = vmul.f32 %v1889_v34, %v1872_v25 }
0x1b65   :  { %1894 = vrot.lane.b32.xlu2 %v1891_v11, %s2591_s22 }
0x1bbf   :  { %v1895_v38 = vpop.permute.xlu2 %1894 }
0x1bc0   :  { %2251 = vmatmul.msk.f32.vlgmr.msrb.gmra.mxu1 %vm392_vm9, %v1895_v38 }
0x1c3d   :  { %v1915_v22 = vpop.f32.mrf.mxu1 }
0x1c3e   :  { %v1918_v27 = vadd.f32 %v1915_v22, %v1510_v19 }
0x1c40   :  { %2446 = vtanh.f32 %v1918_v27  ;;  %v2252_v29 = vmul.f32 -1.442695, %v1918_v27 }
0x1c42   :  { %2448 = vpow2.f32 %v2252_v29 }
0x1c46   :  { %v2447_v28 = vpop.eup %2446 }
0x1c47   :  { %1941 = vrot.lane.b32.xlu0 %v2447_v28, %s2590_s4 }
0x1c48   :  { %v2449_v30 = vpop.eup %2448 }
0x1c49   :  { %v1922_v26 = vadd.f32 1.0, %v2449_v30 }
0x1c4b   :  { %2450 = vrcp.f32 %v1922_v26  ;;  %v1934_v41 = vand.u32 2147483648, %v1922_v26  ;;  %vm1928_vm4 = vweird.f32 %v1922_v26  ;;  %v1932_v56 = vand.u32 2147483647, %v1922_v26 }
0x1c4d   :  { %v1935_v40 = vor.u32 1.1754944e-38, %v1934_v41  ;;  %vm1933_vm6 = vcmp.eq.f32.partialorder %v1932_v56, 8.507059e+37 }
0x1c51   :  { %v2451_v35 = vpop.eup %2450 }
0x1c52   :  { %v1924_v36 = vmul.f32 %v2451_v35, %v1922_v26  ;;  %vm1929_vm3 = vweird.f32 %v2451_v35 }
0x1c53   :  { %vm1930_vm5 = vmor %vm1928_vm4, %vm1929_vm3  ;;  %vm2178_vm4 = vcmask 31744  }
0x1c54   :  { %v1925_v37 = vsub.f32 1.0, %v1924_v36 }
0x1c56   :  { %v1926_v43 = vmul.f32 %v2451_v35, %v1925_v37 }
0x1c58   :  { %v1927_v8 = vadd.f32 %v2451_v35, %v1926_v43 }
0x1c5a   :  { %v1931_v39 = vsel %vm1930_vm5, %v2451_v35, %v1927_v8 }
0x1c5b   :  { %v1936_v62 = vsel %vm1933_vm6, %v1935_v40, %v1931_v39 }
0x1c5c   :  { %v1939_v54 = vmul.f32 %v1936_v62, %v1885_v52 }
0x1cb9   :  { %v1942_v55 = vpop.permute.xlu0 %1941 }
0x1cba   :  { %v1944_v48 = vmul.f32 %v1942_v55, %v1936_v62 }
0x1cbc   :  { %1946 = vrot.lane.b32.xlu1 %v1944_v48, %s2591_s22  ;;  %v1518_v48 = vpop.f32.mrf.mxu0 }
0x1d2e   :  { %v1947_v21 = vpop.permute.xlu1 %1946 }
0x1d2f   :  { %v1949_v60 = vadd.f32 %v1947_v21, %v1939_v54  ;;  %v1519_v54 = vadd.f32 %v3172_v57, %v1518_v48 }
0x1d31   :  { %2452 = vtanh.f32 %v1949_v60 }
0x1d37   :  { %v2453_v61 = vpop.eup %2452 }
0x1d38   :  { %1952 = vrot.lane.b32.xlu2 %v2453_v61, %s2590_s4 }
0x1d92   :  { %v1953_v63 = vpop.permute.xlu2 %1952 }
0x1d93   :  { %v1955_v58 = vmul.f32 %v1953_v63, %v1936_v62 }
0x1d95   :  { %1958 = vrot.lane.b32.xlu0 %v1955_v58, %s2591_s22 }
0x1e07   :  { %v1959_v53 = vpop.permute.xlu0 %1958 }
0x1e08   :  { %2253 = vmatmul.msk.f32.vlgmr.msra.gmra.mxu2 %vm392_vm9, %v1959_v53 }
0x1e8b   :  { %v1979_v2 = vpop.f32.mrf.mxu2 }
0x1e8c   :  { %v1982_v51 = vadd.f32 %v1979_v2, %v1513_v59 }
0x1e8e   :  { %2454 = vtanh.f32 %v1982_v51  ;;  %v2254_v1 = vmul.f32 -1.442695, %v1982_v51 }
0x1e90   :  { %2456 = vpow2.f32 %v2254_v1 }
0x1e94   :  { %v2455_v4 = vpop.eup %2454 }
0x1e95   :  { %2005 = vrot.lane.b32.xlu1 %v2455_v4, %s2590_s4 }
0x1e96   :  { %v2457_v3 = vpop.eup %2456 }
0x1e97   :  { %v1986_v45 = vadd.f32 1.0, %v2457_v3 }
0x1e99   :  { %2458 = vrcp.f32 %v1986_v45  ;;  %v1998_v15 = vand.u32 2147483648, %v1986_v45  ;;  %vm1992_vm8 = vweird.f32 %v1986_v45  ;;  %v1996_v31 = vand.u32 2147483647, %v1986_v45 }
0x1e9b   :  { %v1999_v17 = vor.u32 1.1754944e-38, %v1998_v15  ;;  %vm1997_vm13 = vcmp.eq.f32.partialorder %v1996_v31, 8.507059e+37 }
0x1e9f   :  { %v2459_v5 = vpop.eup %2458 }
0x1ea0   :  { %v1988_v9 = vmul.f32 %v2459_v5, %v1986_v45  ;;  %vm1993_vm7 = vweird.f32 %v2459_v5 }
0x1ea1   :  { %vm1994_vm12 = vmor %vm1992_vm8, %vm1993_vm7 }
0x1ea2   :  { %v1989_v10 = vsub.f32 1.0, %v1988_v9 }
0x1ea4   :  { %v1990_v12 = vmul.f32 %v2459_v5, %v1989_v10 }
0x1ea6   :  { %v1991_v14 = vadd.f32 %v2459_v5, %v1990_v12 }
0x1ea8   :  { %v1995_v16 = vsel %vm1994_vm12, %v2459_v5, %v1991_v14 }
0x1ea9   :  { %v2000_v20 = vsel %vm1997_vm13, %v1999_v17, %v1995_v16  ;;  %v2151_v16 = vld [vmem:[%s3306_s11 + $0x18] sm:$0xff]  ;;  %v2150_v17 = vld [vmem:[%s3306_s11 + $0x10] sm:$0xff] }
0x1eaa   :  { %v2003_v42 = vmul.f32 %v2000_v20, %v1949_v60  ;;  %2169 = vmatpush.msrb.mxu2 %v2151_v16 }
0x1eac   :  { %2170 = vmatpush.msrb.mxu2 %v2150_v17 }
0x1f07   :  { %v2006_v18 = vpop.permute.xlu1 %2005 }
0x1f08   :  { %v2008_v44 = vmul.f32 %v2006_v18, %v2000_v20  ;;  %v2149_v18 = vld [vmem:[%s3306_s11 + $0x8] sm:$0xff] }
0x1f09   :  { %2171 = vmatpush.msrb.mxu2 %v2149_v18 }
0x1f0a   :  { %2010 = vrot.lane.b32.xlu2 %v2008_v44, %s2591_s22 }
0x1f64   :  { %v2011_v23 = vpop.permute.xlu2 %2010 }
0x1f65   :  { %v2013_v47 = vadd.f32 %v2011_v23, %v2003_v42 }
0x1f67   :  { %2460 = vtanh.f32 %v2013_v47 }
0x1f6d   :  { %v2461_v46 = vpop.eup %2460 }
0x1f6e   :  { %2016 = vrot.lane.b32.xlu0 %v2461_v46, %s2590_s4 }
0x1fe0   :  { %v2017_v24 = vpop.permute.xlu0 %2016 }
0x1fe1   :  { %v2019_v33 = vmul.f32 %v2017_v24, %v2000_v20  ;;  %v2148_v20 = vld [vmem:[%s3306_s11] sm:$0xff] }
0x1fe2   :  { %2172 = vmatpush.msrb.mxu2 %v2148_v20 }
0x1fe3   :  { %2022 = vrot.lane.b32.xlu1 %v2019_v33, %s2591_s22 }
0x2055   :  { %v2023_v25 = vpop.permute.xlu1 %2022 }
0x2056   :  { %2255 = vmatmul.msk.f32.vlgmr.msrb.gmra.mxu3 %vm392_vm9, %v2023_v25 }
0x20d9   :  { %v2043_v6 = vpop.f32.mrf.mxu3 }
0x20da   :  { %v2046_v52 = vadd.f32 %v2043_v6, %v1516_v50 }
0x20dc   :  { %2462 = vtanh.f32 %v2046_v52  ;;  %v2256_v34 = vmul.f32 -1.442695, %v2046_v52 }
0x20de   :  { %2464 = vpow2.f32 %v2256_v34 }
0x20e2   :  { %v2463_v7 = vpop.eup %2462 }
0x20e3   :  { %2069 = vrot.lane.b32.xlu2 %v2463_v7, %s2590_s4 }
0x20e4   :  { %v2465_v11 = vpop.eup %2464 }
0x20e5   :  { %v2050_v38 = vadd.f32 1.0, %v2465_v11 }
0x20e7   :  { %2466 = vrcp.f32 %v2050_v38  ;;  %v2062_v29 = vand.u32 2147483648, %v2050_v38  ;;  %vm2056_vm15 = vweird.f32 %v2050_v38  ;;  %v2060_v30 = vand.u32 2147483647, %v2050_v38 }
0x20e9   :  { %v2063_v35 = vor.u32 1.1754944e-38, %v2062_v29  ;;  %vm2061_vm0 = vcmp.eq.f32.partialorder %v2060_v30, 8.507059e+37 }
0x20ed   :  { %v2467_v13 = vpop.eup %2466 }
0x20ee   :  { %v2052_v19 = vmul.f32 %v2467_v13, %v2050_v38  ;;  %vm2057_vm14 = vweird.f32 %v2467_v13 }
0x20ef   :  { %vm2058_vm10 = vmor %vm2056_vm15, %vm2057_vm14 }
0x20f0   :  { %v2053_v22 = vsub.f32 1.0, %v2052_v19 }
0x20f2   :  { %v2054_v27 = vmul.f32 %v2467_v13, %v2053_v22 }
0x20f4   :  { %v2055_v28 = vadd.f32 %v2467_v13, %v2054_v27 }
0x20f6   :  { %v2059_v26 = vsel %vm2058_vm10, %v2467_v13, %v2055_v28 }
0x20f7   :  { %v2064_v37 = vsel %vm2061_vm0, %v2063_v35, %v2059_v26 }
0x20f8   :  { %v2067_v8 = vmul.f32 %v2064_v37, %v2013_v47  ;;  %v2277_v47 = vld [vmem:[%s3307_s12] ss:$0 sm:$0xff] }
0x20f9   :  { %v1633_v46 = vadd.f32 %v2277_v47, %v3238_v32 }
0x213d   :  { %v2070_v36 = vpop.permute.xlu2 %2069 }
0x213e   :  { %v2072_v43 = vmul.f32 %v2070_v36, %v2064_v37 }
0x2140   :  { %2074 = vrot.lane.b32.xlu0 %v2072_v43, %s2591_s22 }
0x21b2   :  { %v2075_v41 = vpop.permute.xlu0 %2074 }
0x21b3   :  { %v2077_v56 = vadd.f32 %v2075_v41, %v2067_v8 }
0x21b5   :  { %2468 = vtanh.f32 %v2077_v56 }
0x21bb   :  { %v2469_v39 = vpop.eup %2468 }
0x21bc   :  { %2080 = vrot.lane.b32.xlu1 %v2469_v39, %s2590_s4 }
0x222e   :  { %v2081_v40 = vpop.permute.xlu1 %2080 }
0x222f   :  { %v2083_v55 = vmul.f32 %v2081_v40, %v2064_v37 }
0x2231   :  { %2086 = vrot.lane.b32.xlu2 %v2083_v55, %s2591_s22 }
0x228b   :  { %v2087_v62 = vpop.permute.xlu2 %2086 }
0x228c   :  { %2257 = vmatmul.msk.f32.vlgmr.msra.gmra.mxu1 %vm392_vm9, %v2087_v62 }
0x2309   :  { %v2107_v21 = vpop.f32.mrf.mxu1 }
0x230a   :  { %v2110_v60 = vadd.f32 %v2107_v21, %v1519_v54 }
0x230c   :  { %2470 = vtanh.f32 %v2110_v60  ;;  %v2258_v63 = vmul.f32 -1.442695, %v2110_v60 }
0x230e   :  { %2472 = vpow2.f32 %v2258_v63 }
0x2312   :  { %v2471_v61 = vpop.eup %2470 }
0x2313   :  { %2133 = vrot.lane.b32.xlu0 %v2471_v61, %s2590_s4 }
0x2314   :  { %v2473_v58 = vpop.eup %2472 }
0x2315   :  { %v2114_v53 = vadd.f32 1.0, %v2473_v58 }
0x2317   :  { %2474 = vrcp.f32 %v2114_v53  ;;  %v2126_v1 = vand.u32 2147483648, %v2114_v53  ;;  %vm2120_vm2 = vweird.f32 %v2114_v53  ;;  %v2124_v57 = vand.u32 2147483647, %v2114_v53 }
0x2319   :  { %v2127_v45 = vor.u32 1.1754944e-38, %v2126_v1  ;;  %vm2125_vm3 = vcmp.eq.f32.partialorder %v2124_v57, 8.507059e+37 }
0x231d   :  { %v2475_v0 = vpop.eup %2474 }
0x231e   :  { %v2116_v59 = vmul.f32 %v2475_v0, %v2114_v53  ;;  %vm2121_vm1 = vweird.f32 %v2475_v0 }
0x231f   :  { %vm2122_vm11 = vmor %vm2120_vm2, %vm2121_vm1 }
0x2320   :  { %v2117_v2 = vsub.f32 1.0, %v2116_v59 }
0x2322   :  { %v2118_v51 = vmul.f32 %v2475_v0, %v2117_v2 }
0x2324   :  { %v2119_v4 = vadd.f32 %v2475_v0, %v2118_v51 }
0x2326   :  { %v2123_v3 = vsel %vm2122_vm11, %v2475_v0, %v2119_v4 }
0x2327   :  { %v2128_v9 = vsel %vm2125_vm3, %v2127_v45, %v2123_v3 }
0x2328   :  { %v2131_v12 = vmul.f32 %v2128_v9, %v2077_v56 }
0x2385   :  { %v2134_v5 = vpop.permute.xlu0 %2133 }
0x2386   :  { %v2136_v10 = vmul.f32 %v2134_v5, %v2128_v9 }
0x2388   :  { %2138 = vrot.lane.b32.xlu1 %v2136_v10, %s2591_s22 }
0x23fa   :  { %v2139_v14 = vpop.permute.xlu1 %2138 }
0x23fb   :  { %v2141_v15 = vadd.f32 %v2139_v14, %v2131_v12 }
0x23fd   :  { %2476 = vtanh.f32 %v2141_v15 }
0x2403   :  { %v2477_v31 = vpop.eup %2476 }
0x2404   :  { %2144 = vrot.lane.b32.xlu2 %v2477_v31, %s2590_s4 }
0x245e   :  { %v2145_v44 = vpop.permute.xlu2 %2144 }
0x245f   :  { %v2147_v42 = vmul.f32 %v2145_v44, %v2128_v9 }
0x2461   :  { %2153 = vrot.lane.b32.xlu0 %v2147_v42, %s2591_s22 }
0x24d3   :  { %v2154_v23 = vpop.permute.xlu0 %2153 }
0x24d4   :  { %2259 = vmatmul.msk.f32.vlgmr.msrb.gmra.mxu2 %vm392_vm9, %v2154_v23 }
0x2557   :  { %v2174_v24 = vpop.f32.mrf.mxu2 }
0x2558   :  { %v2177_v33 = vadd.f32 %v2174_v24, %v1633_v46 }
0x255a   :  { %2179 = vst.msk [vmem:[%s3308_s13] sm:$0xff] %vm2178_vm4, %v2177_v33 }
0x255b   :  { %2184 = vsyncpa [#allocation6], 1 }
0x255c   :  { %2185 = vsyncpa [#allocation8], 1 }
0x255d   :  { %2186 = vsyncpa [#allocation11], 1 }

</bundles_post_ra>
